<compile_context>
chip_gen: v5e
topology: v5e:2x2
jax: 0.10.0
libtpu: 0.0.40
codegen_flags: <defaults>
</compile_context>

<pallas_src>
import numpy as np
import jax
import jax.numpy as jnp
from jax.experimental import pallas as pl
from jax.experimental.pallas import tpu as pltpu

LOG2PI = float(np.log(2.0 * np.pi))


def _nll_kernel(x_ref, p_ref, bx_ref, dmu_ref, dls_ref, s2_ref, o_ref):
    # x_ref:   (tm, L)          observed latents
    # p_ref:   (tm, (2L+1)*n)   packed params: interleaved (mu, logsigma), then logits
    # bx_ref:  (L, L*n)         0/1: broadcast x over mixture components
    # dmu_ref: (2*L*n, L*n)     0/1: select mu (even) lanes -> dense lane l*n + k
    # dls_ref: (2*L*n, L*n)     0/1: select logsigma (odd) lanes -> dense lane l*n + k
    # s2_ref:  (L*n, n)         0/1: sum over latent per mixture component
    # o_ref:   (tm, 1)          negative log likelihood per row
    L = x_ref.shape[1]
    n = s2_ref.shape[1]
    C = 2 * L * n
    prec = jax.lax.Precision.HIGHEST

    loc = p_ref[:, :C]                                # (tm, C) interleaved mu/logsigma
    logit = p_ref[:, C:]                              # (tm, n)  mixture logits

    # De-interleave / broadcast on the otherwise idle MXU.  The selection
    # matrices are exact 0/1 and precision=HIGHEST keeps the f32 data intact.
    mu = jnp.dot(loc, dmu_ref[...], precision=prec,
                 preferred_element_type=jnp.float32)           # (tm, L*n)
    ls = jnp.dot(loc, dls_ref[...], precision=prec,
                 preferred_element_type=jnp.float32)           # (tm, L*n)
    xb = jnp.dot(x_ref[...], bx_ref[...], precision=prec,
                 preferred_element_type=jnp.float32)           # (tm, L*n)

    ls = jnp.clip(ls, -7.0, 5.0)                      # clip(-7, 5)
    z = (xb - mu) * jnp.exp(-ls)                      # (x - mu) / sigma, lane-dense
    val = 0.5 * z * z + ls                            # per-(latent, component) term

    # Sum over the latent dimension for every component (MXU again).
    half = jnp.dot(val, s2_ref[...], precision=prec,
                   preferred_element_type=jnp.float32)         # (tm, n)
    cmp_loglik = -(half + 0.5 * LOG2PI * L)           # (tm, n)

    # Fused log-softmax + logsumexp:
    #   nll = logsumexp(logit) - logsumexp(cmp_loglik + logit)
    t = cmp_loglik + logit
    tmax = jnp.max(t, axis=-1, keepdims=True)
    lse_t = tmax + jnp.log(jnp.sum(jnp.exp(t - tmax), axis=-1, keepdims=True))
    lmax = jnp.max(logit, axis=-1, keepdims=True)
    lse_l = lmax + jnp.log(jnp.sum(jnp.exp(logit - lmax), axis=-1, keepdims=True))
    o_ref[...] = lse_l - lse_t                        # (tm, 1)


def diagonal_normal_mixture_nll(x, params, n=16, tm=1024):
    """Pallas port of DiagonalNormalMixture(n).forward(x, params).

    x:      [..., latent]            float
    params: [..., (2*latent+1)*n]    float
    tm:     rows per grid step (tuning knob; multiple of 128; sweep 1024-4096,
            cap ~2048 on v5e's 16 MiB scoped-VMEM default).
    returns [...]                    float32 negative log likelihood
    """
    *lead, L = x.shape
    P = params.shape[-1]
    assert P == (2 * L + 1) * n, "params last dim must be (2*latent+1)*n"
    M = int(np.prod(lead)) if lead else 1
    xf = x.reshape(M, L).astype(jnp.float32)
    pf = params.reshape(M, P).astype(jnp.float32)

    # Effective row tile: a multiple of 128, no larger than needed.  Pad rows
    # of zeros (finite everywhere in the kernel) and slice them off afterwards.
    m128 = ((M + 127) // 128) * 128
    tm_eff = max(128, min((tm // 128) * 128, m128))
    Mp = ((M + tm_eff - 1) // tm_eff) * tm_eff
    if Mp != M:
        xf = jnp.pad(xf, ((0, Mp - M), (0, 0)))
        pf = jnp.pad(pf, ((0, Mp - M), (0, 0)))

    Ln = L * n
    C = 2 * Ln
    # Constant 0/1 selection matrices (built once on host, fetched once: their
    # block index never changes across grid steps).
    lane = np.arange(Ln)
    dmu = (np.arange(C)[:, None] == 2 * lane[None, :]).astype(np.float32)       # (C, Ln)
    dls = (np.arange(C)[:, None] == 2 * lane[None, :] + 1).astype(np.float32)   # (C, Ln)
    bx = (np.arange(L)[:, None] == (lane[None, :] // n)).astype(np.float32)     # (L, Ln)
    s2 = ((lane[:, None] % n) == np.arange(n)[None, :]).astype(np.float32)      # (Ln, n)

    out = pl.pallas_call(
        _nll_kernel,
        out_shape=jax.ShapeDtypeStruct((Mp, 1), jnp.float32),
        grid_spec=pltpu.PrefetchScalarGridSpec(
            num_scalar_prefetch=0,
            grid=(Mp // tm_eff,),
            in_specs=[
                pl.BlockSpec((tm_eff, L), lambda i: (i, 0)),
                pl.BlockSpec((tm_eff, P), lambda i: (i, 0)),
                pl.BlockSpec((L, Ln), lambda i: (0, 0)),
                pl.BlockSpec((C, Ln), lambda i: (0, 0)),
                pl.BlockSpec((C, Ln), lambda i: (0, 0)),
                pl.BlockSpec((Ln, n), lambda i: (0, 0)),
            ],
            out_specs=pl.BlockSpec((tm_eff, 1), lambda i: (i, 0)),
        ),
        compiler_params=pltpu.CompilerParams(
            dimension_semantics=("parallel",)),
    )(xf, pf, jnp.asarray(bx), jnp.asarray(dmu), jnp.asarray(dls), jnp.asarray(s2))

    out = out[:M, 0]
    return out.reshape(*lead) if lead else out.reshape(())


def _reference_nll(x, params, n=16):
    """Pure-JAX reference mirroring the PyTorch forward, for validation."""
    x = x[..., None]
    locscale = params[..., :-n]
    logitpi = params[..., -n:]
    ls = locscale.reshape(*params.shape[:-1], -1, n, 2)
    mu, logsigma = ls[..., 0], ls[..., 1]
    logsigma = jnp.clip(logsigma, -7, 5)
    cmp = ((x - mu) / jnp.exp(logsigma)) ** 2
    cmp = -0.5 * (cmp.sum(-2) + LOG2PI * x.shape[-2]) - logsigma.sum(-2)
    logpi = jax.nn.log_softmax(logitpi, axis=-1)
    return -jax.scipy.special.logsumexp(cmp + logpi, axis=-1)


if __name__ == "__main__":
    batch, time_steps, latent, n = 2, 64, 8, 16
    n_params = (2 * latent + 1) * n  # 272

    key = jax.random.PRNGKey(0)
    kx, kp = jax.random.split(key)
    x = jax.random.normal(kx, (batch, time_steps, latent), dtype=jnp.float32)
    params = 0.5 * jax.random.normal(kp, (batch, time_steps, n_params),
                                     dtype=jnp.float32)

    nll = diagonal_normal_mixture_nll(x, params, n=n)
    nll = jax.block_until_ready(nll)

    ref = _reference_nll(x, params, n=n)
    assert nll.shape == (batch, time_steps)
    np.testing.assert_allclose(np.asarray(nll), np.asarray(ref),
                               rtol=1e-4, atol=1e-4)
    print("KERNEL_OK")
</pallas_src>

<mosaic_0001>
module attributes {stable_mosaic.version = 11 : i64} {
  func.func @_nll_kernel(%arg0: i32, %arg1: memref<128x8xf32, #tpu.memory_space<vmem>>, %arg2: memref<128x272xf32, #tpu.memory_space<vmem>>, %arg3: memref<8x128xf32, #tpu.memory_space<vmem>>, %arg4: memref<256x128xf32, #tpu.memory_space<vmem>>, %arg5: memref<256x128xf32, #tpu.memory_space<vmem>>, %arg6: memref<128x16xf32, #tpu.memory_space<vmem>>, %arg7: memref<128x1xf32, #tpu.memory_space<vmem>>) attributes {dimension_semantics = [#tpu.dimension_semantics<parallel>], iteration_bounds = array<i64: 1>, scalar_prefetch = 0 : i64, scratch_operands = 0 : i64, tpu.core_type = #tpu.core_type<tc>, window_params = [{transform_indices = @transform_0, window_bounds = array<i64: 128, 8>}, {transform_indices = @transform_1, window_bounds = array<i64: 128, 272>}, {pipeline_mode = #tpu.pipeline_mode<synchronous>, transform_indices = @transform_2, window_bounds = array<i64: 8, 128>}, {pipeline_mode = #tpu.pipeline_mode<synchronous>, transform_indices = @transform_3, window_bounds = array<i64: 256, 128>}, {pipeline_mode = #tpu.pipeline_mode<synchronous>, transform_indices = @transform_4, window_bounds = array<i64: 256, 128>}, {pipeline_mode = #tpu.pipeline_mode<synchronous>, transform_indices = @transform_5, window_bounds = array<i64: 128, 16>}, {transform_indices = @transform_6, window_bounds = array<i64: 128, 1>}]} {
    %c0 = arith.constant 0 : index
    %c0_0 = arith.constant 0 : index
    %0 = vector.load %arg2[%c0, %c0_0] : memref<128x272xf32, #tpu.memory_space<vmem>>, vector<128x256xf32>
    %c0_1 = arith.constant 0 : index
    %c256 = arith.constant 256 : index
    %1 = vector.load %arg2[%c0_1, %c256] : memref<128x272xf32, #tpu.memory_space<vmem>>, vector<128x16xf32>
    %c0_2 = arith.constant 0 : index
    %c0_3 = arith.constant 0 : index
    %2 = vector.load %arg4[%c0_2, %c0_3] : memref<256x128xf32, #tpu.memory_space<vmem>>, vector<256x128xf32>
    %cst = arith.constant dense<0.000000e+00> : vector<128x128xf32>
    %3 = tpu.matmul %0, %2, %cst {dimension_numbers = #tpu.dot_dimension_numbers<[1], [0], [0], [1], [0, 0, 1, 1], [], []>, precision = #tpu.contract_precision<fp32>} : vector<128x256xf32>, vector<256x128xf32>, vector<128x128xf32> -> vector<128x128xf32>
    %c0_4 = arith.constant 0 : index
    %c0_5 = arith.constant 0 : index
    %4 = vector.load %arg5[%c0_4, %c0_5] : memref<256x128xf32, #tpu.memory_space<vmem>>, vector<256x128xf32>
    %cst_6 = arith.constant dense<0.000000e+00> : vector<128x128xf32>
    %5 = tpu.matmul %0, %4, %cst_6 {dimension_numbers = #tpu.dot_dimension_numbers<[1], [0], [0], [1], [0, 0, 1, 1], [], []>, precision = #tpu.contract_precision<fp32>} : vector<128x256xf32>, vector<256x128xf32>, vector<128x128xf32> -> vector<128x128xf32>
    %c0_7 = arith.constant 0 : index
    %c0_8 = arith.constant 0 : index
    %6 = vector.load %arg1[%c0_7, %c0_8] : memref<128x8xf32, #tpu.memory_space<vmem>>, vector<128x8xf32>
    %c0_9 = arith.constant 0 : index
    %c0_10 = arith.constant 0 : index
    %7 = vector.load %arg3[%c0_9, %c0_10] : memref<8x128xf32, #tpu.memory_space<vmem>>, vector<8x128xf32>
    %cst_11 = arith.constant dense<0.000000e+00> : vector<128x128xf32>
    %8 = tpu.matmul %6, %7, %cst_11 {dimension_numbers = #tpu.dot_dimension_numbers<[1], [0], [0], [1], [0, 0, 1, 1], [], []>, precision = #tpu.contract_precision<fp32>} : vector<128x8xf32>, vector<8x128xf32>, vector<128x128xf32> -> vector<128x128xf32>
    %cst_12 = arith.constant -7.000000e+00 : f32
    %cst_13 = arith.constant 5.000000e+00 : f32
    %9 = vector.broadcast %cst_12 : f32 to vector<128x128xf32>
    %10 = arith.maximumf %9, %5 : vector<128x128xf32>
    %11 = vector.broadcast %cst_13 : f32 to vector<128x128xf32>
    %12 = arith.minimumf %11, %10 : vector<128x128xf32>
    %13 = arith.subf %8, %3 : vector<128x128xf32>
    %cst_14 = arith.constant 0.000000e+00 : f32
    %14 = vector.broadcast %cst_14 : f32 to vector<128x128xf32>
    %15 = arith.subf %14, %12 : vector<128x128xf32>
    %16 = math.exp %15 : vector<128x128xf32>
    %17 = arith.mulf %13, %16 : vector<128x128xf32>
    %cst_15 = arith.constant 5.000000e-01 : f32
    %18 = vector.broadcast %cst_15 : f32 to vector<128x128xf32>
    %19 = arith.mulf %18, %17 : vector<128x128xf32>
    %20 = arith.mulf %19, %17 : vector<128x128xf32>
    %21 = arith.addf %20, %12 : vector<128x128xf32>
    %c0_16 = arith.constant 0 : index
    %c0_17 = arith.constant 0 : index
    %22 = vector.load %arg6[%c0_16, %c0_17] : memref<128x16xf32, #tpu.memory_space<vmem>>, vector<128x16xf32>
    %cst_18 = arith.constant dense<0.000000e+00> : vector<128x16xf32>
    %23 = tpu.matmul %21, %22, %cst_18 {dimension_numbers = #tpu.dot_dimension_numbers<[1], [0], [0], [1], [0, 0, 1, 1], [], []>, precision = #tpu.contract_precision<fp32>} : vector<128x128xf32>, vector<128x16xf32>, vector<128x16xf32> -> vector<128x16xf32>
    %cst_19 = arith.constant 7.35150814 : f32
    %24 = vector.broadcast %cst_19 : f32 to vector<128x16xf32>
    %25 = arith.addf %23, %24 : vector<128x16xf32>
    %cst_20 = arith.constant 0.000000e+00 : f32
    %26 = vector.broadcast %cst_20 : f32 to vector<128x16xf32>
    %27 = arith.subf %26, %25 : vector<128x16xf32>
    %28 = arith.addf %27, %1 : vector<128x16xf32>
    %cst_21 = arith.constant dense<0xFF800000> : vector<128xf32>
    %29 = vector.multi_reduction <maximumf>, %28, %cst_21 [1] : vector<128x16xf32> to vector<128xf32>
    %30 = vector.shape_cast %29 : vector<128xf32> to vector<128x1xf32>
    %31 = vector.broadcast %30 : vector<128x1xf32> to vector<128x16xf32>
    %32 = arith.subf %28, %31 : vector<128x16xf32>
    %33 = math.exp %32 : vector<128x16xf32>
    %cst_22 = arith.constant dense<0.000000e+00> : vector<128xf32>
    %34 = vector.multi_reduction <add>, %33, %cst_22 [1] : vector<128x16xf32> to vector<128xf32>
    %35 = vector.shape_cast %34 : vector<128xf32> to vector<128x1xf32>
    %36 = math.log %35 : vector<128x1xf32>
    %37 = arith.addf %30, %36 : vector<128x1xf32>
    %cst_23 = arith.constant dense<0xFF800000> : vector<128xf32>
    %38 = vector.multi_reduction <maximumf>, %1, %cst_23 [1] : vector<128x16xf32> to vector<128xf32>
    %39 = vector.shape_cast %38 : vector<128xf32> to vector<128x1xf32>
    %40 = vector.broadcast %39 : vector<128x1xf32> to vector<128x16xf32>
    %41 = arith.subf %1, %40 : vector<128x16xf32>
    %42 = math.exp %41 : vector<128x16xf32>
    %cst_24 = arith.constant dense<0.000000e+00> : vector<128xf32>
    %43 = vector.multi_reduction <add>, %42, %cst_24 [1] : vector<128x16xf32> to vector<128xf32>
    %44 = vector.shape_cast %43 : vector<128xf32> to vector<128x1xf32>
    %45 = math.log %44 : vector<128x1xf32>
    %46 = arith.addf %39, %45 : vector<128x1xf32>
    %47 = arith.subf %46, %37 : vector<128x1xf32>
    %c0_25 = arith.constant 0 : index
    %c0_26 = arith.constant 0 : index
    %48 = vector.load %arg7[%c0_25, %c0_26] : memref<128x1xf32, #tpu.memory_space<vmem>>, vector<128x1xf32>
    tpu.vector_store %arg7[%c0_25, %c0_26], %47 {strides = array<i32>} : memref<128x1xf32, #tpu.memory_space<vmem>>, vector<128x1xf32>,
    return
  }
  func.func @transform_0(%arg0: i32) -> (i32, i32) {
    %c0_i32 = arith.constant 0 : i32
    %c0_i32_0 = arith.constant 0 : i32
    return %arg0, %c0_i32 : i32, i32
  }
  func.func @transform_1(%arg0: i32) -> (i32, i32) {
    %c0_i32 = arith.constant 0 : i32
    %c0_i32_0 = arith.constant 0 : i32
    return %arg0, %c0_i32 : i32, i32
  }
  func.func @transform_2(%arg0: i32) -> (i32, i32) {
    %c0_i32 = arith.constant 0 : i32
    %c0_i32_0 = arith.constant 0 : i32
    %c0_i32_1 = arith.constant 0 : i32
    return %c0_i32, %c0_i32_0 : i32, i32
  }
  func.func @transform_3(%arg0: i32) -> (i32, i32) {
    %c0_i32 = arith.constant 0 : i32
    %c0_i32_0 = arith.constant 0 : i32
    %c0_i32_1 = arith.constant 0 : i32
    return %c0_i32, %c0_i32_0 : i32, i32
  }
  func.func @transform_4(%arg0: i32) -> (i32, i32) {
    %c0_i32 = arith.constant 0 : i32
    %c0_i32_0 = arith.constant 0 : i32
    %c0_i32_1 = arith.constant 0 : i32
    return %c0_i32, %c0_i32_0 : i32, i32
  }
  func.func @transform_5(%arg0: i32) -> (i32, i32) {
    %c0_i32 = arith.constant 0 : i32
    %c0_i32_0 = arith.constant 0 : i32
    %c0_i32_1 = arith.constant 0 : i32
    return %c0_i32, %c0_i32_0 : i32, i32
  }
  func.func @transform_6(%arg0: i32) -> (i32, i32) {
    %c0_i32 = arith.constant 0 : i32
    %c0_i32_0 = arith.constant 0 : i32
    return %arg0, %c0_i32 : i32, i32
  }
}

</mosaic_0001>

<bundles_post_ra>
// kernel: tpu_custom_call.1
= control target key start
LH: loop header
LB: loop body
LE: loop exit
PB: predicated region body
PF: predicated region fallthrough
CT: control target
= control target key end

     0   :  { %vm3376_vm0 = vcmask 64512   ;;  %vm5050_vm1 = vcmask 130048   ;;  %vm5451_vm2 = vcmask 7168   ;;  %s9381_s3 = inlined_call_operand.vmem [shape: f32[256,128], index: 3, kind: input, shape index: {}]   ;;  %s9382_s1 = inlined_call_operand.vmem [shape: f32[128,272], index: 1, kind: input, shape index: {}]   ;;  %s9383_s4 = inlined_call_operand.vmem [shape: f32[256,128], index: 4, kind: input, shape index: {}]   ;;  %s9384_s2 = inlined_call_operand.vmem [shape: f32[8,128], index: 2, kind: input, shape index: {}]   ;;  %s9385_s0 = inlined_call_operand.vmem [shape: f32[128,8], index: 0, kind: input, shape index: {}]   ;;  %s9386_s5 = inlined_call_operand.vmem [shape: f32[128,16], index: 5, kind: input, shape index: {}]   ;;  %s9387_s6 = inlined_call_operand.vmem [shape: f32[128,1], index: 6, kind: output, shape index: {}]  }
   0x1   :  { %v86_v0 = vld [vmem:[%s9381_s3 + $0x78] sm:$0xff]  ;;  %v85_v1 = vld [vmem:[%s9381_s3 + $0x70] sm:$0xff]  ;;  %v84_v2 = vld [vmem:[%s9381_s3 + $0x68] sm:$0xff] }
   0x2   :  { %v5686_v3 = vand.u32 4294901760, %v86_v0  ;;  %v5688_v4 = vand.u32 4294901760, %v85_v1  ;;  %v5690_v5 = vand.u32 4294901760, %v84_v2  ;;  %v83_v6 = vld [vmem:[%s9381_s3 + $0x60] sm:$0xff]  ;;  %v82_v7 = vld [vmem:[%s9381_s3 + $0x58] sm:$0xff]  ;;  %v81_v8 = vld [vmem:[%s9381_s3 + $0x50] sm:$0xff] }
   0x3   :  { %v5701_v9 = vand.u32 4294901760, %v83_v6  ;;  %v5703_v10 = vand.u32 4294901760, %v82_v7  ;;  %v5705_v11 = vand.u32 4294901760, %v81_v8  ;;  %v80_v12 = vld [vmem:[%s9381_s3 + $0x48] sm:$0xff]  ;;  %v79_v13 = vld [vmem:[%s9381_s3 + $0x40] sm:$0xff]  ;;  %v78_v18 = vld [vmem:[%s9381_s3 + $0x38] sm:$0xff] }
   0x4   :  { %104 = vmatpush.msra.mxu0 %v5686_v3  ;;  %v5715_v14 = vsub.f32 %v86_v0, %v5686_v3  ;;  %v5718_v15 = vsub.f32 %v85_v1, %v5688_v4  ;;  %555 = vmatpush.msra.mxu3 %v5686_v3  ;;  %v5722_v16 = vsub.f32 %v84_v2, %v5690_v5  ;;  %v5724_v17 = vand.u32 4294901760, %v80_v12  ;;  %v77_v29 = vld [vmem:[%s9381_s3 + $0x30] sm:$0xff]  ;;  %v76_v36 = vld [vmem:[%s9381_s3 + $0x28] sm:$0xff]  ;;  %v75_v43 = vld [vmem:[%s9381_s3 + $0x20] sm:$0xff] }
   0x5   :  { %v5730_v19 = vsub.f32 %v83_v6, %v5701_v9  ;;  %v5733_v20 = vsub.f32 %v82_v7, %v5703_v10  ;;  %v5735_v21 = vand.u32 4294901760, %v79_v13  ;;  %v5738_v22 = vsub.f32 %v81_v8, %v5705_v11  ;;  %v74_v49 = vld [vmem:[%s9381_s3 + $0x18] sm:$0xff]  ;;  %v73_v55 = vld [vmem:[%s9381_s3 + $0x10] sm:$0xff]  ;;  %v23_v56 = vld [vmem:[%s9382_s1] sm:$0xff] }
   0x6   :  { %106 = vmatpush.msra.mxu0 %v5688_v4  ;;  %427 = vmatpush.msra.mxu2 %v5715_v14  ;;  %v266_v23 = vand.u32 4294901760, %v5715_v14  ;;  %v272_v24 = vand.u32 4294901760, %v5718_v15  ;;  %v278_v25 = vand.u32 4294901760, %v5722_v16  ;;  %v5747_v27 = vand.u32 4294901760, %v78_v18  ;;  %v72_v62 = vld [vmem:[%s9381_s3 + $0x8] sm:$0xff]  ;;  %v71_v8 = vld [vmem:[%s9381_s3] sm:$0xff] }
   0x7   :  { %557 = vmatpush.msra.mxu3 %v5688_v4  ;;  %v284_v26 = vand.u32 4294901760, %v5730_v19  ;;  %v5750_v28 = vsub.f32 %v80_v12, %v5724_v17  ;;  %v290_v33 = vand.u32 4294901760, %v5733_v20  ;;  %v296_v34 = vand.u32 4294901760, %v5738_v22 }
   0x8   :  { %108 = vmatpush.msra.mxu0 %v5690_v5  ;;  %430 = vmatpush.msra.mxu2 %v5718_v15  ;;  %v267_v30 = vsub.f32 %v5715_v14, %v266_v23  ;;  %v273_v31 = vsub.f32 %v5718_v15, %v272_v24  ;;  %v279_v32 = vsub.f32 %v5722_v16, %v278_v25  ;;  %v5780_v40 = vand.u32 4294901760, %v77_v29  ;;  %v31_v15 = vld [vmem:[%s9382_s1 + $0x60] sm:$0xff] }
   0x9   :  { %559 = vmatpush.msra.mxu3 %v5690_v5  ;;  %v5770_v35 = vsub.f32 %v79_v13, %v5735_v21  ;;  %v285_v39 = vsub.f32 %v5730_v19, %v284_v26  ;;  %v302_v41 = vand.u32 4294901760, %v5750_v28  ;;  %v5785_v42 = vsub.f32 %v78_v18, %v5747_v27 }
   0xa   :  { %110 = vmatpush.msra.mxu0 %v5701_v9  ;;  %v268_v37 = vand.u32 4294901760, %v267_v30  ;;  %433 = vmatpush.msra.mxu2 %v5722_v16  ;;  %v274_v38 = vand.u32 4294901760, %v273_v31  ;;  %v280_v44 = vand.u32 4294901760, %v279_v32  ;;  %v291_v45 = vsub.f32 %v5733_v20, %v290_v33  ;;  %v25_v30 = vld [vmem:[%s9382_s1 + $0x18] sm:$0xff] }
   0xb   :  { %561 = vmatpush.msra.mxu3 %v5701_v9  ;;  %v5794_v46 = vand.u32 4294901760, %v76_v36  ;;  %v297_v47 = vsub.f32 %v5738_v22, %v296_v34  ;;  %v308_v48 = vand.u32 4294901760, %v5770_v35  ;;  %v286_v50 = vand.u32 4294901760, %v285_v39 }
   0xc   :  { %112 = vmatpush.msra.mxu0 %v5703_v10  ;;  %269 = vmatpush.msra.mxu1 %v268_v37  ;;  %v5806_v51 = vand.u32 4294901760, %v75_v43  ;;  %v5809_v52 = vsub.f32 %v77_v29, %v5780_v40  ;;  %v303_v53 = vsub.f32 %v5750_v28, %v302_v41  ;;  %v314_v54 = vand.u32 4294901760, %v5785_v42 }
   0xd   :  { %436 = vmatpush.msra.mxu2 %v5730_v19  ;;  %563 = vmatpush.msra.mxu3 %v5703_v10  ;;  %v292_v57 = vand.u32 4294901760, %v291_v45  ;;  %v5824_v58 = vand.u32 4294901760, %v74_v49  ;;  %v5827_v59 = vsub.f32 %v76_v36, %v5794_v46  ;;  %v298_v60 = vand.u32 4294901760, %v297_v47  ;;  %v33_v19 = vld [vmem:[%s9382_s1 + $0x78] sm:$0xff] }
   0xe   :  { %114 = vmatpush.msra.mxu0 %v5705_v11  ;;  %275 = vmatpush.msra.mxu1 %v274_v38  ;;  %v309_v61 = vsub.f32 %v5770_v35, %v308_v48  ;;  %v5838_v63 = vand.u32 4294901760, %v73_v55  ;;  %v320_v0 = vand.u32 4294901760, %v5809_v52  ;;  %v5842_v1 = vsub.f32 %v75_v43, %v5806_v51 }
   0xf   :  { %439 = vmatpush.msra.mxu2 %v5733_v20  ;;  %565 = vmatpush.msra.mxu3 %v5705_v11  ;;  %v5844_v2 = vand.u32 4294901760, %v23_v56  ;;  %v304_v6 = vand.u32 4294901760, %v303_v53  ;;  %v315_v7 = vsub.f32 %v5785_v42, %v314_v54  ;;  %v5855_v12 = vand.u32 4294901760, %v72_v62 }
  0x10   :  { %116 = vmatpush.msra.mxu0 %v5724_v17  ;;  %281 = vmatpush.msra.mxu1 %v280_v44  ;;  %v326_v13 = vand.u32 4294901760, %v5827_v59  ;;  %v5859_v18 = vsub.f32 %v74_v49, %v5824_v58  ;;  %v310_v31 = vand.u32 4294901760, %v309_v61  ;;  %v321_v32 = vsub.f32 %v5809_v52, %v320_v0 }
  0x11   :  { %442 = vmatpush.msra.mxu2 %v5738_v22  ;;  %567 = vmatpush.msra.mxu3 %v5724_v17  ;;  %9622 = vst [vmem:[#allocation2_spill] sm:$0xff] %v5844_v2  ;;  %v5862_v29 = vsub.f32 %v23_v56, %v5844_v2  ;;  %v5873_v36 = vand.u32 4294901760, %v71_v8  ;;  %v332_v37 = vand.u32 4294901760, %v5842_v1  ;;  %v5877_v38 = vsub.f32 %v73_v55, %v5838_v63  ;;  %v35_v22 = vld [vmem:[%s9382_s1 + $0x90] sm:$0xff] }
  0x12   :  { %118 = vmatpush.msra.mxu0 %v5735_v21  ;;  %287 = vmatpush.msra.mxu1 %v286_v50  ;;  %v5884_v43 = vand.u32 4294901760, %v25_v30  ;;  %v316_v44 = vand.u32 4294901760, %v315_v7  ;;  %v327_v45 = vsub.f32 %v5827_v59, %v326_v13  ;;  %v338_v47 = vand.u32 4294901760, %v5859_v18  ;;  %v27_v7 = vld [vmem:[%s9382_s1 + $0x30] sm:$0xff] }
  0x13   :  { %445 = vmatpush.msra.mxu2 %v5750_v28  ;;  %569 = vmatpush.msra.mxu3 %v5735_v21  ;;  %9623 = vst [vmem:[#allocation3_spill] sm:$0xff] %v5862_v29  ;;  %v5882_v39 = vand.u32 4294901760, %v5862_v29  ;;  %v5892_v49 = vsub.f32 %v72_v62, %v5855_v12  ;;  %v322_v50 = vand.u32 4294901760, %v321_v32  ;;  %v333_v53 = vsub.f32 %v5842_v1, %v332_v37  ;;  %v37_v28 = vld [vmem:[%s9382_s1 + $0xa8] sm:$0xff] }
  0x14   :  { %120 = vmatpush.msra.mxu0 %v5747_v27  ;;  %293 = vmatpush.msra.mxu1 %v292_v57  ;;  %9625 = vst [vmem:[#allocation5_spill] sm:$0xff] %v5884_v43  ;;  %v9388_v55 = vand.u32 4294901760, %v5877_v38  ;;  %v5902_v56 = vsub.f32 %v71_v8, %v5873_v36  ;;  %v328_v61 = vand.u32 4294901760, %v327_v45  ;;  %v339_v62 = vsub.f32 %v5859_v18, %v338_v47 }
  0x15   :  { %448 = vmatpush.msra.mxu2 %v5770_v35  ;;  %571 = vmatpush.msra.mxu3 %v5747_v27  ;;  %9624 = vst [vmem:[#allocation4_spill] sm:$0xff] %v5882_v39  ;;  %v138_v57 = vsub.f32 %v5862_v29, %v5882_v39  ;;  %v334_v8 = vand.u32 4294901760, %v333_v53  ;;  %v5933_v45 = vand.u32 4294901760, %v27_v7  ;;  %v6020_v20 = vand.u32 4294901760, %v33_v19 }
  0x16   :  { %122 = vmatpush.msra.mxu0 %v5780_v40  ;;  %299 = vmatpush.msra.mxu1 %v298_v60  ;;  %v5909_v60 = vsub.f32 %v25_v30, %v5884_v43  ;;  %v345_v30 = vsub.f32 %v5877_v38, %v9388_v55  ;;  %v6079_v35 = vand.u32 4294901760, %v37_v28 }
  0x17   :  { %451 = vmatpush.msra.mxu2 %v5785_v42  ;;  %573 = vmatpush.msra.mxu3 %v5780_v40  ;;  %v5927_v32 = vand.u32 4294901760, %v138_v57  ;;  %9629 = vst [vmem:[#allocation9_spill] sm:$0xff] %v5933_v45 }
  0x18   :  { %124 = vmatpush.msra.mxu0 %v5794_v46  ;;  %305 = vmatpush.msra.mxu1 %v304_v6  ;;  %9626 = vst [vmem:[#allocation6_spill] sm:$0xff] %v5909_v60  ;;  %v9389_v6 = vand.u32 4294901760, %v5892_v49  ;;  %v346_v57 = vand.u32 4294901760, %v345_v30 }
  0x19   :  { %454 = vmatpush.msra.mxu2 %v5809_v52  ;;  %575 = vmatpush.msra.mxu3 %v5794_v46  ;;  %9627 = vst [vmem:[#allocation7_spill] sm:$0xff] %v5927_v32 }
  0x1a   :  { %126 = vmatpush.msra.mxu0 %v5806_v51  ;;  %311 = vmatpush.msra.mxu1 %v310_v31  ;;  %v356_v31 = vand.u32 4294901760, %v5902_v56  ;;  %v351_v53 = vsub.f32 %v5892_v49, %v9389_v6  ;;  %9641 = vst [vmem:[#allocation21_spill] sm:$0xff] %v6020_v20 }
  0x1b   :  { %457 = vmatpush.msra.mxu2 %v5827_v59  ;;  %577 = vmatpush.msra.mxu3 %v5806_v51  ;;  %9649 = vst [vmem:[#allocation29_spill] sm:$0xff] %v6079_v35 }
  0x1c   :  { %128 = vmatpush.msra.mxu0 %v5824_v58  ;;  %317 = vmatpush.msra.mxu1 %v316_v44  ;;  %v5931_v44 = vand.u32 4294901760, %v5909_v60  ;;  %v357_v55 = vsub.f32 %v5902_v56, %v356_v31  ;;  %v352_v6 = vand.u32 4294901760, %v351_v53 }
  0x1d   :  { %460 = vmatpush.msra.mxu2 %v5842_v1  ;;  %579 = vmatpush.msra.mxu3 %v5824_v58 }
  0x1e   :  { %130 = vmatpush.msra.mxu0 %v5838_v63  ;;  %323 = vmatpush.msra.mxu1 %v322_v50  ;;  %9628 = vst [vmem:[#allocation8_spill] sm:$0xff] %v5931_v44  ;;  %v340_v50 = vand.u32 4294901760, %v339_v62  ;;  %v5950_v62 = vsub.f32 %v27_v7, %v5933_v45  ;;  %v358_v30 = vand.u32 4294901760, %v357_v55 }
  0x1f   :  { %463 = vmatpush.msra.mxu2 %v5859_v18  ;;  %581 = vmatpush.msra.mxu3 %v5838_v63 }
  0x20   :  { %132 = vmatpush.msra.mxu0 %v5855_v12  ;;  %329 = vmatpush.msra.mxu1 %v328_v61  ;;  %v146_v61 = vsub.f32 %v5909_v60, %v5931_v44  ;;  %9630 = vst [vmem:[#allocation10_spill] sm:$0xff] %v5950_v62 }
  0x21   :  { %466 = vmatpush.msra.mxu2 %v5877_v38  ;;  %583 = vmatpush.msra.mxu3 %v5855_v12 }
  0x22   :  { %134 = vmatpush.msra.mxu0 %v5873_v36  ;;  %335 = vmatpush.msra.mxu1 %v334_v8  ;;  %v29_v8 = vld [vmem:[%s9382_s1 + $0x48] sm:$0xff]  ;;  %v5961_v7 = vand.u32 4294901760, %v146_v61 }
  0x23   :  { %140 = vmatmul.f32.vlgmr.msra.gmra.mxu0 %v5927_v32  ;;  %469 = vmatpush.msra.mxu2 %v5892_v49  ;;  %v5966_v53 = vand.u32 4294901760, %v29_v8 }
  0x24   :  { %341 = vmatpush.msra.mxu1 %v340_v50  ;;  %585 = vmatpush.msra.mxu3 %v5873_v36  ;;  %9631 = vst [vmem:[#allocation11_spill] sm:$0xff] %v5961_v7  ;;  %v5964_v50 = vand.u32 4294901760, %v5950_v62 }
  0x25   :  { %472 = vmatpush.msra.mxu2 %v5902_v56  ;;  %589 = vmatmul.f32.vlgmr.msra.gmra.mxu3 %v5882_v39  ;;  %9633 = vst [vmem:[#allocation13_spill] sm:$0xff] %v5966_v53 }
  0x26   :  { %347 = vmatpush.msra.mxu1 %v346_v57  ;;  %475 = vmatmul.f32.vlgmr.msra.gmra.mxu2 %v5862_v29  ;;  %9632 = vst [vmem:[#allocation12_spill] sm:$0xff] %v5964_v50  ;;  %v154_v14 = vsub.f32 %v5950_v62, %v5964_v50 }
  0x27   :  { %686 = vmatpush.msrb.mxu0 %v266_v23  ;;  %v5975_v23 = vsub.f32 %v29_v8, %v5966_v53 }
  0x28   :  { %353 = vmatpush.msra.mxu1 %v352_v6  ;;  %v101_v6 = vld [vmem:[%s9381_s3 + $0xf0] sm:$0xff] }
  0x29   :  { %690 = vmatpush.msrb.mxu0 %v272_v24  ;;  %9634 = vst [vmem:[#allocation14_spill] sm:$0xff] %v5975_v23  ;;  %v5986_v24 = vand.u32 4294901760, %v154_v14  ;;  %v5989_v55 = vand.u32 4294901760, %v5975_v23  ;;  %v45_v14 = vld [vmem:[%s9382_s1 + $0x108] sm:$0xff] }
  0x2a   :  { %359 = vmatpush.msra.mxu1 %v358_v30  ;;  %v100_v30 = vld [vmem:[%s9381_s3 + $0xe8] sm:$0xff] }
  0x2b   :  { %148 = vmatmul.f32.gmra.mxu0 %v5961_v7  ;;  %361 = vmatmul.f32.vlgmr.msra.gmra.mxu1 %v5844_v2  ;;  %9635 = vst [vmem:[#allocation15_spill] sm:$0xff] %v5986_v24 }
  0x2c   :  { %813 = vmatpush.msrb.mxu1 %v5686_v3  ;;  %694 = vmatpush.msrb.mxu0 %v278_v25  ;;  %9636 = vst [vmem:[#allocation16_spill] sm:$0xff] %v5989_v55  ;;  %v5993_v3 = vand.u32 4294901760, %v31_v15  ;;  %v6050_v25 = vand.u32 4294901760, %v35_v22 }
  0x2d   :  { %595 = vmatmul.f32.gmra.mxu3 %v5931_v44 }
  0x2e   :  { %480 = vmatmul.f32.gmra.mxu2 %v5909_v60  ;;  %815 = vmatpush.msrb.mxu1 %v5688_v4  ;;  %9637 = vst [vmem:[#allocation17_spill] sm:$0xff] %v5993_v3  ;;  %v162_v4 = vsub.f32 %v5975_v23, %v5989_v55  ;;  %v6004_v16 = vsub.f32 %v31_v15, %v5993_v3 }
  0x2f   :  { %698 = vmatpush.msrb.mxu0 %v284_v26  ;;  %9645 = vst [vmem:[#allocation25_spill] sm:$0xff] %v6050_v25 }
  0x30   :  { %817 = vmatpush.msrb.mxu1 %v5690_v5  ;;  %9638 = vst [vmem:[#allocation18_spill] sm:$0xff] %v6004_v16  ;;  %v6015_v5 = vand.u32 4294901760, %v162_v4  ;;  %v6177_v4 = vand.u32 4294901760, %v100_v30 }
  0x31   :  { %702 = vmatpush.msrb.mxu0 %v290_v33 }
  0x32   :  { %819 = vmatpush.msrb.mxu1 %v5701_v9  ;;  %9639 = vst [vmem:[#allocation19_spill] sm:$0xff] %v6015_v5  ;;  %v6018_v9 = vand.u32 4294901760, %v6004_v16 }
  0x33   :  { %156 = vmatmul.f32.gmra.mxu0 %v5986_v24  ;;  %365 = vmatmul.f32.gmra.mxu1 %v5884_v43 }
  0x34   :  { %821 = vmatpush.msrb.mxu1 %v5703_v10  ;;  %706 = vmatpush.msrb.mxu0 %v296_v34  ;;  %9640 = vst [vmem:[#allocation20_spill] sm:$0xff] %v6018_v9  ;;  %v170_v10 = vsub.f32 %v6004_v16, %v6018_v9 }
  0x35   :  { %601 = vmatmul.f32.gmra.mxu3 %v5964_v50 }
  0x36   :  { %485 = vmatmul.f32.gmra.mxu2 %v5950_v62  ;;  %823 = vmatpush.msrb.mxu1 %v5705_v11  ;;  %v6033_v11 = vsub.f32 %v33_v19, %v6020_v20 }
  0x37   :  { %710 = vmatpush.msrb.mxu0 %v302_v41  ;;  %v9651_v41 = vand.u32 4294901760, %v5892_v49  ;;  %v102_v49 = vld [vmem:[%s9381_s3 + $0xf8] sm:$0xff] }
  0x38   :  { %825 = vmatpush.msrb.mxu1 %v5724_v17  ;;  %9642 = vst [vmem:[#allocation22_spill] sm:$0xff] %v6033_v11  ;;  %v6045_v17 = vand.u32 4294901760, %v170_v10  ;;  %v6150_v56 = vand.u32 4294901760, %v102_v49  ;;  %v99_v10 = vld [vmem:[%s9381_s3 + $0xe0] sm:$0xff] }
  0x39   :  { %714 = vmatpush.msrb.mxu0 %v308_v48  ;;  %v39_v48 = vld [vmem:[%s9382_s1 + $0xc0] sm:$0xff] }
  0x3a   :  { %827 = vmatpush.msrb.mxu1 %v5735_v21  ;;  %9643 = vst [vmem:[#allocation23_spill] sm:$0xff] %v6045_v17  ;;  %v6048_v21 = vand.u32 4294901760, %v6033_v11  ;;  %910 = vmatpush.msrb.mxu2 %v6150_v56  ;;  %v6159_v57 = vsub.f32 %v102_v49, %v6150_v56 }
  0x3b   :  { %164 = vmatmul.f32.gmra.mxu0 %v6015_v5  ;;  %369 = vmatmul.f32.gmra.mxu1 %v5933_v45 }
  0x3c   :  { %718 = vmatpush.msrb.mxu0 %v314_v54  ;;  %829 = vmatpush.msrb.mxu1 %v5747_v27  ;;  %9644 = vst [vmem:[#allocation24_spill] sm:$0xff] %v6048_v21  ;;  %v178_v26 = vsub.f32 %v6033_v11, %v6048_v21  ;;  %v6063_v27 = vsub.f32 %v35_v22, %v6050_v25  ;;  %v6107_v54 = vand.u32 4294901760, %v39_v48  ;;  %v9391_v15 = vand.u32 4294901760, %v6159_v57 }
  0x3d   :  { %607 = vmatmul.f32.gmra.mxu3 %v5989_v55 }
  0x3e   :  { %490 = vmatmul.f32.gmra.mxu2 %v5975_v23  ;;  %722 = vmatpush.msrb.mxu0 %v320_v0  ;;  %9646 = vst [vmem:[#allocation26_spill] sm:$0xff] %v6063_v27  ;;  %v6074_v33 = vand.u32 4294901760, %v178_v26  ;;  %v6077_v34 = vand.u32 4294901760, %v6063_v27  ;;  %v6114_v59 = vsub.f32 %v39_v48, %v6107_v54  ;;  %v1073_v22 = vsub.f32 %v6159_v57, %v9391_v15 }
  0x3f   :  { %831 = vmatpush.msrb.mxu1 %v5780_v40  ;;  %v9650_v40 = vand.u32 4294901760, %v5877_v38  ;;  %9655 = vst [vmem:[#allocation33_spill] sm:$0xff] %v6107_v54  ;;  %v6204_v48 = vand.u32 4294901760, %v45_v14 }
  0x40   :  { %726 = vmatpush.msrb.mxu0 %v326_v13  ;;  %9647 = vst [vmem:[#allocation27_spill] sm:$0xff] %v6074_v33  ;;  %v186_v42 = vsub.f32 %v6063_v27, %v6077_v34  ;;  %v6124_v1 = vand.u32 4294901760, %v6114_v59 }
  0x41   :  { %833 = vmatpush.msrb.mxu1 %v5794_v46  ;;  %9648 = vst [vmem:[#allocation28_spill] sm:$0xff] %v6077_v34  ;;  %v6092_v46 = vsub.f32 %v37_v28, %v6079_v35  ;;  %v6193_v28 = vand.u32 4294901760, %v99_v10 }
  0x42   :  { %730 = vmatpush.msrb.mxu0 %v332_v37  ;;  %9656 = vst [vmem:[#allocation34_spill] sm:$0xff] %v6114_v59  ;;  %v202_v13 = vsub.f32 %v6114_v59, %v6124_v1 }
  0x43   :  { %172 = vmatmul.f32.gmra.mxu0 %v6045_v17  ;;  %373 = vmatmul.f32.gmra.mxu1 %v5966_v53  ;;  %9652 = vst [vmem:[#allocation30_spill] sm:$0xff] %v6092_v46  ;;  %v6105_v52 = vand.u32 4294901760, %v6092_v46 }
  0x44   :  { %835 = vmatpush.msrb.mxu1 %v5806_v51  ;;  %734 = vmatpush.msrb.mxu0 %v338_v47  ;;  %v6102_v51 = vand.u32 4294901760, %v186_v42  ;;  %9658 = vst [vmem:[#allocation36_spill] sm:$0xff] %v6124_v1  ;;  %v6140_v37 = vand.u32 4294901760, %v202_v13 }
  0x45   :  { %613 = vmatmul.f32.gmra.mxu3 %v6018_v9  ;;  %9654 = vst [vmem:[#allocation32_spill] sm:$0xff] %v6105_v52 }
  0x46   :  { %495 = vmatmul.f32.gmra.mxu2 %v6004_v16  ;;  %837 = vmatpush.msrb.mxu1 %v5824_v58  ;;  %9653 = vst [vmem:[#allocation31_spill] sm:$0xff] %v6102_v51  ;;  %v194_v58 = vsub.f32 %v6092_v46, %v6105_v52 }
  0x47   :  { %738 = vmatpush.msrb.mxu0 %v9650_v40  ;;  %9661 = vst [vmem:[#allocation39_spill] sm:$0xff] %v6140_v37  ;;  %v6196_v40 = vsub.f32 %v100_v30, %v6177_v4 }
  0x48   :  { %839 = vmatpush.msrb.mxu1 %v5838_v63  ;;  %v41_v63 = vld [vmem:[%s9382_s1 + $0xd8] sm:$0xff]  ;;  %v6121_v0 = vand.u32 4294901760, %v194_v58  ;;  %9667 = vst [vmem:[#allocation45_spill] sm:$0xff] %v6204_v48 }
  0x49   :  { %742 = vmatpush.msrb.mxu0 %v9651_v41  ;;  %v98_v58 = vld [vmem:[%s9381_s3 + $0xd8] sm:$0xff] }
  0x4a   :  { %841 = vmatpush.msrb.mxu1 %v5855_v12  ;;  %9657 = vst [vmem:[#allocation35_spill] sm:$0xff] %v6121_v0  ;;  %v6126_v12 = vand.u32 4294901760, %v41_v63  ;;  %v6215_v49 = vand.u32 4294901760, %v98_v58 }
  0x4b   :  { %180 = vmatmul.f32.gmra.mxu0 %v6074_v33  ;;  %377 = vmatmul.f32.gmra.mxu1 %v5993_v3 }
  0x4c   :  { %746 = vmatpush.msrb.mxu0 %v356_v31  ;;  %843 = vmatpush.msrb.mxu1 %v5873_v36  ;;  %9659 = vst [vmem:[#allocation37_spill] sm:$0xff] %v6126_v12  ;;  %v6133_v18 = vsub.f32 %v41_v63, %v6126_v12  ;;  %v43_v36 = vld [vmem:[%s9382_s1 + $0xf0] sm:$0xff]  ;;  %v6156_v31 = vand.u32 4294901760, %v101_v6  ;;  %v1074_v63 = vand.u32 4294901760, %v1073_v22  ;;  %v6232_v15 = vsub.f32 %v98_v58, %v6215_v49  ;;  %v47_v58 = vld [vmem:[%s9382_s1 + $0x120] sm:$0xff] }
  0x4d   :  { %619 = vmatmul.f32.gmra.mxu3 %v6048_v21  ;;  %v6145_v47 = vand.u32 4294901760, %v43_v36 }
  0x4e   :  { %500 = vmatmul.f32.gmra.mxu2 %v6033_v11  ;;  %9660 = vst [vmem:[#allocation38_spill] sm:$0xff] %v6133_v18  ;;  %v6143_v38 = vand.u32 4294901760, %v6133_v18  ;;  %1361 = vmatpush.msra.mxu1 %v6150_v56  ;;  %v6180_v19 = vsub.f32 %v101_v6, %v6156_v31  ;;  %v6220_v6 = vsub.f32 %v99_v10, %v6193_v28 }
  0x4f   :  { %9663 = vst [vmem:[#allocation41_spill] sm:$0xff] %v6145_v47  ;;  %v6167_v8 = vsub.f32 %v43_v36, %v6145_v47  ;;  %912 = vmatpush.msrb.mxu2 %v6156_v31  ;;  %1233 = vmatpush.msra.mxu0 %v6159_v57  ;;  %v9393_v36 = vand.u32 4294901760, %v6196_v40 }
  0x50   :  { %9662 = vst [vmem:[#allocation40_spill] sm:$0xff] %v6143_v38  ;;  %v210_v61 = vsub.f32 %v6133_v18, %v6143_v38  ;;  %1363 = vmatpush.msra.mxu1 %v6156_v31  ;;  %v9390_v26 = vand.u32 4294901760, %v6180_v19  ;;  %1075 = vmatpush.msrb.mxu3 %v1074_v63  ;;  %v9399_v63 = vand.u32 4294901760, %v6220_v6 }
  0x51   :  { %9664 = vst [vmem:[#allocation42_spill] sm:$0xff] %v6167_v8  ;;  %1236 = vmatpush.msra.mxu0 %v6180_v19  ;;  %v6202_v42 = vand.u32 4294901760, %v6167_v8  ;;  %914 = vmatpush.msrb.mxu2 %v6177_v4  ;;  %v1085_v22 = vsub.f32 %v6196_v40, %v9393_v36 }
  0x52   :  { %v6199_v41 = vand.u32 4294901760, %v210_v61  ;;  %1365 = vmatpush.msra.mxu1 %v6177_v4  ;;  %v1079_v13 = vsub.f32 %v6180_v19, %v9390_v26  ;;  %v97_v61 = vld [vmem:[%s9381_s3 + $0xd0] sm:$0xff] }
  0x53   :  { %188 = vmatmul.f32.gmra.mxu0 %v6102_v51  ;;  %381 = vmatmul.f32.gmra.mxu1 %v6020_v20  ;;  %9666 = vst [vmem:[#allocation44_spill] sm:$0xff] %v6202_v42  ;;  %v6229_v26 = vand.u32 4294901760, %v97_v61  ;;  %v218_v10 = vsub.f32 %v6167_v8, %v6202_v42  ;;  %v1086_v36 = vand.u32 4294901760, %v1085_v22 }
  0x54   :  { %9665 = vst [vmem:[#allocation43_spill] sm:$0xff] %v6199_v41  ;;  %1239 = vmatpush.msra.mxu0 %v6196_v40  ;;  %916 = vmatpush.msrb.mxu2 %v6193_v28  ;;  %v1080_v30 = vand.u32 4294901760, %v1079_v13  ;;  %v96_v13 = vld [vmem:[%s9381_s3 + $0xc8] sm:$0xff] }
  0x55   :  { %625 = vmatmul.f32.gmra.mxu3 %v6077_v34  ;;  %1367 = vmatpush.msra.mxu1 %v6193_v28 }
  0x56   :  { %505 = vmatmul.f32.gmra.mxu2 %v6063_v27  ;;  %1081 = vmatpush.msrb.mxu3 %v1080_v30  ;;  %v95_v30 = vld [vmem:[%s9381_s3 + $0xc0] sm:$0xff] }
  0x57   :  { %918 = vmatpush.msrb.mxu2 %v6215_v49  ;;  %1242 = vmatpush.msra.mxu0 %v6220_v6 }
  0x58   :  { %1087 = vmatpush.msrb.mxu3 %v1086_v36  ;;  %v94_v36 = vld [vmem:[%s9381_s3 + $0xb8] sm:$0xff]  ;;  %1369 = vmatpush.msra.mxu1 %v6215_v49 }
  0x59   :  { %920 = vmatpush.msrb.mxu2 %v6229_v26  ;;  %1245 = vmatpush.msra.mxu0 %v6232_v15  ;;  %v6289_v27 = vand.u32 4294901760, %v94_v36 }
  0x5a   :  { %1371 = vmatpush.msra.mxu1 %v6229_v26 }
  0x5b   :  { %196 = vmatmul.f32.gmra.mxu0 %v6121_v0  ;;  %385 = vmatmul.f32.gmra.mxu1 %v6050_v25  ;;  %v6278_v0 = vand.u32 4294901760, %v47_v58  ;;  %v6305_v11 = vsub.f32 %v94_v36, %v6289_v27  ;;  %v92_v36 = vld [vmem:[%s9381_s3 + $0xa8] sm:$0xff] }
  0x5c   :  { %v6325_v33 = vand.u32 4294901760, %v92_v36 }
  0x5d   :  { %631 = vmatmul.f32.gmra.mxu3 %v6105_v52  ;;  %9671 = vst [vmem:[#allocation49_spill] sm:$0xff] %v6278_v0  ;;  %v9419_v21 = vand.u32 4294901760, %v6305_v11 }
  0x5e   :  { %510 = vmatmul.f32.gmra.mxu2 %v6092_v46  ;;  %v6346_v9 = vsub.f32 %v92_v36, %v6325_v33 }
  0x63   :  { %204 = vmatmul.f32.gmra.mxu0 %v6140_v37  ;;  %389 = vmatmul.f32.gmra.mxu1 %v6079_v35  ;;  %v1091_v37 = vsub.f32 %v6220_v6, %v9399_v63  ;;  %v6273_v63 = vand.u32 4294901760, %v218_v10 }
  0x65   :  { %637 = vmatmul.f32.gmra.mxu3 %v6124_v1  ;;  %v6250_v1 = vand.u32 4294901760, %v96_v13  ;;  %9669 = vst [vmem:[#allocation47_spill] sm:$0xff] %v6273_v63 }
  0x66   :  { %515 = vmatmul.f32.gmra.mxu2 %v6114_v59  ;;  %v6239_v59 = vsub.f32 %v45_v14, %v6204_v48  ;;  %v6253_v14 = vsub.f32 %v97_v61, %v6229_v26 }
  0x67   :  { %v6271_v46 = vsub.f32 %v96_v13, %v6250_v1  ;;  %922 = vmatpush.msrb.mxu2 %v6250_v1  ;;  %1373 = vmatpush.msra.mxu1 %v6250_v1 }
  0x68   :  { %9668 = vst [vmem:[#allocation46_spill] sm:$0xff] %v6239_v59  ;;  %v9406_v22 = vand.u32 4294901760, %v6253_v14  ;;  %v6276_v52 = vand.u32 4294901760, %v6239_v59  ;;  %1248 = vmatpush.msra.mxu0 %v6253_v14 }
  0x69   :  { %v9409_v13 = vand.u32 4294901760, %v6271_v46 }
  0x6a   :  { %9670 = vst [vmem:[#allocation48_spill] sm:$0xff] %v6276_v52  ;;  %v1103_v10 = vsub.f32 %v6253_v14, %v9406_v22  ;;  %1251 = vmatpush.msra.mxu0 %v6271_v46 }
  0x6b   :  { %212 = vmatmul.f32.gmra.mxu0 %v6199_v41  ;;  %393 = vmatmul.f32.gmra.mxu1 %v6107_v54  ;;  %v9403_v41 = vand.u32 4294901760, %v6232_v15  ;;  %v1109_v22 = vsub.f32 %v6271_v46, %v9409_v13  ;;  %v49_v13 = vld [vmem:[%s9382_s1 + $0x138] sm:$0xff] }
  0x6c   :  { %v1104_v34 = vand.u32 4294901760, %v1103_v10  ;;  %v6353_v23 = vand.u32 4294901760, %v49_v13 }
  0x6d   :  { %643 = vmatmul.f32.gmra.mxu3 %v6143_v38  ;;  %v1097_v61 = vsub.f32 %v6232_v15, %v9403_v41  ;;  %v6268_v38 = vand.u32 4294901760, %v95_v30 }
  0x6e   :  { %520 = vmatmul.f32.gmra.mxu2 %v6133_v18  ;;  %v1092_v18 = vand.u32 4294901760, %v1091_v37  ;;  %9675 = vst [vmem:[#allocation53_spill] sm:$0xff] %v6353_v23 }
  0x6f   :  { %v1098_v41 = vand.u32 4294901760, %v1097_v61  ;;  %v6294_v37 = vsub.f32 %v95_v30, %v6268_v38  ;;  %v93_v61 = vld [vmem:[%s9381_s3 + $0xb0] sm:$0xff]  ;;  %v6314_v30 = vsub.f32 %v47_v58, %v6278_v0  ;;  %924 = vmatpush.msrb.mxu2 %v6268_v38  ;;  %1375 = vmatpush.msra.mxu1 %v6268_v38 }
  0x70   :  { %1093 = vmatpush.msrb.mxu3 %v1092_v18  ;;  %v6302_v51 = vand.u32 4294901760, %v93_v61  ;;  %v226_v18 = vsub.f32 %v6239_v59, %v6276_v52 }
  0x71   :  { %9672 = vst [vmem:[#allocation50_spill] sm:$0xff] %v6314_v30  ;;  %v9416_v10 = vand.u32 4294901760, %v6294_v37  ;;  %v6351_v17 = vand.u32 4294901760, %v6314_v30  ;;  %926 = vmatpush.msrb.mxu2 %v6289_v27  ;;  %1254 = vmatpush.msra.mxu0 %v6294_v37 }
  0x72   :  { %1099 = vmatpush.msrb.mxu3 %v1098_v41  ;;  %v6328_v58 = vsub.f32 %v93_v61, %v6302_v51  ;;  %v91_v41 = vld [vmem:[%s9381_s3 + $0xa0] sm:$0xff]  ;;  %1377 = vmatpush.msra.mxu1 %v6289_v27 }
  0x73   :  { %220 = vmatmul.f32.gmra.mxu0 %v6273_v63  ;;  %397 = vmatmul.f32.gmra.mxu1 %v6126_v12  ;;  %v1110_v63 = vand.u32 4294901760, %v1109_v22  ;;  %v1115_v16 = vsub.f32 %v6294_v37, %v9416_v10  ;;  %v1121_v22 = vsub.f32 %v6305_v11, %v9419_v21  ;;  %v6348_v10 = vand.u32 4294901760, %v226_v18  ;;  %9674 = vst [vmem:[#allocation52_spill] sm:$0xff] %v6351_v17  ;;  %v90_v21 = vld [vmem:[%s9381_s3 + $0x98] sm:$0xff] }
  0x74   :  { %1105 = vmatpush.msrb.mxu3 %v1104_v34  ;;  %v9676_v36 = vand.u32 4294901760, %v6328_v58  ;;  %v6364_v55 = vand.u32 4294901760, %v90_v21  ;;  %928 = vmatpush.msrb.mxu2 %v6302_v51 }
  0x75   :  { %649 = vmatmul.f32.gmra.mxu3 %v6202_v42  ;;  %v6343_v42 = vand.u32 4294901760, %v91_v41  ;;  %9673 = vst [vmem:[#allocation51_spill] sm:$0xff] %v6348_v10  ;;  %v1116_v34 = vand.u32 4294901760, %v1115_v16  ;;  %v1122_v61 = vand.u32 4294901760, %v1121_v22  ;;  %1257 = vmatpush.msra.mxu0 %v6305_v11 }
  0x76   :  { %525 = vmatmul.f32.gmra.mxu2 %v6167_v8  ;;  %1111 = vmatpush.msrb.mxu3 %v1110_v63  ;;  %v1127_v18 = vsub.f32 %v6328_v58, %v9676_v36  ;;  %v9424_v8 = vand.u32 4294901760, %v6346_v9  ;;  %v89_v63 = vld [vmem:[%s9381_s3 + $0x90] sm:$0xff]  ;;  %v6381_v62 = vsub.f32 %v90_v21, %v6364_v55 }
  0x77   :  { %v6369_v16 = vsub.f32 %v91_v41, %v6343_v42  ;;  %v6378_v5 = vand.u32 4294901760, %v89_v63  ;;  %v234_v41 = vsub.f32 %v6314_v30, %v6351_v17  ;;  %v51_v21 = vld [vmem:[%s9382_s1 + $0x150] sm:$0xff]  ;;  %930 = vmatpush.msrb.mxu2 %v6325_v33  ;;  %1260 = vmatpush.msra.mxu0 %v6328_v58 }
  0x78   :  { %1117 = vmatpush.msrb.mxu3 %v1116_v34  ;;  %v1128_v22 = vand.u32 4294901760, %v1127_v18  ;;  %v1133_v36 = vsub.f32 %v6346_v9, %v9424_v8  ;;  %v6389_v34 = vsub.f32 %v49_v13, %v6353_v23  ;;  %v88_v8 = vld [vmem:[%s9381_s3 + $0x88] sm:$0xff]  ;;  %v9434_v50 = vand.u32 4294901760, %v6381_v62  ;;  %1379 = vmatpush.msra.mxu1 %v6302_v51 }
  0x79   :  { %v9431_v18 = vand.u32 4294901760, %v6369_v16  ;;  %v6400_v24 = vand.u32 4294901760, %v88_v8  ;;  %v6403_v13 = vsub.f32 %v89_v63, %v6378_v5  ;;  %v6428_v29 = vand.u32 4294901760, %v51_v21  ;;  %932 = vmatpush.msrb.mxu2 %v6343_v42  ;;  %1263 = vmatpush.msra.mxu0 %v6346_v9 }
  0x7a   :  { %9677 = vst [vmem:[#allocation54_spill] sm:$0xff] %v6389_v34  ;;  %1123 = vmatpush.msrb.mxu3 %v1122_v61  ;;  %v87_v61 = vld [vmem:[%s9381_s3 + $0x80] sm:$0xff]  ;;  %v1145_v63 = vsub.f32 %v6381_v62, %v9434_v50  ;;  %v6426_v7 = vand.u32 4294901760, %v6389_v34  ;;  %1381 = vmatpush.msra.mxu1 %v6325_v33 }
  0x7b   :  { %228 = vmatmul.f32.gmra.mxu0 %v6348_v10  ;;  %401 = vmatmul.f32.gmra.mxu1 %v6145_v47  ;;  %v1134_v10 = vand.u32 4294901760, %v1133_v36  ;;  %v1139_v60 = vsub.f32 %v6369_v16, %v9431_v18  ;;  %v9436_v36 = vand.u32 4294901760, %v6403_v13  ;;  %v6421_v44 = vsub.f32 %v88_v8, %v6400_v24  ;;  %9680 = vst [vmem:[#allocation57_spill] sm:$0xff] %v6428_v29 }
  0x7c   :  { %1129 = vmatpush.msrb.mxu3 %v1128_v22  ;;  %v6423_v18 = vand.u32 4294901760, %v234_v41  ;;  %9679 = vst [vmem:[#allocation56_spill] sm:$0xff] %v6426_v7  ;;  %v1146_v50 = vand.u32 4294901760, %v1145_v63  ;;  %934 = vmatpush.msrb.mxu2 %v6364_v55 }
  0x7d   :  { %655 = vmatmul.f32.gmra.mxu3 %v6276_v52  ;;  %v6418_v52 = vand.u32 4294901760, %v87_v61  ;;  %v1140_v22 = vand.u32 4294901760, %v1139_v60  ;;  %v9437_v8 = vand.u32 4294901760, %v6421_v44  ;;  %1266 = vmatpush.msra.mxu0 %v6369_v16 }
  0x7e   :  { %530 = vmatmul.f32.gmra.mxu2 %v6239_v59  ;;  %9678 = vst [vmem:[#allocation55_spill] sm:$0xff] %v6423_v18  ;;  %1135 = vmatpush.msrb.mxu3 %v1134_v10  ;;  %v1151_v59 = vsub.f32 %v6403_v13, %v9436_v36  ;;  %v6452_v36 = vsub.f32 %v51_v21, %v6428_v29 }
  0x7f   :  { %v6437_v41 = vsub.f32 %v87_v61, %v6418_v52  ;;  %v1157_v10 = vsub.f32 %v6421_v44, %v9437_v8  ;;  %v242_v61 = vsub.f32 %v6389_v34, %v6426_v7  ;;  %936 = vmatpush.msrb.mxu2 %v6378_v5  ;;  %1383 = vmatpush.msra.mxu1 %v6343_v42 }
  0x80   :  { %1141 = vmatpush.msrb.mxu3 %v1140_v22  ;;  %v1152_v60 = vand.u32 4294901760, %v1151_v59  ;;  %9681 = vst [vmem:[#allocation58_spill] sm:$0xff] %v6452_v36  ;;  %v53_v59 = vld [vmem:[%s9382_s1 + $0x168] sm:$0xff]  ;;  %v6467_v39 = vand.u32 4294901760, %v6452_v36  ;;  %1269 = vmatpush.msra.mxu0 %v6381_v62 }
  0x81   :  { %v1162_v63 = vand.u32 4294901760, %v6437_v41  ;;  %v1158_v22 = vand.u32 4294901760, %v1157_v10  ;;  %v6469_v32 = vand.u32 4294901760, %v53_v59  ;;  %938 = vmatpush.msrb.mxu2 %v6400_v24  ;;  %1385 = vmatpush.msra.mxu1 %v6364_v55  ;;  %v9687_v10 = vand.u32 4294901760, %v6180_v19  ;;  %v24_v19 = vld [vmem:[%s9382_s1 + $0x8] sm:$0xff] }
  0x82   :  { %1147 = vmatpush.msrb.mxu3 %v1146_v50  ;;  %9683 = vst [vmem:[#allocation60_spill] sm:$0xff] %v6467_v39  ;;  %v9685_v50 = vand.u32 4294901760, %v6159_v57  ;;  %1272 = vmatpush.msra.mxu0 %v6403_v13 }
  0x83   :  { %236 = vmatmul.f32.gmra.mxu0 %v6423_v18  ;;  %405 = vmatmul.f32.gmra.mxu1 %v6204_v48  ;;  %v1163_v8 = vsub.f32 %v6437_v41, %v1162_v63  ;;  %v6464_v18 = vand.u32 4294901760, %v242_v61  ;;  %9684 = vst [vmem:[#allocation61_spill] sm:$0xff] %v6469_v32 }
  0x84   :  { %1153 = vmatpush.msrb.mxu3 %v1152_v60  ;;  %940 = vmatpush.msrb.mxu2 %v6418_v52  ;;  %v6483_v60 = vsub.f32 %v53_v59, %v6469_v32  ;;  %v9690_v59 = vand.u32 4294901760, %v6196_v40  ;;  %v9693_v40 = vand.u32 4294901760, %v6232_v15  ;;  %v26_v15 = vld [vmem:[%s9382_s1 + $0x20] sm:$0xff] }
  0x85   :  { %661 = vmatmul.f32.gmra.mxu3 %v6351_v17  ;;  %v1164_v21 = vand.u32 4294901760, %v1163_v8  ;;  %9682 = vst [vmem:[#allocation59_spill] sm:$0xff] %v6464_v18  ;;  %v250_v8 = vsub.f32 %v6452_v36, %v6467_v39  ;;  %1387 = vmatpush.msra.mxu1 %v6378_v5 }
  0x86   :  { %535 = vmatmul.f32.gmra.mxu2 %v6314_v30  ;;  %1159 = vmatpush.msrb.mxu3 %v1158_v22  ;;  %9686 = vst [vmem:[#allocation62_spill] sm:$0xff] %v6483_v60  ;;  %v6495_v61 = vand.u32 4294901760, %v6483_v60  ;;  %v9696_v22 = vand.u32 4294901760, %v6253_v14  ;;  %v9701_v14 = vand.u32 4294901760, %v6305_v11  ;;  %v9705_v11 = vand.u32 4294901760, %v6346_v9 }
  0x87   :  { %1492 = vmatpush.msra.mxu2 %v9685_v50  ;;  %v6492_v57 = vand.u32 4294901760, %v250_v8  ;;  %1275 = vmatpush.msra.mxu0 %v6421_v44  ;;  %v6539_v50 = vand.u32 4294901760, %v26_v15  ;;  %v9707_v9 = vand.u32 4294901760, %v6369_v16 }
  0x88   :  { %1165 = vmatpush.msrb.mxu3 %v1164_v21  ;;  %9689 = vst [vmem:[#allocation64_spill] sm:$0xff] %v6495_v61  ;;  %1389 = vmatpush.msra.mxu1 %v6400_v24 }
  0x89   :  { %1496 = vmatpush.msra.mxu2 %v9687_v10  ;;  %9688 = vst [vmem:[#allocation63_spill] sm:$0xff] %v6492_v57  ;;  %1278 = vmatpush.msra.mxu0 %v6437_v41 }
  0x8a   :  { %1619 = vmatpush.msra.mxu3 %v6150_v56  ;;  %v9691_v56 = vand.u32 4294901760, %v6220_v6  ;;  %1391 = vmatpush.msra.mxu1 %v6418_v52 }
  0x8b   :  { %244 = vmatmul.f32.gmra.mxu0 %v6464_v18  ;;  %409 = vmatmul.f32.gmra.mxu1 %v6278_v0 }
  0x8c   :  { %1621 = vmatpush.msra.mxu3 %v6156_v31  ;;  %1500 = vmatpush.msra.mxu2 %v9690_v59  ;;  %v6508_v31 = vand.u32 4294901760, %v24_v19 }
  0x8d   :  { %667 = vmatmul.f32.gmra.mxu3 %v6426_v7 }
  0x8e   :  { %540 = vmatmul.f32.gmra.mxu2 %v6389_v34  ;;  %1623 = vmatpush.msra.mxu3 %v6177_v4  ;;  %9692 = vst [vmem:[#allocation65_spill] sm:$0xff] %v6508_v31  ;;  %v258_v4 = vsub.f32 %v6483_v60, %v6495_v61 }
  0x8f   :  { %1504 = vmatpush.msra.mxu2 %v9691_v56 }
  0x90   :  { %1625 = vmatpush.msra.mxu3 %v6193_v28  ;;  %v6523_v28 = vsub.f32 %v24_v19, %v6508_v31  ;;  %v6526_v6 = vand.u32 4294901760, %v258_v4 }
  0x91   :  { %1508 = vmatpush.msra.mxu2 %v9693_v40  ;;  %v9708_v40 = vand.u32 4294901760, %v6381_v62 }
  0x92   :  { %1627 = vmatpush.msra.mxu3 %v6215_v49  ;;  %9694 = vst [vmem:[#allocation66_spill] sm:$0xff] %v6523_v28  ;;  %v9697_v49 = vand.u32 4294901760, %v6271_v46  ;;  %v6537_v21 = vand.u32 4294901760, %v6523_v28 }
  0x93   :  { %252 = vmatmul.f32.gmra.mxu0 %v6492_v57  ;;  %413 = vmatmul.f32.gmra.mxu1 %v6353_v23  ;;  %9695 = vst [vmem:[#allocation67_spill] sm:$0xff] %v6526_v6 }
  0x94   :  { %1629 = vmatpush.msra.mxu3 %v6229_v26  ;;  %1512 = vmatpush.msra.mxu2 %v9696_v22  ;;  %9698 = vst [vmem:[#allocation68_spill] sm:$0xff] %v6537_v21  ;;  %v9699_v26 = vand.u32 4294901760, %v6294_v37  ;;  %v944_v46 = vsub.f32 %v6523_v28, %v6537_v21  ;;  %v9702_v37 = vand.u32 4294901760, %v6328_v58 }
  0x95   :  { %673 = vmatmul.f32.gmra.mxu3 %v6467_v39 }
  0x96   :  { %545 = vmatmul.f32.gmra.mxu2 %v6452_v36  ;;  %1631 = vmatpush.msra.mxu3 %v6250_v1  ;;  %v6552_v1 = vsub.f32 %v26_v15, %v6539_v50  ;;  %v6563_v8 = vand.u32 4294901760, %v944_v46  ;;  %v9714_v46 = vand.u32 4294901760, %v6421_v44 }
  0x97   :  { %1516 = vmatpush.msra.mxu2 %v9697_v49 }
  0x98   :  { %1633 = vmatpush.msra.mxu3 %v6268_v38  ;;  %9700 = vst [vmem:[#allocation69_spill] sm:$0xff] %v6552_v1  ;;  %v28_v38 = vld [vmem:[%s9382_s1 + $0x38] sm:$0xff]  ;;  %v6566_v10 = vand.u32 4294901760, %v6552_v1 }
  0x99   :  { %1520 = vmatpush.msra.mxu2 %v9699_v26  ;;  %9703 = vst [vmem:[#allocation70_spill] sm:$0xff] %v6563_v8  ;;  %v6568_v19 = vand.u32 4294901760, %v28_v38 }
  0x9a   :  { %1635 = vmatpush.msra.mxu3 %v6289_v27  ;;  %9704 = vst [vmem:[#allocation71_spill] sm:$0xff] %v6566_v10 }
  0x9b   :  { %260 = vmatmul.f32.gmra.mxu0 %v6526_v6  ;;  %417 = vmatmul.f32.gmra.mxu1 %v6428_v29 }
  0x9c   :  { %1637 = vmatpush.msra.mxu3 %v6302_v51  ;;  %1524 = vmatpush.msra.mxu2 %v9701_v14  ;;  %v6581_v51 = vsub.f32 %v28_v38, %v6568_v19 }
  0x9d   :  { %679 = vmatmul.f32.gmra.mxu3 %v6495_v61 }
  0x9e   :  { %550 = vmatmul.f32.gmra.mxu2 %v6483_v60  ;;  %1639 = vmatpush.msra.mxu3 %v6325_v33  ;;  %v952_v33 = vsub.f32 %v6552_v1, %v6566_v10  ;;  %9706 = vst [vmem:[#allocation72_spill] sm:$0xff] %v6581_v51 }
  0x9f   :  { %1528 = vmatpush.msra.mxu2 %v9702_v37 }
  0xa0   :  { %v141_v27 = vpop.f32.mrf.mxu0  ;;  %1641 = vmatpush.msra.mxu3 %v6343_v42  ;;  %v30_v42 = vld [vmem:[%s9382_s1 + $0x50] sm:$0xff]  ;;  %v6592_v15 = vand.u32 4294901760, %v952_v33 }
  0xa1   :  { %1532 = vmatpush.msra.mxu2 %v9705_v11  ;;  %v6597_v22 = vand.u32 4294901760, %v30_v42 }
  0xa2   :  { %1643 = vmatpush.msra.mxu3 %v6364_v55  ;;  %9709 = vst [vmem:[#allocation73_spill] sm:$0xff] %v6592_v15 }
  0xa3   :  { %421 = vmatmul.f32.gmra.mxu1 %v6469_v32  ;;  %748 = vmatmul.f32.vlgmr.msrb.gmra.mxu0 %v5844_v2  ;;  %9711 = vst [vmem:[#allocation75_spill] sm:$0xff] %v6597_v22  ;;  %v6611_v26 = vsub.f32 %v30_v42, %v6597_v22 }
  0xa4   :  { %1645 = vmatpush.msra.mxu3 %v6378_v5  ;;  %1536 = vmatpush.msra.mxu2 %v9707_v9  ;;  %v6595_v5 = vand.u32 4294901760, %v6581_v51 }
  0xa5   :  { %1167 = vmatmul.f32.vlgmr.msrb.gmra.mxu3 %v6508_v31  ;;  %9713 = vst [vmem:[#allocation76_spill] sm:$0xff] %v6611_v26  ;;  %v6623_v33 = vand.u32 4294901760, %v6611_v26 }
  0xa6   :  { %946 = vmatmul.f32.vlgmr.msrb.gmra.mxu2 %v6563_v8  ;;  %1647 = vmatpush.msra.mxu3 %v6400_v24  ;;  %9710 = vst [vmem:[#allocation74_spill] sm:$0xff] %v6595_v5  ;;  %v9712_v24 = vand.u32 4294901760, %v6403_v13  ;;  %v960_v62 = vsub.f32 %v6581_v51, %v6595_v5 }
  0xa7   :  { %1540 = vmatpush.msra.mxu2 %v9708_v40  ;;  %9716 = vst [vmem:[#allocation78_spill] sm:$0xff] %v6623_v33  ;;  %v968_v41 = vsub.f32 %v6611_v26, %v6623_v33 }
  0xa8   :  { %v149_v55 = vpop.f32.mrf.mxu0  ;;  %v362_v58 = vpop.f32.mrf.mxu1  ;;  %1649 = vmatpush.msra.mxu3 %v6418_v52  ;;  %v32_v52 = vld [vmem:[%s9382_s1 + $0x68] sm:$0xff]  ;;  %v6620_v11 = vand.u32 4294901760, %v960_v62 }
  0xa9   :  { %v363_v59 = vadd.f32 %v362_v58, %v141_v27  ;;  %v476_v56 = vpop.f32.mrf.mxu2  ;;  %v590_v4 = vpop.f32.mrf.mxu3  ;;  %1544 = vmatpush.msra.mxu2 %v9712_v24  ;;  %v6625_v42 = vand.u32 4294901760, %v32_v52 }
  0xaa   :  { %9715 = vst [vmem:[#allocation77_spill] sm:$0xff] %v6620_v11 }
  0xab   :  { %v477_v16 = vadd.f32 %v476_v56, %v363_v59  ;;  %752 = vmatmul.f32.gmra.mxu0 %v5884_v43  ;;  %845 = vmatmul.f32.vlgmr.msrb.gmra.mxu1 %v5844_v2  ;;  %9717 = vst [vmem:[#allocation79_spill] sm:$0xff] %v6625_v42 }
  0xac   :  { %1548 = vmatpush.msra.mxu2 %v9714_v46 }
  0xad   :  { %v6604_v49 = vadd.f32 %v590_v4, %v477_v16  ;;  %1171 = vmatmul.f32.gmra.mxu3 %v6539_v50  ;;  %v6641_v16 = vand.u32 4294901760, %v968_v41 }
  0xae   :  { %954 = vmatmul.f32.gmra.mxu2 %v6592_v15 }
  0xaf   :  { %1552 = vmatpush.msra.mxu2 %v1162_v63  ;;  %v6636_v63 = vsub.f32 %v32_v52, %v6625_v42  ;;  %9719 = vst [vmem:[#allocation81_spill] sm:$0xff] %v6641_v16 }
  0xb0   :  { %v157_v13 = vpop.f32.mrf.mxu0  ;;  %v366_v38 = vpop.f32.mrf.mxu1 }
  0xb1   :  { %v367_v14 = vadd.f32 %v366_v38, %v149_v55  ;;  %v481_v27 = vpop.f32.mrf.mxu2  ;;  %v596_v37 = vpop.f32.mrf.mxu3  ;;  %9718 = vst [vmem:[#allocation80_spill] sm:$0xff] %v6636_v63  ;;  %v34_v55 = vld [vmem:[%s9382_s1 + $0x80] sm:$0xff]  ;;  %v6644_v24 = vand.u32 4294901760, %v6636_v63 }
  0xb2   :  { %v6646_v62 = vand.u32 4294901760, %v34_v55 }
  0xb3   :  { %v482_v9 = vadd.f32 %v481_v27, %v367_v14  ;;  %756 = vmatmul.f32.gmra.mxu0 %v5933_v45  ;;  %849 = vmatmul.f32.gmra.mxu1 %v5884_v43  ;;  %9720 = vst [vmem:[#allocation82_spill] sm:$0xff] %v6644_v24  ;;  %v36_v14 = vld [vmem:[%s9382_s1 + $0x98] sm:$0xff] }
  0xb4   :  { %9721 = vst [vmem:[#allocation83_spill] sm:$0xff] %v6646_v62  ;;  %v6657_v38 = vsub.f32 %v34_v55, %v6646_v62 }
  0xb5   :  { %v6629_v44 = vadd.f32 %v596_v37, %v482_v9  ;;  %1175 = vmatmul.f32.gmra.mxu3 %v6568_v19 }
  0xb6   :  { %962 = vmatmul.f32.gmra.mxu2 %v6620_v11  ;;  %9722 = vst [vmem:[#allocation84_spill] sm:$0xff] %v6657_v38 }
  0xb8   :  { %v165_v58 = vpop.f32.mrf.mxu0  ;;  %v370_v59 = vpop.f32.mrf.mxu1 }
  0xb9   :  { %v371_v56 = vadd.f32 %v370_v59, %v157_v13  ;;  %v486_v4 = vpop.f32.mrf.mxu2  ;;  %v602_v40 = vpop.f32.mrf.mxu3  ;;  %v976_v13 = vsub.f32 %v6636_v63, %v6644_v24 }
  0xbb   :  { %v487_v46 = vadd.f32 %v486_v4, %v371_v56  ;;  %760 = vmatmul.f32.gmra.mxu0 %v5966_v53  ;;  %853 = vmatmul.f32.gmra.mxu1 %v5933_v45  ;;  %v6662_v56 = vand.u32 4294901760, %v976_v13  ;;  %v6665_v4 = vand.u32 4294901760, %v6657_v38 }
  0xbd   :  { %v6650_v52 = vadd.f32 %v602_v40, %v487_v46  ;;  %1179 = vmatmul.f32.gmra.mxu3 %v6597_v22  ;;  %9723 = vst [vmem:[#allocation85_spill] sm:$0xff] %v6662_v56  ;;  %v6667_v40 = vand.u32 4294901760, %v36_v14 }
  0xbe   :  { %970 = vmatmul.f32.gmra.mxu2 %v6641_v16  ;;  %9724 = vst [vmem:[#allocation86_spill] sm:$0xff] %v6665_v4 }
  0xbf   :  { %9725 = vst [vmem:[#allocation87_spill] sm:$0xff] %v6667_v40  ;;  %v6678_v13 = vsub.f32 %v36_v14, %v6667_v40 }
  0xc0   :  { %v173_v27 = vpop.f32.mrf.mxu0  ;;  %v374_v37 = vpop.f32.mrf.mxu1 }
  0xc1   :  { %v375_v9 = vadd.f32 %v374_v37, %v165_v58  ;;  %v491_v41 = vpop.f32.mrf.mxu2  ;;  %v608_v59 = vpop.f32.mrf.mxu3  ;;  %v984_v58 = vsub.f32 %v6657_v38, %v6665_v4  ;;  %9726 = vst [vmem:[#allocation88_spill] sm:$0xff] %v6678_v13  ;;  %v38_v37 = vld [vmem:[%s9382_s1 + $0xb0] sm:$0xff]  ;;  %v6686_v15 = vand.u32 4294901760, %v6678_v13 }
  0xc3   :  { %v492_v46 = vadd.f32 %v491_v41, %v375_v9  ;;  %764 = vmatmul.f32.gmra.mxu0 %v5993_v3  ;;  %857 = vmatmul.f32.gmra.mxu1 %v5966_v53  ;;  %9728 = vst [vmem:[#allocation90_spill] sm:$0xff] %v6686_v15 }
  0xc5   :  { %v6671_v55 = vadd.f32 %v608_v59, %v492_v46  ;;  %1183 = vmatmul.f32.gmra.mxu3 %v6625_v42  ;;  %v6683_v46 = vand.u32 4294901760, %v984_v58 }
  0xc6   :  { %978 = vmatmul.f32.gmra.mxu2 %v6662_v56  ;;  %v6688_v56 = vand.u32 4294901760, %v38_v37 }
  0xc7   :  { %9727 = vst [vmem:[#allocation89_spill] sm:$0xff] %v6683_v46 }
  0xc8   :  { %v181_v9 = vpop.f32.mrf.mxu0  ;;  %v378_v41 = vpop.f32.mrf.mxu1  ;;  %9729 = vst [vmem:[#allocation91_spill] sm:$0xff] %v6688_v56  ;;  %v6699_v58 = vsub.f32 %v38_v37, %v6688_v56 }
  0xc9   :  { %v379_v16 = vadd.f32 %v378_v41, %v173_v27  ;;  %v496_v11 = vpop.f32.mrf.mxu2  ;;  %v614_v59 = vpop.f32.mrf.mxu3  ;;  %v992_v27 = vsub.f32 %v6678_v13, %v6686_v15 }
  0xca   :  { %9730 = vst [vmem:[#allocation92_spill] sm:$0xff] %v6699_v58  ;;  %v6707_v6 = vand.u32 4294901760, %v6699_v58 }
  0xcb   :  { %v497_v8 = vadd.f32 %v496_v11, %v379_v16  ;;  %768 = vmatmul.f32.gmra.mxu0 %v6020_v20  ;;  %861 = vmatmul.f32.gmra.mxu1 %v5993_v3  ;;  %v40_v11 = vld [vmem:[%s9382_s1 + $0xc8] sm:$0xff] }
  0xcc   :  { %9732 = vst [vmem:[#allocation94_spill] sm:$0xff] %v6707_v6 }
  0xcd   :  { %v6692_v14 = vadd.f32 %v614_v59, %v497_v8  ;;  %1187 = vmatmul.f32.gmra.mxu3 %v6646_v62  ;;  %v6704_v59 = vand.u32 4294901760, %v992_v27 }
  0xce   :  { %986 = vmatmul.f32.gmra.mxu2 %v6683_v46  ;;  %v6709_v46 = vand.u32 4294901760, %v40_v11 }
  0xcf   :  { %9731 = vst [vmem:[#allocation93_spill] sm:$0xff] %v6704_v59 }
  0xd0   :  { %v189_v16 = vpop.f32.mrf.mxu0  ;;  %v382_v41 = vpop.f32.mrf.mxu1  ;;  %9733 = vst [vmem:[#allocation95_spill] sm:$0xff] %v6709_v46  ;;  %v6720_v27 = vsub.f32 %v40_v11, %v6709_v46 }
  0xd1   :  { %v383_v60 = vadd.f32 %v382_v41, %v181_v9  ;;  %v501_v61 = vpop.f32.mrf.mxu2  ;;  %v620_v8 = vpop.f32.mrf.mxu3  ;;  %v1000_v9 = vsub.f32 %v6699_v58, %v6707_v6 }
  0xd2   :  { %9734 = vst [vmem:[#allocation96_spill] sm:$0xff] %v6720_v27  ;;  %v6728_v34 = vand.u32 4294901760, %v6720_v27 }
  0xd3   :  { %v502_v36 = vadd.f32 %v501_v61, %v383_v60  ;;  %772 = vmatmul.f32.gmra.mxu0 %v6050_v25  ;;  %865 = vmatmul.f32.gmra.mxu1 %v6020_v20  ;;  %v42_v60 = vld [vmem:[%s9382_s1 + $0xe0] sm:$0xff] }
  0xd4   :  { %9736 = vst [vmem:[#allocation98_spill] sm:$0xff] %v6728_v34 }
  0xd5   :  { %v6713_v37 = vadd.f32 %v620_v8, %v502_v36  ;;  %1191 = vmatmul.f32.gmra.mxu3 %v6667_v40  ;;  %v6725_v8 = vand.u32 4294901760, %v1000_v9 }
  0xd6   :  { %994 = vmatmul.f32.gmra.mxu2 %v6704_v59  ;;  %v6730_v59 = vand.u32 4294901760, %v42_v60 }
  0xd7   :  { %9735 = vst [vmem:[#allocation97_spill] sm:$0xff] %v6725_v8 }
  0xd8   :  { %v197_v61 = vpop.f32.mrf.mxu0  ;;  %v386_v41 = vpop.f32.mrf.mxu1  ;;  %9737 = vst [vmem:[#allocation99_spill] sm:$0xff] %v6730_v59  ;;  %v6741_v9 = vsub.f32 %v42_v60, %v6730_v59 }
  0xd9   :  { %v387_v39 = vadd.f32 %v386_v41, %v189_v16  ;;  %v506_v57 = vpop.f32.mrf.mxu2  ;;  %v626_v36 = vpop.f32.mrf.mxu3  ;;  %v1008_v16 = vsub.f32 %v6720_v27, %v6728_v34 }
  0xda   :  { %9738 = vst [vmem:[#allocation100_spill] sm:$0xff] %v6741_v9  ;;  %v6749_v17 = vand.u32 4294901760, %v6741_v9 }
  0xdb   :  { %v507_v7 = vadd.f32 %v506_v57, %v387_v39  ;;  %776 = vmatmul.f32.gmra.mxu0 %v6079_v35  ;;  %869 = vmatmul.f32.gmra.mxu1 %v6050_v25  ;;  %v44_v39 = vld [vmem:[%s9382_s1 + $0xf8] sm:$0xff] }
  0xdc   :  { %9740 = vst [vmem:[#allocation102_spill] sm:$0xff] %v6749_v17 }
  0xdd   :  { %v6734_v11 = vadd.f32 %v626_v36, %v507_v7  ;;  %1195 = vmatmul.f32.gmra.mxu3 %v6688_v56  ;;  %v6746_v36 = vand.u32 4294901760, %v1008_v16 }
  0xde   :  { %1002 = vmatmul.f32.gmra.mxu2 %v6725_v8  ;;  %v6751_v8 = vand.u32 4294901760, %v44_v39 }
  0xdf   :  { %9739 = vst [vmem:[#allocation101_spill] sm:$0xff] %v6746_v36 }
  0xe0   :  { %v205_v57 = vpop.f32.mrf.mxu0  ;;  %v390_v41 = vpop.f32.mrf.mxu1  ;;  %9741 = vst [vmem:[#allocation103_spill] sm:$0xff] %v6751_v8  ;;  %v6762_v16 = vsub.f32 %v44_v39, %v6751_v8 }
  0xe1   :  { %v391_v18 = vadd.f32 %v390_v41, %v197_v61  ;;  %v511_v30 = vpop.f32.mrf.mxu2  ;;  %v632_v7 = vpop.f32.mrf.mxu3  ;;  %v1016_v61 = vsub.f32 %v6741_v9, %v6749_v17 }
  0xe2   :  { %9742 = vst [vmem:[#allocation104_spill] sm:$0xff] %v6762_v16  ;;  %v6770_v3 = vand.u32 4294901760, %v6762_v16 }
  0xe3   :  { %v512_v25 = vadd.f32 %v511_v30, %v391_v18  ;;  %780 = vmatmul.f32.gmra.mxu0 %v6107_v54  ;;  %873 = vmatmul.f32.gmra.mxu1 %v6079_v35  ;;  %v46_v30 = vld [vmem:[%s9382_s1 + $0x110] sm:$0xff] }
  0xe4   :  { %9744 = vst [vmem:[#allocation106_spill] sm:$0xff] %v6770_v3 }
  0xe5   :  { %v6755_v60 = vadd.f32 %v632_v7, %v512_v25  ;;  %1199 = vmatmul.f32.gmra.mxu3 %v6709_v46  ;;  %v6767_v7 = vand.u32 4294901760, %v1016_v61 }
  0xe6   :  { %1010 = vmatmul.f32.gmra.mxu2 %v6746_v36  ;;  %v6772_v36 = vand.u32 4294901760, %v46_v30 }
  0xe7   :  { %9743 = vst [vmem:[#allocation105_spill] sm:$0xff] %v6767_v7 }
  0xe8   :  { %v213_v18 = vpop.f32.mrf.mxu0  ;;  %v394_v41 = vpop.f32.mrf.mxu1  ;;  %9745 = vst [vmem:[#allocation107_spill] sm:$0xff] %v6772_v36  ;;  %v6783_v61 = vsub.f32 %v46_v30, %v6772_v36 }
  0xe9   :  { %v395_v20 = vadd.f32 %v394_v41, %v205_v57  ;;  %v516_v35 = vpop.f32.mrf.mxu2  ;;  %v638_v25 = vpop.f32.mrf.mxu3  ;;  %v1024_v57 = vsub.f32 %v6762_v16, %v6770_v3 }
  0xea   :  { %9746 = vst [vmem:[#allocation108_spill] sm:$0xff] %v6783_v61  ;;  %v6791_v43 = vand.u32 4294901760, %v6783_v61 }
  0xeb   :  { %v517_v53 = vadd.f32 %v516_v35, %v395_v20  ;;  %784 = vmatmul.f32.gmra.mxu0 %v6126_v12  ;;  %877 = vmatmul.f32.gmra.mxu1 %v6107_v54  ;;  %v48_v20 = vld [vmem:[%s9382_s1 + $0x128] sm:$0xff] }
  0xec   :  { %9748 = vst [vmem:[#allocation110_spill] sm:$0xff] %v6791_v43 }
  0xed   :  { %v6776_v39 = vadd.f32 %v638_v25, %v517_v53  ;;  %1203 = vmatmul.f32.gmra.mxu3 %v6730_v59  ;;  %v6788_v25 = vand.u32 4294901760, %v1024_v57 }
  0xee   :  { %1018 = vmatmul.f32.gmra.mxu2 %v6767_v7  ;;  %v6793_v7 = vand.u32 4294901760, %v48_v20 }
  0xef   :  { %9747 = vst [vmem:[#allocation109_spill] sm:$0xff] %v6788_v25 }
  0xf0   :  { %v221_v35 = vpop.f32.mrf.mxu0  ;;  %v398_v41 = vpop.f32.mrf.mxu1  ;;  %9749 = vst [vmem:[#allocation111_spill] sm:$0xff] %v6793_v7  ;;  %v6804_v57 = vsub.f32 %v48_v20, %v6793_v7 }
  0xf1   :  { %v399_v45 = vadd.f32 %v398_v41, %v213_v18  ;;  %v521_v54 = vpop.f32.mrf.mxu2  ;;  %v644_v53 = vpop.f32.mrf.mxu3  ;;  %v1032_v18 = vsub.f32 %v6783_v61, %v6791_v43 }
  0xf2   :  { %9750 = vst [vmem:[#allocation112_spill] sm:$0xff] %v6804_v57 }
  0xf3   :  { %v522_v2 = vadd.f32 %v521_v54, %v399_v45  ;;  %788 = vmatmul.f32.gmra.mxu0 %v6145_v47  ;;  %881 = vmatmul.f32.gmra.mxu1 %v6126_v12  ;;  %v50_v45 = vld [vmem:[%s9382_s1 + $0x140] sm:$0xff] }
  0xf5   :  { %v6797_v30 = vadd.f32 %v644_v53, %v522_v2  ;;  %1207 = vmatmul.f32.gmra.mxu3 %v6751_v8  ;;  %v6809_v53 = vand.u32 4294901760, %v1032_v18  ;;  %v6812_v8 = vand.u32 4294901760, %v6804_v57 }
  0xf6   :  { %1026 = vmatmul.f32.gmra.mxu2 %v6788_v25  ;;  %v6814_v25 = vand.u32 4294901760, %v50_v45 }
  0xf7   :  { %9751 = vst [vmem:[#allocation113_spill] sm:$0xff] %v6809_v53 }
  0xf8   :  { %v229_v54 = vpop.f32.mrf.mxu0  ;;  %v402_v41 = vpop.f32.mrf.mxu1  ;;  %9752 = vst [vmem:[#allocation114_spill] sm:$0xff] %v6812_v8  ;;  %v6825_v18 = vsub.f32 %v50_v45, %v6814_v25 }
  0xf9   :  { %v403_v3 = vadd.f32 %v402_v41, %v221_v35  ;;  %v526_v12 = vpop.f32.mrf.mxu2  ;;  %v650_v2 = vpop.f32.mrf.mxu3  ;;  %9753 = vst [vmem:[#allocation115_spill] sm:$0xff] %v6814_v25  ;;  %v1040_v35 = vsub.f32 %v6804_v57, %v6812_v8 }
  0xfa   :  { %9754 = vst [vmem:[#allocation116_spill] sm:$0xff] %v6825_v18 }
  0xfb   :  { %v527_v43 = vadd.f32 %v526_v12, %v403_v3  ;;  %792 = vmatmul.f32.gmra.mxu0 %v6204_v48  ;;  %885 = vmatmul.f32.gmra.mxu1 %v6145_v47  ;;  %v52_v3 = vld [vmem:[%s9382_s1 + $0x158] sm:$0xff] }
  0xfd   :  { %v6818_v20 = vadd.f32 %v650_v2, %v527_v43  ;;  %1211 = vmatmul.f32.gmra.mxu3 %v6772_v36  ;;  %v6830_v2 = vand.u32 4294901760, %v1040_v35  ;;  %v6833_v36 = vand.u32 4294901760, %v6825_v18 }
  0xfe   :  { %1034 = vmatmul.f32.gmra.mxu2 %v6809_v53  ;;  %v6835_v53 = vand.u32 4294901760, %v52_v3 }
  0xff   :  { %9755 = vst [vmem:[#allocation117_spill] sm:$0xff] %v6830_v2 }
 0x100   :  { %v237_v12 = vpop.f32.mrf.mxu0  ;;  %v406_v41 = vpop.f32.mrf.mxu1  ;;  %9756 = vst [vmem:[#allocation118_spill] sm:$0xff] %v6833_v36  ;;  %v6846_v35 = vsub.f32 %v52_v3, %v6835_v53 }
 0x101   :  { %v407_v61 = vadd.f32 %v406_v41, %v229_v54  ;;  %v531_v47 = vpop.f32.mrf.mxu2  ;;  %v656_v43 = vpop.f32.mrf.mxu3  ;;  %9757 = vst [vmem:[#allocation119_spill] sm:$0xff] %v6835_v53  ;;  %v1048_v54 = vsub.f32 %v6825_v18, %v6833_v36 }
 0x102   :  { %9759 = vst [vmem:[#allocation121_spill] sm:$0xff] %v6846_v35  ;;  %v6857_v36 = vand.u32 4294901760, %v6846_v35 }
 0x103   :  { %v532_v8 = vadd.f32 %v531_v47, %v407_v61  ;;  %796 = vmatmul.f32.gmra.mxu0 %v6278_v0  ;;  %889 = vmatmul.f32.gmra.mxu1 %v6204_v48  ;;  %v54_v47 = vld [vmem:[%s9382_s1 + $0x170] sm:$0xff] }
 0x104   :  { %9761 = vst [vmem:[#allocation123_spill] sm:$0xff] %v6857_v36  ;;  %v6859_v3 = vand.u32 4294901760, %v54_v47 }
 0x105   :  { %v6839_v45 = vadd.f32 %v656_v43, %v532_v8  ;;  %1215 = vmatmul.f32.gmra.mxu3 %v6793_v7  ;;  %v1730_v43 = vld [vmem:[%s9383_s4 + $0x78] sm:$0xff] }
 0x106   :  { %1042 = vmatmul.f32.gmra.mxu2 %v6830_v2  ;;  %v6854_v2 = vand.u32 4294901760, %v1048_v54  ;;  %9762 = vst [vmem:[#allocation124_spill] sm:$0xff] %v6859_v3  ;;  %v6861_v18 = vand.u32 4294901760, %v1730_v43 }
 0x107   :  { %9758 = vst [vmem:[#allocation120_spill] sm:$0xff] %v6839_v45 }
 0x108   :  { %v245_v61 = vpop.f32.mrf.mxu0  ;;  %v410_v41 = vpop.f32.mrf.mxu1  ;;  %9760 = vst [vmem:[#allocation122_spill] sm:$0xff] %v6854_v2  ;;  %1748 = vmatpush.msrb.mxu0 %v6861_v18  ;;  %2199 = vmatpush.msrb.mxu3 %v6861_v18 }
 0x109   :  { %v411_v57 = vadd.f32 %v410_v41, %v237_v12  ;;  %v536_v48 = vpop.f32.mrf.mxu2  ;;  %v662_v8 = vpop.f32.mrf.mxu3  ;;  %9763 = vst [vmem:[#allocation125_spill] sm:$0xff] %v6861_v18  ;;  %v6867_v12 = vsub.f32 %v1730_v43, %v6861_v18 }
 0x10b   :  { %v537_v7 = vadd.f32 %v536_v48, %v411_v57  ;;  %800 = vmatmul.f32.gmra.mxu0 %v6353_v23  ;;  %893 = vmatmul.f32.gmra.mxu1 %v6278_v0  ;;  %v1056_v48 = vsub.f32 %v6846_v35, %v6857_v36  ;;  %v6877_v57 = vsub.f32 %v54_v47, %v6859_v3  ;;  %v9519_v41 = vand.u32 4294901760, %v6867_v12 }
 0x10c   :  { %2071 = vmatpush.msrb.mxu2 %v6867_v12 }
 0x10d   :  { %v6870_v54 = vadd.f32 %v662_v8, %v537_v7  ;;  %1219 = vmatmul.f32.gmra.mxu3 %v6814_v25  ;;  %9765 = vst [vmem:[#allocation127_spill] sm:$0xff] %v6877_v57  ;;  %v1911_v7 = vsub.f32 %v6867_v12, %v9519_v41  ;;  %v6887_v36 = vand.u32 4294901760, %v1056_v48  ;;  %v6890_v47 = vand.u32 4294901760, %v6877_v57  ;;  %v1728_v41 = vld [vmem:[%s9383_s4 + $0x68] sm:$0xff] }
 0x10e   :  { %1050 = vmatmul.f32.gmra.mxu2 %v6854_v2  ;;  %v1729_v2 = vld [vmem:[%s9383_s4 + $0x70] sm:$0xff] }
 0x10f   :  { %9764 = vst [vmem:[#allocation126_spill] sm:$0xff] %v6870_v54  ;;  %v1912_v35 = vand.u32 4294901760, %v1911_v7  ;;  %v6892_v54 = vand.u32 4294901760, %v1729_v2  ;;  %v1064_v48 = vsub.f32 %v6877_v57, %v6890_v47 }
 0x110   :  { %v253_v43 = vpop.f32.mrf.mxu0  ;;  %v414_v0 = vpop.f32.mrf.mxu1  ;;  %9766 = vst [vmem:[#allocation128_spill] sm:$0xff] %v6887_v36 }
 0x111   :  { %v415_v8 = vadd.f32 %v414_v0, %v245_v61  ;;  %v541_v25 = vpop.f32.mrf.mxu2  ;;  %v668_v18 = vpop.f32.mrf.mxu3  ;;  %9767 = vst [vmem:[#allocation129_spill] sm:$0xff] %v6890_v47  ;;  %1913 = vmatpush.msrb.mxu1 %v1912_v35  ;;  %1750 = vmatpush.msrb.mxu0 %v6892_v54  ;;  %v6898_v0 = vsub.f32 %v1729_v2, %v6892_v54  ;;  %v6917_v47 = vand.u32 4294901760, %v1728_v41 }
 0x112   :  { %2201 = vmatpush.msrb.mxu3 %v6892_v54 }
 0x113   :  { %v542_v45 = vadd.f32 %v541_v25, %v415_v8  ;;  %804 = vmatmul.f32.gmra.mxu0 %v6428_v29  ;;  %897 = vmatmul.f32.gmra.mxu1 %v6353_v23  ;;  %v9527_v25 = vand.u32 4294901760, %v6898_v0 }
 0x114   :  { %2074 = vmatpush.msrb.mxu2 %v6898_v0  ;;  %1752 = vmatpush.msrb.mxu0 %v6917_v47 }
 0x115   :  { %v6900_v61 = vadd.f32 %v668_v18, %v542_v45  ;;  %1223 = vmatmul.f32.gmra.mxu3 %v6835_v53  ;;  %v1917_v18 = vsub.f32 %v6898_v0, %v9527_v25 }
 0x116   :  { %1058 = vmatmul.f32.gmra.mxu2 %v6887_v36  ;;  %v6915_v36 = vand.u32 4294901760, %v1064_v48  ;;  %2203 = vmatpush.msrb.mxu3 %v6917_v47 }
 0x117   :  { %v1918_v23 = vand.u32 4294901760, %v1917_v18 }
 0x118   :  { %v261_v35 = vpop.f32.mrf.mxu0  ;;  %v418_v7 = vpop.f32.mrf.mxu1  ;;  %9768 = vst [vmem:[#allocation130_spill] sm:$0xff] %v6915_v36 }
 0x119   :  { %v419_v2 = vadd.f32 %v418_v7, %v253_v43  ;;  %v546_v45 = vpop.f32.mrf.mxu2  ;;  %v674_v8 = vpop.f32.mrf.mxu3  ;;  %1919 = vmatpush.msrb.mxu1 %v1918_v23  ;;  %v6923_v43 = vsub.f32 %v1728_v41, %v6917_v47 }
 0x11b   :  { %v547_v57 = vadd.f32 %v546_v45, %v419_v2  ;;  %808 = vmatmul.f32.gmra.mxu0 %v6469_v32  ;;  %901 = vmatmul.f32.gmra.mxu1 %v6428_v29  ;;  %v9531_v48 = vand.u32 4294901760, %v6923_v43 }
 0x11c   :  { %2077 = vmatpush.msrb.mxu2 %v6923_v43 }
 0x11d   :  { %v6925_v7 = vadd.f32 %v674_v8, %v547_v57  ;;  %1227 = vmatmul.f32.gmra.mxu3 %v6859_v3  ;;  %v1923_v23 = vsub.f32 %v6923_v43, %v9531_v48  ;;  %v1727_v8 = vld [vmem:[%s9383_s4 + $0x60] sm:$0xff] }
 0x11e   :  { %1066 = vmatmul.f32.gmra.mxu2 %v6915_v36  ;;  %v6938_v36 = vand.u32 4294901760, %v1727_v8 }
 0x11f   :  { %v1924_v25 = vand.u32 4294901760, %v1923_v23 }
 0x120   :  { %v422_v18 = vpop.f32.mrf.mxu1  ;;  %v749_v2 = vpop.f32.mrf.mxu0  ;;  %1754 = vmatpush.msrb.mxu0 %v6938_v36  ;;  %v6944_v48 = vsub.f32 %v1727_v8, %v6938_v36  ;;  %2205 = vmatpush.msrb.mxu3 %v6938_v36 }
 0x121   :  { %v423_v41 = vadd.f32 %v422_v18, %v261_v35  ;;  %v551_v45 = vpop.f32.mrf.mxu2  ;;  %v680_v57 = vpop.f32.mrf.mxu3  ;;  %1925 = vmatpush.msrb.mxu1 %v1924_v25  ;;  %v750_v23 = vadd.f32 %v749_v2, %v6604_v49 }
 0x122   :  { %v9537_v18 = vand.u32 4294901760, %v6944_v48  ;;  %2080 = vmatpush.msrb.mxu2 %v6944_v48 }
 0x123   :  { %v552_v29 = vadd.f32 %v551_v45, %v423_v41  ;;  %905 = vmatmul.f32.gmra.mxu1 %v6469_v32  ;;  %1281 = vmatmul.f32.vlgmr.msra.gmra.mxu0 %v6523_v28  ;;  %v1726_v28 = vld [vmem:[%s9383_s4 + $0x58] sm:$0xff] }
 0x124   :  { %v1929_v45 = vsub.f32 %v6944_v48, %v9537_v18  ;;  %v6960_v32 = vand.u32 4294901760, %v1726_v28 }
 0x125   :  { %v6946_v35 = vadd.f32 %v680_v57, %v552_v29  ;;  %1651 = vmatmul.f32.vlgmr.msra.gmra.mxu3 %v6508_v31 }
 0x126   :  { %1554 = vmatmul.f32.vlgmr.msra.gmra.mxu2 %v6508_v31  ;;  %v1930_v31 = vand.u32 4294901760, %v1929_v45  ;;  %1756 = vmatpush.msrb.mxu0 %v6960_v32  ;;  %v6966_v49 = vsub.f32 %v1726_v28, %v6960_v32 }
 0x127   :  { %9769 = vst [vmem:[#allocation131_spill] sm:$0xff] %v6946_v35  ;;  %2207 = vmatpush.msrb.mxu3 %v6960_v32 }
 0x128   :  { %v753_v25 = vpop.f32.mrf.mxu0  ;;  %v846_v41 = vpop.f32.mrf.mxu1  ;;  %1931 = vmatpush.msrb.mxu1 %v1930_v31  ;;  %2083 = vmatpush.msrb.mxu2 %v6966_v49 }
 0x129   :  { %v847_v29 = vadd.f32 %v846_v41, %v750_v23  ;;  %v947_v57 = vpop.f32.mrf.mxu2  ;;  %v1168_v8 = vpop.f32.mrf.mxu3  ;;  %v9540_v23 = vand.u32 4294901760, %v6966_v49  ;;  %v754_v41 = vadd.f32 %v753_v25, %v6629_v44 }
 0x12b   :  { %v948_v35 = vadd.f32 %v947_v57, %v847_v29  ;;  %1286 = vmatmul.f32.gmra.mxu0 %v6552_v1  ;;  %1395 = vmatmul.f32.vlgmr.msra.gmra.mxu1 %v6537_v21  ;;  %v1935_v28 = vsub.f32 %v6966_v49, %v9540_v23 }
 0x12d   :  { %v6968_v2 = vadd.f32 %v1168_v8, %v948_v35  ;;  %1655 = vmatmul.f32.gmra.mxu3 %v6539_v50  ;;  %v1725_v8 = vld [vmem:[%s9383_s4 + $0x50] sm:$0xff]  ;;  %v1936_v18 = vand.u32 4294901760, %v1935_v28 }
 0x12e   :  { %1558 = vmatmul.f32.gmra.mxu2 %v6539_v50  ;;  %v6982_v21 = vand.u32 4294901760, %v1725_v8 }
 0x12f   :  { %1937 = vmatpush.msrb.mxu1 %v1936_v18 }
 0x130   :  { %v757_v31 = vpop.f32.mrf.mxu0  ;;  %v850_v45 = vpop.f32.mrf.mxu1  ;;  %1758 = vmatpush.msrb.mxu0 %v6982_v21  ;;  %v6988_v44 = vsub.f32 %v1725_v8, %v6982_v21  ;;  %2209 = vmatpush.msrb.mxu3 %v6982_v21  ;;  %v1724_v8 = vld [vmem:[%s9383_s4 + $0x48] sm:$0xff] }
 0x131   :  { %v851_v35 = vadd.f32 %v850_v45, %v754_v41  ;;  %v955_v29 = vpop.f32.mrf.mxu2  ;;  %v1172_v57 = vpop.f32.mrf.mxu3  ;;  %v758_v45 = vadd.f32 %v757_v31, %v6650_v52 }
 0x132   :  { %v9543_v41 = vand.u32 4294901760, %v6988_v44  ;;  %2086 = vmatpush.msrb.mxu2 %v6988_v44 }
 0x133   :  { %v956_v1 = vadd.f32 %v955_v29, %v851_v35  ;;  %1291 = vmatmul.f32.gmra.mxu0 %v6581_v51  ;;  %1401 = vmatmul.f32.gmra.mxu1 %v6566_v10  ;;  %v7004_v10 = vand.u32 4294901760, %v1724_v8 }
 0x134   :  { %v1941_v35 = vsub.f32 %v6988_v44, %v9543_v41 }
 0x135   :  { %v6990_v25 = vadd.f32 %v1172_v57, %v956_v1  ;;  %1659 = vmatmul.f32.gmra.mxu3 %v6568_v19  ;;  %1760 = vmatpush.msrb.mxu0 %v7004_v10  ;;  %v7010_v52 = vsub.f32 %v1724_v8, %v7004_v10  ;;  %v1723_v8 = vld [vmem:[%s9383_s4 + $0x40] sm:$0xff] }
 0x136   :  { %1562 = vmatmul.f32.gmra.mxu2 %v6568_v19  ;;  %v1942_v23 = vand.u32 4294901760, %v1941_v35  ;;  %2211 = vmatpush.msrb.mxu3 %v7004_v10 }
 0x137   :  { %2089 = vmatpush.msrb.mxu2 %v7010_v52 }
 0x138   :  { %v761_v18 = vpop.f32.mrf.mxu0  ;;  %v854_v28 = vpop.f32.mrf.mxu1  ;;  %1943 = vmatpush.msrb.mxu1 %v1942_v23 }
 0x139   :  { %v855_v1 = vadd.f32 %v854_v28, %v758_v45  ;;  %v963_v29 = vpop.f32.mrf.mxu2  ;;  %v1176_v57 = vpop.f32.mrf.mxu3  ;;  %v9546_v45 = vand.u32 4294901760, %v7010_v52  ;;  %v762_v28 = vadd.f32 %v761_v18, %v6671_v55 }
 0x13b   :  { %v964_v51 = vadd.f32 %v963_v29, %v855_v1  ;;  %1296 = vmatmul.f32.gmra.mxu0 %v6611_v26  ;;  %1407 = vmatmul.f32.gmra.mxu1 %v6595_v5  ;;  %v1947_v1 = vsub.f32 %v7010_v52, %v9546_v45  ;;  %v7026_v5 = vand.u32 4294901760, %v1723_v8 }
 0x13d   :  { %v7012_v31 = vadd.f32 %v1176_v57, %v964_v51  ;;  %1663 = vmatmul.f32.gmra.mxu3 %v6597_v22  ;;  %v1948_v41 = vand.u32 4294901760, %v1947_v1  ;;  %1762 = vmatpush.msrb.mxu0 %v7026_v5  ;;  %v7032_v55 = vsub.f32 %v1723_v8, %v7026_v5  ;;  %v1722_v8 = vld [vmem:[%s9383_s4 + $0x38] sm:$0xff] }
 0x13e   :  { %1566 = vmatmul.f32.gmra.mxu2 %v6597_v22  ;;  %2213 = vmatpush.msrb.mxu3 %v7026_v5  ;;  %v9783_v22 = vld [vmem:[#allocation114_spill] sm:$0xff] }
 0x13f   :  { %1949 = vmatpush.msrb.mxu1 %v1948_v41  ;;  %2092 = vmatpush.msrb.mxu2 %v7032_v55 }
 0x140   :  { %v765_v23 = vpop.f32.mrf.mxu0  ;;  %v858_v35 = vpop.f32.mrf.mxu1 }
 0x141   :  { %v859_v51 = vadd.f32 %v858_v35, %v762_v28  ;;  %v971_v29 = vpop.f32.mrf.mxu2  ;;  %v1180_v57 = vpop.f32.mrf.mxu3  ;;  %v9549_v28 = vand.u32 4294901760, %v7032_v55  ;;  %v766_v35 = vadd.f32 %v765_v23, %v6692_v14 }
 0x143   :  { %v972_v26 = vadd.f32 %v971_v29, %v859_v51  ;;  %1301 = vmatmul.f32.gmra.mxu0 %v6636_v63  ;;  %1413 = vmatmul.f32.gmra.mxu1 %v6623_v33  ;;  %v1953_v51 = vsub.f32 %v7032_v55, %v9549_v28  ;;  %v7048_v33 = vand.u32 4294901760, %v1722_v8 }
 0x145   :  { %v7034_v18 = vadd.f32 %v1180_v57, %v972_v26  ;;  %1667 = vmatmul.f32.gmra.mxu3 %v6625_v42  ;;  %v1954_v45 = vand.u32 4294901760, %v1953_v51  ;;  %1764 = vmatpush.msrb.mxu0 %v7048_v33  ;;  %v7054_v14 = vsub.f32 %v1722_v8, %v7048_v33  ;;  %v1721_v8 = vld [vmem:[%s9383_s4 + $0x30] sm:$0xff] }
 0x146   :  { %1570 = vmatmul.f32.gmra.mxu2 %v6625_v42  ;;  %2215 = vmatpush.msrb.mxu3 %v7048_v33 }
 0x147   :  { %1955 = vmatpush.msrb.mxu1 %v1954_v45  ;;  %2095 = vmatpush.msrb.mxu2 %v7054_v14 }
 0x148   :  { %v769_v41 = vpop.f32.mrf.mxu0  ;;  %v862_v1 = vpop.f32.mrf.mxu1 }
 0x149   :  { %v863_v26 = vadd.f32 %v862_v1, %v766_v35  ;;  %v979_v29 = vpop.f32.mrf.mxu2  ;;  %v1184_v57 = vpop.f32.mrf.mxu3  ;;  %v9552_v35 = vand.u32 4294901760, %v7054_v14  ;;  %v770_v1 = vadd.f32 %v769_v41, %v6713_v37 }
 0x14b   :  { %v980_v63 = vadd.f32 %v979_v29, %v863_v26  ;;  %1306 = vmatmul.f32.gmra.mxu0 %v6657_v38  ;;  %1419 = vmatmul.f32.gmra.mxu1 %v6644_v24  ;;  %v1959_v26 = vsub.f32 %v7054_v14, %v9552_v35  ;;  %v7070_v24 = vand.u32 4294901760, %v1721_v8 }
 0x14d   :  { %v7056_v23 = vadd.f32 %v1184_v57, %v980_v63  ;;  %1671 = vmatmul.f32.gmra.mxu3 %v6646_v62  ;;  %v1960_v28 = vand.u32 4294901760, %v1959_v26  ;;  %1766 = vmatpush.msrb.mxu0 %v7070_v24  ;;  %v7076_v37 = vsub.f32 %v1721_v8, %v7070_v24  ;;  %v1720_v8 = vld [vmem:[%s9383_s4 + $0x28] sm:$0xff] }
 0x14e   :  { %1574 = vmatmul.f32.gmra.mxu2 %v6646_v62  ;;  %2217 = vmatpush.msrb.mxu3 %v7070_v24 }
 0x14f   :  { %1961 = vmatpush.msrb.mxu1 %v1960_v28  ;;  %2098 = vmatpush.msrb.mxu2 %v7076_v37 }
 0x150   :  { %v773_v45 = vpop.f32.mrf.mxu0  ;;  %v866_v51 = vpop.f32.mrf.mxu1 }
 0x151   :  { %v867_v63 = vadd.f32 %v866_v51, %v770_v1  ;;  %v987_v29 = vpop.f32.mrf.mxu2  ;;  %v1188_v57 = vpop.f32.mrf.mxu3  ;;  %v9555_v1 = vand.u32 4294901760, %v7076_v37  ;;  %v774_v51 = vadd.f32 %v773_v45, %v6734_v11 }
 0x153   :  { %v988_v38 = vadd.f32 %v987_v29, %v867_v63  ;;  %1311 = vmatmul.f32.gmra.mxu0 %v6678_v13  ;;  %1425 = vmatmul.f32.gmra.mxu1 %v6665_v4  ;;  %v1965_v63 = vsub.f32 %v7076_v37, %v9555_v1  ;;  %v7092_v4 = vand.u32 4294901760, %v1720_v8 }
 0x155   :  { %v7078_v41 = vadd.f32 %v1188_v57, %v988_v38  ;;  %1675 = vmatmul.f32.gmra.mxu3 %v6667_v40  ;;  %v1966_v35 = vand.u32 4294901760, %v1965_v63  ;;  %1768 = vmatpush.msrb.mxu0 %v7092_v4  ;;  %v7098_v11 = vsub.f32 %v1720_v8, %v7092_v4  ;;  %v1719_v8 = vld [vmem:[%s9383_s4 + $0x20] sm:$0xff] }
 0x156   :  { %1578 = vmatmul.f32.gmra.mxu2 %v6667_v40  ;;  %2219 = vmatpush.msrb.mxu3 %v7092_v4  ;;  %v9776_v40 = vld [vmem:[#allocation110_spill] sm:$0xff] }
 0x157   :  { %1967 = vmatpush.msrb.mxu1 %v1966_v35  ;;  %2101 = vmatpush.msrb.mxu2 %v7098_v11 }
 0x158   :  { %v777_v28 = vpop.f32.mrf.mxu0  ;;  %v870_v26 = vpop.f32.mrf.mxu1 }
 0x159   :  { %v871_v38 = vadd.f32 %v870_v26, %v774_v51  ;;  %v995_v29 = vpop.f32.mrf.mxu2  ;;  %v1192_v57 = vpop.f32.mrf.mxu3  ;;  %v9558_v51 = vand.u32 4294901760, %v7098_v11  ;;  %v778_v26 = vadd.f32 %v777_v28, %v6755_v60 }
 0x15b   :  { %v996_v13 = vadd.f32 %v995_v29, %v871_v38  ;;  %1316 = vmatmul.f32.gmra.mxu0 %v6699_v58  ;;  %1431 = vmatmul.f32.gmra.mxu1 %v6686_v15  ;;  %v1971_v38 = vsub.f32 %v7098_v11, %v9558_v51  ;;  %v7114_v15 = vand.u32 4294901760, %v1719_v8 }
 0x15d   :  { %v7100_v45 = vadd.f32 %v1192_v57, %v996_v13  ;;  %1679 = vmatmul.f32.gmra.mxu3 %v6688_v56  ;;  %v1972_v1 = vand.u32 4294901760, %v1971_v38  ;;  %1770 = vmatpush.msrb.mxu0 %v7114_v15  ;;  %v7120_v60 = vsub.f32 %v1719_v8, %v7114_v15  ;;  %v1718_v8 = vld [vmem:[%s9383_s4 + $0x18] sm:$0xff] }
 0x15e   :  { %1582 = vmatmul.f32.gmra.mxu2 %v6688_v56  ;;  %2221 = vmatpush.msrb.mxu3 %v7114_v15  ;;  %v9775_v56 = vld [vmem:[#allocation112_spill] sm:$0xff] }
 0x15f   :  { %1973 = vmatpush.msrb.mxu1 %v1972_v1  ;;  %2104 = vmatpush.msrb.mxu2 %v7120_v60 }
 0x160   :  { %v781_v35 = vpop.f32.mrf.mxu0  ;;  %v874_v63 = vpop.f32.mrf.mxu1 }
 0x161   :  { %v875_v13 = vadd.f32 %v874_v63, %v778_v26  ;;  %v1003_v29 = vpop.f32.mrf.mxu2  ;;  %v1196_v57 = vpop.f32.mrf.mxu3  ;;  %v9561_v26 = vand.u32 4294901760, %v7120_v60  ;;  %v782_v63 = vadd.f32 %v781_v35, %v6776_v39 }
 0x163   :  { %v1004_v58 = vadd.f32 %v1003_v29, %v875_v13  ;;  %1321 = vmatmul.f32.gmra.mxu0 %v6720_v27  ;;  %1437 = vmatmul.f32.gmra.mxu1 %v6707_v6  ;;  %v1977_v13 = vsub.f32 %v7120_v60, %v9561_v26  ;;  %v7136_v6 = vand.u32 4294901760, %v1718_v8 }
 0x165   :  { %v7122_v28 = vadd.f32 %v1196_v57, %v1004_v58  ;;  %1683 = vmatmul.f32.gmra.mxu3 %v6709_v46  ;;  %v1978_v51 = vand.u32 4294901760, %v1977_v13  ;;  %1772 = vmatpush.msrb.mxu0 %v7136_v6  ;;  %v7142_v39 = vsub.f32 %v1718_v8, %v7136_v6  ;;  %v1717_v8 = vld [vmem:[%s9383_s4 + $0x10] sm:$0xff] }
 0x166   :  { %1586 = vmatmul.f32.gmra.mxu2 %v6709_v46  ;;  %2223 = vmatpush.msrb.mxu3 %v7136_v6 }
 0x167   :  { %1979 = vmatpush.msrb.mxu1 %v1978_v51  ;;  %2107 = vmatpush.msrb.mxu2 %v7142_v39 }
 0x168   :  { %v785_v1 = vpop.f32.mrf.mxu0  ;;  %v878_v38 = vpop.f32.mrf.mxu1 }
 0x169   :  { %v879_v58 = vadd.f32 %v878_v38, %v782_v63  ;;  %v1011_v29 = vpop.f32.mrf.mxu2  ;;  %v1200_v57 = vpop.f32.mrf.mxu3  ;;  %v9564_v63 = vand.u32 4294901760, %v7142_v39  ;;  %v786_v38 = vadd.f32 %v785_v1, %v6797_v30 }
 0x16b   :  { %v1012_v27 = vadd.f32 %v1011_v29, %v879_v58  ;;  %1326 = vmatmul.f32.gmra.mxu0 %v6741_v9  ;;  %1443 = vmatmul.f32.gmra.mxu1 %v6728_v34  ;;  %v1983_v58 = vsub.f32 %v7142_v39, %v9564_v63  ;;  %v7158_v34 = vand.u32 4294901760, %v1717_v8  ;;  %v1716_v63 = vld [vmem:[%s9383_s4 + $0x8] sm:$0xff] }
 0x16d   :  { %v7144_v35 = vadd.f32 %v1200_v57, %v1012_v27  ;;  %1687 = vmatmul.f32.gmra.mxu3 %v6730_v59  ;;  %v1984_v26 = vand.u32 4294901760, %v1983_v58  ;;  %1774 = vmatpush.msrb.mxu0 %v7158_v34  ;;  %v7164_v30 = vsub.f32 %v1717_v8, %v7158_v34 }
 0x16e   :  { %1590 = vmatmul.f32.gmra.mxu2 %v6730_v59  ;;  %2225 = vmatpush.msrb.mxu3 %v7158_v34 }
 0x16f   :  { %1985 = vmatpush.msrb.mxu1 %v1984_v26  ;;  %2110 = vmatpush.msrb.mxu2 %v7164_v30 }
 0x170   :  { %v789_v51 = vpop.f32.mrf.mxu0  ;;  %v882_v13 = vpop.f32.mrf.mxu1 }
 0x171   :  { %v883_v27 = vadd.f32 %v882_v13, %v786_v38  ;;  %v1019_v29 = vpop.f32.mrf.mxu2  ;;  %v1204_v57 = vpop.f32.mrf.mxu3  ;;  %v9770_v38 = vld [vmem:[#allocation103_spill] sm:$0xff]  ;;  %v9568_v13 = vand.u32 4294901760, %v7164_v30  ;;  %v790_v58 = vadd.f32 %v789_v51, %v6818_v20  ;;  %v9771_v20 = vld [vmem:[#allocation108_spill] sm:$0xff]  ;;  %v9772_v51 = vld [vmem:[#allocation106_spill] sm:$0xff] }
 0x173   :  { %v1020_v9 = vadd.f32 %v1019_v29, %v883_v27  ;;  %1331 = vmatmul.f32.gmra.mxu0 %v6762_v16  ;;  %1449 = vmatmul.f32.gmra.mxu1 %v6749_v17  ;;  %v1989_v29 = vsub.f32 %v7164_v30, %v9568_v13  ;;  %v7180_v16 = vand.u32 4294901760, %v1716_v63 }
 0x175   :  { %v7166_v1 = vadd.f32 %v1204_v57, %v1020_v9  ;;  %1691 = vmatmul.f32.gmra.mxu3 %v9770_v38  ;;  %v1990_v17 = vand.u32 4294901760, %v1989_v29  ;;  %1776 = vmatpush.msrb.mxu0 %v7180_v16  ;;  %v7186_v13 = vsub.f32 %v1716_v63, %v7180_v16 }
 0x176   :  { %1594 = vmatmul.f32.gmra.mxu2 %v9770_v38  ;;  %2227 = vmatpush.msrb.mxu3 %v7180_v16 }
 0x177   :  { %1991 = vmatpush.msrb.mxu1 %v1990_v17  ;;  %v9578_v29 = vand.u32 4294901760, %v7186_v13  ;;  %v1715_v17 = vld [vmem:[%s9383_s4] sm:$0xff]  ;;  %2113 = vmatpush.msrb.mxu2 %v7186_v13 }
 0x178   :  { %v793_v26 = vpop.f32.mrf.mxu0  ;;  %v886_v27 = vpop.f32.mrf.mxu1 }
 0x179   :  { %v887_v9 = vadd.f32 %v886_v27, %v790_v58  ;;  %v1027_v57 = vpop.f32.mrf.mxu2  ;;  %v1208_v8 = vpop.f32.mrf.mxu3  ;;  %v9773_v27 = vld [vmem:[#allocation107_spill] sm:$0xff] }
 0x17b   :  { %v1028_v38 = vadd.f32 %v1027_v57, %v887_v9  ;;  %1336 = vmatmul.f32.gmra.mxu0 %v9771_v20  ;;  %1455 = vmatmul.f32.gmra.mxu1 %v9772_v51  ;;  %v9774_v9 = vld [vmem:[#allocation120_spill] sm:$0xff] }
 0x17c   :  { %v794_v57 = vadd.f32 %v793_v26, %v9774_v9 }
 0x17d   :  { %v7188_v58 = vadd.f32 %v1208_v8, %v1028_v38  ;;  %1695 = vmatmul.f32.gmra.mxu3 %v9773_v27  ;;  %v1995_v38 = vsub.f32 %v7186_v13, %v9578_v29  ;;  %v7202_v8 = vand.u32 4294901760, %v1715_v17 }
 0x17e   :  { %1598 = vmatmul.f32.gmra.mxu2 %v9773_v27 }
 0x17f   :  { %v1996_v46 = vand.u32 4294901760, %v1995_v38  ;;  %1778 = vmatpush.msrb.mxu0 %v7202_v8  ;;  %v7206_v26 = vsub.f32 %v1715_v17, %v7202_v8  ;;  %2229 = vmatpush.msrb.mxu3 %v7202_v8  ;;  %v9778_v38 = vand.u32 4294901760, %v6867_v12  ;;  %v9781_v12 = vand.u32 4294901760, %v6923_v43 }
 0x180   :  { %v797_v63 = vpop.f32.mrf.mxu0  ;;  %v890_v51 = vpop.f32.mrf.mxu1 }
 0x181   :  { %v891_v20 = vadd.f32 %v890_v51, %v794_v57  ;;  %v1035_v27 = vpop.f32.mrf.mxu2  ;;  %v1212_v59 = vpop.f32.mrf.mxu3  ;;  %1997 = vmatpush.msrb.mxu1 %v1996_v46  ;;  %v9586_v29 = vand.u32 4294901760, %v7206_v26  ;;  %2116 = vmatpush.msrb.mxu2 %v7206_v26  ;;  %v9777_v57 = vld [vmem:[#allocation111_spill] sm:$0xff]  ;;  %v9780_v46 = vand.u32 4294901760, %v6898_v0  ;;  %v9785_v0 = vand.u32 4294901760, %v6944_v48 }
 0x182   :  { %2330 = vmatpush.msra.mxu0 %v9778_v38 }
 0x183   :  { %v1036_v9 = vadd.f32 %v1035_v27, %v891_v20  ;;  %1341 = vmatmul.f32.gmra.mxu0 %v9775_v56  ;;  %1461 = vmatmul.f32.gmra.mxu1 %v9776_v40  ;;  %v2001_v20 = vsub.f32 %v7206_v26, %v9586_v29  ;;  %v9779_v27 = vld [vmem:[#allocation126_spill] sm:$0xff]  ;;  %v9784_v29 = vld [vmem:[#allocation125_spill] sm:$0xff] }
 0x184   :  { %v798_v17 = vadd.f32 %v797_v63, %v9779_v27  ;;  %2334 = vmatpush.msra.mxu0 %v9780_v46 }
 0x185   :  { %v7213_v51 = vadd.f32 %v1212_v59, %v1036_v9  ;;  %1699 = vmatmul.f32.gmra.mxu3 %v9777_v57  ;;  %v2002_v59 = vand.u32 4294901760, %v2001_v20  ;;  %v9786_v20 = vld [vmem:[#allocation115_spill] sm:$0xff] }
 0x186   :  { %1602 = vmatmul.f32.gmra.mxu2 %v9777_v57  ;;  %2338 = vmatpush.msra.mxu0 %v9781_v12  ;;  %v9782_v57 = vld [vmem:[#allocation116_spill] sm:$0xff]  ;;  %v9793_v12 = vand.u32 4294901760, %v7054_v14  ;;  %v9798_v14 = vand.u32 4294901760, %v7098_v11  ;;  %v9802_v11 = vand.u32 4294901760, %v7142_v39  ;;  %v9806_v39 = vand.u32 4294901760, %v7186_v13  ;;  %v9812_v13 = vld [vmem:[#allocation6_spill] sm:$0xff] }
 0x187   :  { %2003 = vmatpush.msrb.mxu1 %v2002_v59  ;;  %v9789_v59 = vld [vmem:[#allocation121_spill] sm:$0xff] }
 0x188   :  { %v801_v40 = vpop.f32.mrf.mxu0  ;;  %v894_v56 = vpop.f32.mrf.mxu1  ;;  %2342 = vmatpush.msra.mxu0 %v9785_v0  ;;  %v9794_v0 = vld [vmem:[#allocation127_spill] sm:$0xff] }
 0x189   :  { %v895_v9 = vadd.f32 %v894_v56, %v798_v17  ;;  %v1043_v62 = vpop.f32.mrf.mxu2  ;;  %v1216_v42 = vpop.f32.mrf.mxu3  ;;  %2457 = vmatpush.msra.mxu1 %v9784_v29  ;;  %v802_v56 = vadd.f32 %v801_v40, %v6900_v61  ;;  %v9791_v40 = vand.u32 4294901760, %v7010_v52 }
 0x18b   :  { %v1044_v38 = vadd.f32 %v1043_v62, %v895_v9  ;;  %1346 = vmatmul.f32.gmra.mxu0 %v9782_v57  ;;  %1467 = vmatmul.f32.gmra.mxu1 %v9783_v22  ;;  %v9787_v62 = vand.u32 4294901760, %v6966_v49 }
 0x18c   :  { %2459 = vmatpush.msra.mxu1 %v6892_v54  ;;  %v9790_v54 = vld [vmem:[#allocation118_spill] sm:$0xff] }
 0x18d   :  { %v7232_v63 = vadd.f32 %v1216_v42, %v1044_v38  ;;  %1703 = vmatmul.f32.gmra.mxu3 %v9786_v20  ;;  %2346 = vmatpush.msra.mxu0 %v9787_v62  ;;  %v9788_v42 = vand.u32 4294901760, %v6988_v44 }
 0x18e   :  { %1606 = vmatmul.f32.gmra.mxu2 %v9786_v20  ;;  %2461 = vmatpush.msra.mxu1 %v6917_v47  ;;  %v9792_v47 = vand.u32 4294901760, %v7032_v55  ;;  %v9864_v20 = vld [vmem:[#allocation55_spill] sm:$0xff] }
 0x18f   :  { %2350 = vmatpush.msra.mxu0 %v9788_v42  ;;  %v9804_v42 = vld [vmem:[#allocation3_spill] sm:$0xff] }
 0x190   :  { %v805_v43 = vpop.f32.mrf.mxu0  ;;  %v898_v27 = vpop.f32.mrf.mxu1  ;;  %2463 = vmatpush.msra.mxu1 %v6938_v36 }
 0x191   :  { %v899_v29 = vadd.f32 %v898_v27, %v802_v56  ;;  %v1051_v48 = vpop.f32.mrf.mxu2  ;;  %v1220_v17 = vpop.f32.mrf.mxu3  ;;  %2354 = vmatpush.msra.mxu0 %v9791_v40  ;;  %v806_v36 = vadd.f32 %v805_v43, %v6925_v7  ;;  %v9796_v7 = vand.u32 4294901760, %v7076_v37  ;;  %v9799_v27 = vand.u32 4294901760, %v7120_v60 }
 0x192   :  { %2465 = vmatpush.msra.mxu1 %v6960_v32  ;;  %v9805_v60 = vand.u32 4294901760, %v7164_v30  ;;  %v9808_v30 = vld [vmem:[#allocation11_spill] sm:$0xff] }
 0x193   :  { %v1052_v46 = vadd.f32 %v1051_v48, %v899_v29  ;;  %1351 = vmatmul.f32.gmra.mxu0 %v9789_v59  ;;  %1473 = vmatmul.f32.gmra.mxu1 %v9790_v54  ;;  %v9800_v48 = vld [vmem:[#allocation129_spill] sm:$0xff]  ;;  %v9859_v54 = vld [vmem:[#allocation51_spill] sm:$0xff] }
 0x194   :  { %2467 = vmatpush.msra.mxu1 %v6982_v21  ;;  %2358 = vmatpush.msra.mxu0 %v9792_v47  ;;  %v9795_v21 = vld [vmem:[#allocation123_spill] sm:$0xff]  ;;  %v9860_v59 = vld [vmem:[#allocation41_spill] sm:$0xff] }
 0x195   :  { %v7249_v61 = vadd.f32 %v1220_v17, %v1052_v46  ;;  %1707 = vmatmul.f32.gmra.mxu3 %v6835_v53 }
 0x196   :  { %1610 = vmatmul.f32.gmra.mxu2 %v6835_v53  ;;  %2469 = vmatpush.msra.mxu1 %v7004_v10  ;;  %v9797_v10 = vld [vmem:[#allocation131_spill] sm:$0xff] }
 0x197   :  { %2362 = vmatpush.msra.mxu0 %v9793_v12 }
 0x198   :  { %v809_v49 = vpop.f32.mrf.mxu0  ;;  %v902_v44 = vpop.f32.mrf.mxu1  ;;  %2471 = vmatpush.msra.mxu1 %v7026_v5 }
 0x199   :  { %v903_v32 = vadd.f32 %v902_v44, %v806_v36  ;;  %v1059_v52 = vpop.f32.mrf.mxu2  ;;  %v1224_v9 = vpop.f32.mrf.mxu3  ;;  %2366 = vmatpush.msra.mxu0 %v9796_v7  ;;  %v810_v5 = vadd.f32 %v809_v49, %v9797_v10  ;;  %v9807_v49 = vand.u32 4294901760, %v7206_v26  ;;  %v9813_v10 = vld [vmem:[#allocation15_spill] sm:$0xff] }
 0x19a   :  { %2473 = vmatpush.msra.mxu1 %v7048_v33 }
 0x19b   :  { %v1060_v38 = vadd.f32 %v1059_v52, %v903_v32  ;;  %1356 = vmatmul.f32.gmra.mxu0 %v9794_v0  ;;  %1479 = vmatmul.f32.gmra.mxu1 %v9795_v21  ;;  %v9809_v32 = vld [vmem:[#allocation2_spill] sm:$0xff] }
 0x19c   :  { %2475 = vmatpush.msra.mxu1 %v7070_v24  ;;  %2370 = vmatpush.msra.mxu0 %v9798_v14  ;;  %v9801_v24 = vld [vmem:[#allocation7_spill] sm:$0xff] }
 0x19d   :  { %v7266_v55 = vadd.f32 %v1224_v9, %v1060_v38  ;;  %1711 = vmatmul.f32.gmra.mxu3 %v6859_v3 }
 0x19e   :  { %1614 = vmatmul.f32.gmra.mxu2 %v6859_v3  ;;  %2477 = vmatpush.msra.mxu1 %v7092_v4  ;;  %v9803_v4 = vld [vmem:[#allocation4_spill] sm:$0xff] }
 0x19f   :  { %2374 = vmatpush.msra.mxu0 %v9799_v27 }
 0x1a0   :  { %v906_v56 = vpop.f32.mrf.mxu1  ;;  %v1282_v62 = vpop.f32.mrf.mxu0  ;;  %2479 = vmatpush.msra.mxu1 %v7114_v15 }
 0x1a1   :  { %v907_v33 = vadd.f32 %v906_v56, %v810_v5  ;;  %v1067_v37 = vpop.f32.mrf.mxu2  ;;  %v1228_v43 = vpop.f32.mrf.mxu3  ;;  %2378 = vmatpush.msra.mxu0 %v9802_v11  ;;  %v1283_v15 = vadd.f32 %v1282_v62, %v6968_v2  ;;  %v9811_v2 = vld [vmem:[#allocation8_spill] sm:$0xff]  ;;  %v9814_v5 = vld [vmem:[#allocation5_spill] sm:$0xff]  ;;  %v9817_v56 = vld [vmem:[#allocation10_spill] sm:$0xff] }
 0x1a2   :  { %2481 = vmatpush.msra.mxu1 %v7136_v6  ;;  %v9819_v11 = vld [vmem:[#allocation9_spill] sm:$0xff] }
 0x1a3   :  { %v1068_v29 = vadd.f32 %v1067_v37, %v907_v33  ;;  %1485 = vmatmul.f32.gmra.mxu1 %v9800_v48  ;;  %1784 = vmatmul.f32.vlgmr.msrb.gmra.mxu0 %v9801_v24  ;;  %v9818_v24 = vld [vmem:[#allocation19_spill] sm:$0xff] }
 0x1a4   :  { %2382 = vmatpush.msra.mxu0 %v9805_v60  ;;  %2483 = vmatpush.msra.mxu1 %v7158_v34  ;;  %v9822_v60 = vld [vmem:[#allocation14_spill] sm:$0xff] }
 0x1a5   :  { %v7283_v17 = vadd.f32 %v1228_v43, %v1068_v29  ;;  %2233 = vmatmul.f32.vlgmr.msrb.gmra.mxu3 %v9803_v4 }
 0x1a6   :  { %2119 = vmatmul.f32.vlgmr.msrb.gmra.mxu2 %v9804_v42  ;;  %2386 = vmatpush.msra.mxu0 %v9806_v39  ;;  %v9821_v42 = vld [vmem:[#allocation16_spill] sm:$0xff] }
 0x1a7   :  { %2485 = vmatpush.msra.mxu1 %v7180_v16 }
 0x1a8   :  { %v1287_v46 = vpop.f32.mrf.mxu0  ;;  %v1396_v40 = vpop.f32.mrf.mxu1  ;;  %2390 = vmatpush.msra.mxu0 %v9807_v49  ;;  %v9824_v49 = vld [vmem:[#allocation13_spill] sm:$0xff] }
 0x1a9   :  { %v1397_v36 = vadd.f32 %v1396_v40, %v1283_v15  ;;  %v1555_v6 = vpop.f32.mrf.mxu2  ;;  %v1652_v47 = vpop.f32.mrf.mxu3  ;;  %2487 = vmatpush.msra.mxu1 %v7202_v8  ;;  %v1288_v52 = vadd.f32 %v1287_v46, %v6990_v25  ;;  %v9816_v8 = vld [vmem:[#allocation12_spill] sm:$0xff] }
 0x1ab   :  { %v1556_v44 = vadd.f32 %v1555_v6, %v1397_v36  ;;  %1792 = vmatmul.f32.gmra.mxu0 %v9808_v30  ;;  %2005 = vmatmul.f32.vlgmr.msrb.gmra.mxu1 %v9809_v32  ;;  %v9826_v30 = vld [vmem:[#allocation20_spill] sm:$0xff] }
 0x1ad   :  { %v7299_v34 = vadd.f32 %v1652_v47, %v1556_v44  ;;  %2239 = vmatmul.f32.gmra.mxu3 %v9811_v2  ;;  %v9823_v47 = vld [vmem:[#allocation23_spill] sm:$0xff]  ;;  %v9827_v2 = vld [vmem:[#allocation18_spill] sm:$0xff] }
 0x1ae   :  { %2124 = vmatmul.f32.gmra.mxu2 %v9812_v13 }
 0x1af   :  { %9810 = vst [vmem:[#allocation120_spill] sm:$0xff] %v7299_v34 }
 0x1b0   :  { %v1292_v9 = vpop.f32.mrf.mxu0  ;;  %v1402_v16 = vpop.f32.mrf.mxu1 }
 0x1b1   :  { %v1403_v12 = vadd.f32 %v1402_v16, %v1288_v52  ;;  %v1559_v26 = vpop.f32.mrf.mxu2  ;;  %v1656_v38 = vpop.f32.mrf.mxu3  ;;  %v1293_v62 = vadd.f32 %v1292_v9, %v7012_v31 }
 0x1b3   :  { %v1560_v7 = vadd.f32 %v1559_v26, %v1403_v12  ;;  %1800 = vmatmul.f32.gmra.mxu0 %v9813_v10  ;;  %2009 = vmatmul.f32.gmra.mxu1 %v9814_v5 }
 0x1b5   :  { %v7306_v14 = vadd.f32 %v1656_v38, %v1560_v7  ;;  %2245 = vmatmul.f32.gmra.mxu3 %v9816_v8  ;;  %v9828_v38 = vld [vmem:[#allocation27_spill] sm:$0xff]  ;;  %v9829_v7 = vld [vmem:[#allocation17_spill] sm:$0xff]  ;;  %v9831_v8 = vld [vmem:[#allocation24_spill] sm:$0xff] }
 0x1b6   :  { %2129 = vmatmul.f32.gmra.mxu2 %v9817_v56  ;;  %v9832_v56 = vld [vmem:[#allocation22_spill] sm:$0xff] }
 0x1b7   :  { %9815 = vst [vmem:[#allocation126_spill] sm:$0xff] %v7306_v14 }
 0x1b8   :  { %v1297_v33 = vpop.f32.mrf.mxu0  ;;  %v1408_v25 = vpop.f32.mrf.mxu1 }
 0x1b9   :  { %v1409_v37 = vadd.f32 %v1408_v25, %v1293_v62  ;;  %v1563_v43 = vpop.f32.mrf.mxu2  ;;  %v1660_v27 = vpop.f32.mrf.mxu3  ;;  %v1298_v15 = vadd.f32 %v1297_v33, %v7034_v18 }
 0x1bb   :  { %v1564_v29 = vadd.f32 %v1563_v43, %v1409_v37  ;;  %1808 = vmatmul.f32.gmra.mxu0 %v9818_v24  ;;  %2013 = vmatmul.f32.gmra.mxu1 %v9819_v11  ;;  %v9834_v24 = vld [vmem:[#allocation21_spill] sm:$0xff] }
 0x1bd   :  { %v7313_v4 = vadd.f32 %v1660_v27, %v1564_v29  ;;  %2251 = vmatmul.f32.gmra.mxu3 %v9821_v42  ;;  %v9833_v29 = vld [vmem:[#allocation31_spill] sm:$0xff] }
 0x1be   :  { %2134 = vmatmul.f32.gmra.mxu2 %v9822_v60  ;;  %v9836_v60 = vld [vmem:[#allocation28_spill] sm:$0xff] }
 0x1bf   :  { %9820 = vst [vmem:[#allocation125_spill] sm:$0xff] %v7313_v4 }
 0x1c0   :  { %v1302_v46 = vpop.f32.mrf.mxu0  ;;  %v1414_v31 = vpop.f32.mrf.mxu1 }
 0x1c1   :  { %v1415_v40 = vadd.f32 %v1414_v31, %v1298_v15  ;;  %v1567_v39 = vpop.f32.mrf.mxu2  ;;  %v1664_v36 = vpop.f32.mrf.mxu3  ;;  %v1303_v13 = vadd.f32 %v1302_v46, %v7056_v23  ;;  %v9837_v15 = vld [vmem:[#allocation26_spill] sm:$0xff] }
 0x1c3   :  { %v1568_v6 = vadd.f32 %v1567_v39, %v1415_v40  ;;  %1816 = vmatmul.f32.gmra.mxu0 %v9823_v47  ;;  %2017 = vmatmul.f32.gmra.mxu1 %v9824_v49  ;;  %v9838_v47 = vld [vmem:[#allocation35_spill] sm:$0xff] }
 0x1c5   :  { %v7320_v44 = vadd.f32 %v1664_v36, %v1568_v6  ;;  %2257 = vmatmul.f32.gmra.mxu3 %v9826_v30  ;;  %v9839_v30 = vld [vmem:[#allocation25_spill] sm:$0xff] }
 0x1c6   :  { %2139 = vmatmul.f32.gmra.mxu2 %v9827_v2 }
 0x1c7   :  { %9825 = vst [vmem:[#allocation131_spill] sm:$0xff] %v7320_v44 }
 0x1c8   :  { %v1307_v52 = vpop.f32.mrf.mxu0  ;;  %v1420_v18 = vpop.f32.mrf.mxu1 }
 0x1c9   :  { %v1421_v9 = vadd.f32 %v1420_v18, %v1303_v13  ;;  %v1571_v16 = vpop.f32.mrf.mxu2  ;;  %v1668_v12 = vpop.f32.mrf.mxu3  ;;  %v1308_v62 = vadd.f32 %v1307_v52, %v7078_v41  ;;  %v9841_v13 = vld [vmem:[#allocation32_spill] sm:$0xff]  ;;  %v9842_v52 = vld [vmem:[#allocation30_spill] sm:$0xff] }
 0x1cb   :  { %v1572_v26 = vadd.f32 %v1571_v16, %v1421_v9  ;;  %1824 = vmatmul.f32.gmra.mxu0 %v9828_v38  ;;  %2021 = vmatmul.f32.gmra.mxu1 %v9829_v7 }
 0x1cd   :  { %v7327_v10 = vadd.f32 %v1668_v12, %v1572_v26  ;;  %2263 = vmatmul.f32.gmra.mxu3 %v9831_v8 }
 0x1ce   :  { %2144 = vmatmul.f32.gmra.mxu2 %v9832_v56  ;;  %v1745_v56 = vld [vmem:[%s9383_s4 + $0xf0] sm:$0xff] }
 0x1cf   :  { %9830 = vst [vmem:[#allocation7_spill] sm:$0xff] %v7327_v10 }
 0x1d0   :  { %v1312_v33 = vpop.f32.mrf.mxu0  ;;  %v1426_v23 = vpop.f32.mrf.mxu1 }
 0x1d1   :  { %v1427_v25 = vadd.f32 %v1426_v23, %v1308_v62  ;;  %v1575_v37 = vpop.f32.mrf.mxu2  ;;  %v1672_v43 = vpop.f32.mrf.mxu3  ;;  %v1313_v46 = vadd.f32 %v1312_v33, %v7100_v45  ;;  %v1746_v45 = vld [vmem:[%s9383_s4 + $0xf8] sm:$0xff]  ;;  %v9843_v23 = vld [vmem:[#allocation39_spill] sm:$0xff] }
 0x1d2   :  { %v7349_v12 = vand.u32 4294901760, %v1746_v45 }
 0x1d3   :  { %v1576_v27 = vadd.f32 %v1575_v37, %v1427_v25  ;;  %1832 = vmatmul.f32.gmra.mxu0 %v9833_v29  ;;  %2025 = vmatmul.f32.gmra.mxu1 %v9834_v24  ;;  %v9844_v25 = vld [vmem:[#allocation29_spill] sm:$0xff]  ;;  %v1744_v37 = vld [vmem:[%s9383_s4 + $0xe8] sm:$0xff] }
 0x1d4   :  { %2554 = vmatpush.msra.mxu2 %v7349_v12  ;;  %v7356_v62 = vsub.f32 %v1746_v45, %v7349_v12  ;;  %3005 = vmatpush.msrb.mxu1 %v7349_v12 }
 0x1d5   :  { %v7334_v42 = vadd.f32 %v1672_v43, %v1576_v27  ;;  %2269 = vmatmul.f32.gmra.mxu3 %v9836_v60  ;;  %v7368_v27 = vand.u32 4294901760, %v1744_v37 }
 0x1d6   :  { %2149 = vmatmul.f32.gmra.mxu2 %v9837_v15  ;;  %v9591_v43 = vand.u32 4294901760, %v7356_v62  ;;  %2877 = vmatpush.msrb.mxu0 %v7356_v62  ;;  %v9846_v15 = vld [vmem:[#allocation36_spill] sm:$0xff] }
 0x1d7   :  { %9835 = vst [vmem:[#allocation4_spill] sm:$0xff] %v7334_v42 }
 0x1d8   :  { %v1317_v31 = vpop.f32.mrf.mxu0  ;;  %v1432_v41 = vpop.f32.mrf.mxu1 }
 0x1d9   :  { %v1433_v40 = vadd.f32 %v1432_v41, %v1313_v46  ;;  %v1579_v39 = vpop.f32.mrf.mxu2  ;;  %v1676_v36 = vpop.f32.mrf.mxu3  ;;  %v1318_v18 = vadd.f32 %v1317_v31, %v7122_v28  ;;  %v7358_v28 = vand.u32 4294901760, %v1745_v56  ;;  %v1743_v46 = vld [vmem:[%s9383_s4 + $0xe0] sm:$0xff]  ;;  %v2717_v41 = vsub.f32 %v7356_v62, %v9591_v43 }
 0x1da   :  { %v9847_v31 = vld [vmem:[#allocation34_spill] sm:$0xff] }
 0x1db   :  { %v1580_v6 = vadd.f32 %v1579_v39, %v1433_v40  ;;  %1840 = vmatmul.f32.gmra.mxu0 %v9838_v47  ;;  %2029 = vmatmul.f32.gmra.mxu1 %v9839_v30  ;;  %v7371_v29 = vsub.f32 %v1745_v56, %v7358_v28  ;;  %v7386_v39 = vand.u32 4294901760, %v1743_v46  ;;  %v1742_v47 = vld [vmem:[%s9383_s4 + $0xd8] sm:$0xff]  ;;  %v1741_v56 = vld [vmem:[%s9383_s4 + $0xd0] sm:$0xff] }
 0x1dc   :  { %2556 = vmatpush.msra.mxu2 %v7358_v28  ;;  %3007 = vmatpush.msrb.mxu1 %v7358_v28 }
 0x1dd   :  { %v7341_v2 = vadd.f32 %v1676_v36, %v1580_v6  ;;  %2275 = vmatmul.f32.gmra.mxu3 %v9841_v13  ;;  %v9589_v40 = vand.u32 4294901760, %v7371_v29  ;;  %v7389_v36 = vsub.f32 %v1744_v37, %v7368_v27  ;;  %2880 = vmatpush.msrb.mxu0 %v7371_v29  ;;  %v7416_v37 = vand.u32 4294901760, %v1741_v56 }
 0x1de   :  { %2154 = vmatmul.f32.gmra.mxu2 %v9842_v52  ;;  %3009 = vmatpush.msrb.mxu1 %v7368_v27 }
 0x1df   :  { %9840 = vst [vmem:[#allocation3_spill] sm:$0xff] %v7341_v2  ;;  %2558 = vmatpush.msra.mxu2 %v7368_v27  ;;  %v2723_v45 = vsub.f32 %v7371_v29, %v9589_v40  ;;  %2883 = vmatpush.msrb.mxu0 %v7389_v36 }
 0x1e0   :  { %v1322_v9 = vpop.f32.mrf.mxu0  ;;  %v1438_v16 = vpop.f32.mrf.mxu1  ;;  %3011 = vmatpush.msrb.mxu1 %v7386_v39 }
 0x1e1   :  { %v1439_v26 = vadd.f32 %v1438_v16, %v1318_v18  ;;  %v1583_v38 = vpop.f32.mrf.mxu2  ;;  %v1680_v8 = vpop.f32.mrf.mxu3  ;;  %v1323_v6 = vadd.f32 %v1322_v9, %v7144_v35  ;;  %v2718_v18 = vand.u32 4294901760, %v2717_v41  ;;  %v9587_v16 = vand.u32 4294901760, %v7389_v36  ;;  %2560 = vmatpush.msra.mxu2 %v7386_v39  ;;  %v9849_v41 = vld [vmem:[#allocation33_spill] sm:$0xff] }
 0x1e3   :  { %v1584_v33 = vadd.f32 %v1583_v38, %v1439_v26  ;;  %1848 = vmatmul.f32.gmra.mxu0 %v9843_v23  ;;  %2033 = vmatmul.f32.gmra.mxu1 %v9844_v25  ;;  %v7402_v26 = vand.u32 4294901760, %v1742_v47  ;;  %v2729_v23 = vsub.f32 %v7389_v36, %v9587_v16 }
 0x1e4   :  { %2719 = vmatpush.msra.mxu3 %v2718_v18 }
 0x1e5   :  { %v7374_v60 = vadd.f32 %v1680_v8, %v1584_v33  ;;  %2281 = vmatmul.f32.gmra.mxu3 %v9846_v15  ;;  %v7407_v8 = vsub.f32 %v1743_v46, %v7386_v39  ;;  %v2724_v33 = vand.u32 4294901760, %v2723_v45  ;;  %v7419_v15 = vsub.f32 %v1742_v47, %v7402_v26  ;;  %v9848_v46 = vld [vmem:[#allocation43_spill] sm:$0xff]  ;;  %2562 = vmatpush.msra.mxu2 %v7402_v26 }
 0x1e6   :  { %2159 = vmatmul.f32.gmra.mxu2 %v9847_v31  ;;  %v2730_v18 = vand.u32 4294901760, %v2729_v23  ;;  %v7432_v47 = vsub.f32 %v1741_v56, %v7416_v37  ;;  %v9852_v23 = vld [vmem:[#allocation38_spill] sm:$0xff]  ;;  %3013 = vmatpush.msrb.mxu1 %v7402_v26 }
 0x1e7   :  { %9845 = vst [vmem:[#allocation11_spill] sm:$0xff] %v7374_v60  ;;  %2725 = vmatpush.msra.mxu3 %v2724_v33  ;;  %v9590_v45 = vand.u32 4294901760, %v7419_v15  ;;  %v1739_v33 = vld [vmem:[%s9383_s4 + $0xc0] sm:$0xff]  ;;  %2886 = vmatpush.msrb.mxu0 %v7407_v8 }
 0x1e8   :  { %v1327_v13 = vpop.f32.mrf.mxu0  ;;  %v1444_v52 = vpop.f32.mrf.mxu1  ;;  %v9592_v56 = vand.u32 4294901760, %v7432_v47  ;;  %2564 = vmatpush.msra.mxu2 %v7416_v37  ;;  %3015 = vmatpush.msrb.mxu1 %v7416_v37 }
 0x1e9   :  { %v1445_v35 = vadd.f32 %v1444_v52, %v1323_v6  ;;  %v1587_v9 = vpop.f32.mrf.mxu2  ;;  %v1684_v38 = vpop.f32.mrf.mxu3  ;;  %v9588_v6 = vand.u32 4294901760, %v7407_v8  ;;  %v1740_v52 = vld [vmem:[%s9383_s4 + $0xc8] sm:$0xff]  ;;  %2731 = vmatpush.msra.mxu3 %v2730_v18  ;;  %v1738_v18 = vld [vmem:[%s9383_s4 + $0xb8] sm:$0xff]  ;;  %2889 = vmatpush.msrb.mxu0 %v7419_v15 }
 0x1ea   :  { %v7429_v16 = vand.u32 4294901760, %v1740_v52  ;;  %v7464_v60 = vand.u32 4294901760, %v1738_v18 }
 0x1eb   :  { %v1588_v31 = vadd.f32 %v1587_v9, %v1445_v35  ;;  %1856 = vmatmul.f32.gmra.mxu0 %v9848_v46  ;;  %2037 = vmatmul.f32.gmra.mxu1 %v9849_v41  ;;  %v9851_v9 = vld [vmem:[#allocation40_spill] sm:$0xff]  ;;  %v2735_v46 = vsub.f32 %v7407_v8, %v9588_v6  ;;  %v1328_v6 = vadd.f32 %v1327_v13, %v7166_v1 }
 0x1ec   :  { %2566 = vmatpush.msra.mxu2 %v7429_v16  ;;  %2892 = vmatpush.msrb.mxu0 %v7432_v47 }
 0x1ed   :  { %v7434_v35 = vadd.f32 %v1684_v38, %v1588_v31  ;;  %2287 = vmatmul.f32.gmra.mxu3 %v9851_v9  ;;  %v2741_v38 = vsub.f32 %v7419_v15, %v9590_v45  ;;  %v7449_v31 = vand.u32 4294901760, %v1739_v33  ;;  %v7452_v9 = vsub.f32 %v1740_v52, %v7429_v16  ;;  %3017 = vmatpush.msrb.mxu1 %v7429_v16 }
 0x1ee   :  { %2164 = vmatmul.f32.gmra.mxu2 %v9852_v23  ;;  %v2736_v40 = vand.u32 4294901760, %v2735_v46 }
 0x1ef   :  { %9850 = vst [vmem:[#allocation2_spill] sm:$0xff] %v7434_v35  ;;  %v2742_v43 = vand.u32 4294901760, %v2741_v38  ;;  %v2747_v35 = vsub.f32 %v7432_v47, %v9592_v56  ;;  %v9593_v52 = vand.u32 4294901760, %v7452_v9  ;;  %v7469_v2 = vsub.f32 %v1739_v33, %v7449_v31  ;;  %v1737_v38 = vld [vmem:[%s9383_s4 + $0xb0] sm:$0xff]  ;;  %v9854_v33 = vld [vmem:[#allocation37_spill] sm:$0xff]  ;;  %2568 = vmatpush.msra.mxu2 %v7449_v31  ;;  %2895 = vmatpush.msrb.mxu0 %v7452_v9 }
 0x1f0   :  { %v1332_v23 = vpop.f32.mrf.mxu0  ;;  %v1450_v45 = vpop.f32.mrf.mxu1  ;;  %2737 = vmatpush.msra.mxu3 %v2736_v40  ;;  %v7477_v10 = vand.u32 4294901760, %v1737_v38  ;;  %3019 = vmatpush.msrb.mxu1 %v7449_v31 }
 0x1f1   :  { %v1451_v1 = vadd.f32 %v1450_v45, %v1328_v6  ;;  %v1591_v13 = vpop.f32.mrf.mxu2  ;;  %v1688_v46 = vpop.f32.mrf.mxu3  ;;  %v2748_v56 = vand.u32 4294901760, %v2747_v35  ;;  %v2753_v42 = vsub.f32 %v7452_v9, %v9593_v52  ;;  %v7480_v6 = vsub.f32 %v1738_v18, %v7464_v60  ;;  %v9853_v45 = vld [vmem:[#allocation47_spill] sm:$0xff]  ;;  %2570 = vmatpush.msra.mxu2 %v7464_v60  ;;  %2898 = vmatpush.msrb.mxu0 %v7469_v2 }
 0x1f2   :  { %v9594_v35 = vand.u32 4294901760, %v7469_v2  ;;  %v1736_v52 = vld [vmem:[%s9383_s4 + $0xa8] sm:$0xff]  ;;  %2743 = vmatpush.msra.mxu3 %v2742_v43  ;;  %v1735_v43 = vld [vmem:[%s9383_s4 + $0xa0] sm:$0xff]  ;;  %3021 = vmatpush.msrb.mxu1 %v7464_v60 }
 0x1f3   :  { %v1592_v40 = vadd.f32 %v1591_v13, %v1451_v1  ;;  %1864 = vmatmul.f32.gmra.mxu0 %v9853_v45  ;;  %2041 = vmatmul.f32.gmra.mxu1 %v9854_v33  ;;  %v2754_v18 = vand.u32 4294901760, %v2753_v42  ;;  %v9595_v44 = vand.u32 4294901760, %v7480_v6  ;;  %v7492_v4 = vand.u32 4294901760, %v1736_v52  ;;  %v9856_v45 = vld [vmem:[#allocation44_spill] sm:$0xff]  ;;  %v9857_v42 = vld [vmem:[#allocation42_spill] sm:$0xff] }
 0x1f4   :  { %v7495_v1 = vsub.f32 %v1737_v38, %v7477_v10  ;;  %v2759_v14 = vsub.f32 %v7469_v2, %v9594_v35  ;;  %2749 = vmatpush.msra.mxu3 %v2748_v56  ;;  %v1333_v35 = vadd.f32 %v1332_v23, %v7188_v58  ;;  %v1734_v56 = vld [vmem:[%s9383_s4 + $0x98] sm:$0xff]  ;;  %2572 = vmatpush.msra.mxu2 %v7477_v10 }
 0x1f5   :  { %v7497_v13 = vadd.f32 %v1688_v46, %v1592_v40  ;;  %2293 = vmatmul.f32.gmra.mxu3 %v9856_v45  ;;  %v2765_v46 = vsub.f32 %v7480_v6, %v9595_v44  ;;  %v7512_v40 = vand.u32 4294901760, %v1735_v43  ;;  %v7515_v45 = vsub.f32 %v1736_v52, %v7492_v4  ;;  %2901 = vmatpush.msrb.mxu0 %v7480_v6 }
 0x1f6   :  { %2169 = vmatmul.f32.gmra.mxu2 %v9857_v42  ;;  %2755 = vmatpush.msra.mxu3 %v2754_v18  ;;  %v9858_v34 = vand.u32 4294901760, %v7495_v1  ;;  %v7527_v58 = vand.u32 4294901760, %v1734_v56  ;;  %v1733_v18 = vld [vmem:[%s9383_s4 + $0x90] sm:$0xff] }
 0x1f7   :  { %9855 = vst [vmem:[#allocation8_spill] sm:$0xff] %v7497_v13  ;;  %v2760_v13 = vand.u32 4294901760, %v2759_v14  ;;  %v2766_v38 = vand.u32 4294901760, %v2765_v46  ;;  %v9596_v48 = vand.u32 4294901760, %v7515_v45  ;;  %v7532_v0 = vsub.f32 %v1735_v43, %v7512_v40  ;;  %2574 = vmatpush.msra.mxu2 %v7492_v4  ;;  %2904 = vmatpush.msrb.mxu0 %v7495_v1 }
 0x1f8   :  { %v1337_v42 = vpop.f32.mrf.mxu0  ;;  %v1456_v44 = vpop.f32.mrf.mxu1  ;;  %v2771_v52 = vsub.f32 %v7495_v1, %v9858_v34  ;;  %3023 = vmatpush.msrb.mxu1 %v7477_v10 }
 0x1f9   :  { %v1457_v14 = vadd.f32 %v1456_v44, %v1333_v35  ;;  %v1595_v23 = vpop.f32.mrf.mxu2  ;;  %v1692_v21 = vpop.f32.mrf.mxu3  ;;  %2761 = vmatpush.msra.mxu3 %v2760_v13  ;;  %v2777_v46 = vsub.f32 %v7515_v45, %v9596_v48  ;;  %v7541_v44 = vand.u32 4294901760, %v1733_v18  ;;  %v7544_v35 = vsub.f32 %v1734_v56, %v7527_v58  ;;  %v1732_v13 = vld [vmem:[%s9383_s4 + $0x88] sm:$0xff]  ;;  %2576 = vmatpush.msra.mxu2 %v7512_v40 }
 0x1fa   :  { %v2772_v34 = vand.u32 4294901760, %v2771_v52  ;;  %v9597_v22 = vand.u32 4294901760, %v7532_v0  ;;  %v7555_v48 = vand.u32 4294901760, %v1732_v13  ;;  %2907 = vmatpush.msrb.mxu0 %v7515_v45  ;;  %3025 = vmatpush.msrb.mxu1 %v7492_v4 }
 0x1fb   :  { %v1596_v43 = vadd.f32 %v1595_v23, %v1457_v14  ;;  %1872 = vmatmul.f32.gmra.mxu0 %v9859_v54  ;;  %2045 = vmatmul.f32.gmra.mxu1 %v9860_v59  ;;  %v2778_v52 = vand.u32 4294901760, %v2777_v46  ;;  %v9600_v56 = vand.u32 4294901760, %v7544_v35  ;;  %v7558_v14 = vsub.f32 %v1733_v18, %v7541_v44  ;;  %v9862_v23 = vld [vmem:[#allocation48_spill] sm:$0xff]  ;;  %v9863_v46 = vld [vmem:[#allocation46_spill] sm:$0xff] }
 0x1fc   :  { %2767 = vmatpush.msra.mxu3 %v2766_v38  ;;  %v2783_v57 = vsub.f32 %v7532_v0, %v9597_v22  ;;  %v1731_v38 = vld [vmem:[%s9383_s4 + $0x80] sm:$0xff]  ;;  %v1338_v22 = vadd.f32 %v1337_v42, %v7213_v51  ;;  %2578 = vmatpush.msra.mxu2 %v7527_v58 }
 0x1fd   :  { %v7560_v54 = vadd.f32 %v1692_v21, %v1596_v43  ;;  %2299 = vmatmul.f32.gmra.mxu3 %v9862_v23  ;;  %v2789_v21 = vsub.f32 %v7544_v35, %v9600_v56  ;;  %v9603_v18 = vand.u32 4294901760, %v7558_v14  ;;  %v7575_v43 = vand.u32 4294901760, %v1731_v38  ;;  %2910 = vmatpush.msrb.mxu0 %v7532_v0  ;;  %v9868_v59 = vld [vmem:[#allocation50_spill] sm:$0xff] }
 0x1fe   :  { %2174 = vmatmul.f32.gmra.mxu2 %v9863_v46  ;;  %2773 = vmatpush.msra.mxu3 %v2772_v34  ;;  %v7578_v23 = vsub.f32 %v1732_v13, %v7555_v48 }
 0x1ff   :  { %9861 = vst [vmem:[#allocation6_spill] sm:$0xff] %v7560_v54  ;;  %v2784_v54 = vand.u32 4294901760, %v2783_v57  ;;  %v2790_v3 = vand.u32 4294901760, %v2789_v21  ;;  %v2795_v56 = vsub.f32 %v7558_v14, %v9603_v18  ;;  %v7588_v13 = vsub.f32 %v1731_v38, %v7575_v43  ;;  %2580 = vmatpush.msra.mxu2 %v7541_v44  ;;  %3027 = vmatpush.msrb.mxu1 %v7512_v40 }
 0x200   :  { %v1342_v46 = vpop.f32.mrf.mxu0  ;;  %v1462_v34 = vpop.f32.mrf.mxu1  ;;  %2779 = vmatpush.msra.mxu3 %v2778_v52  ;;  %v9605_v53 = vand.u32 4294901760, %v7578_v23  ;;  %2913 = vmatpush.msrb.mxu0 %v7544_v35 }
 0x201   :  { %v1463_v51 = vadd.f32 %v1462_v34, %v1338_v22  ;;  %v1599_v42 = vpop.f32.mrf.mxu2  ;;  %v1696_v57 = vpop.f32.mrf.mxu3  ;;  %v2796_v52 = vand.u32 4294901760, %v2795_v56  ;;  %v2806_v18 = vand.u32 4294901760, %v7588_v13  ;;  %v9865_v22 = vld [vmem:[#allocation45_spill] sm:$0xff]  ;;  %2582 = vmatpush.msra.mxu2 %v7555_v48  ;;  %3029 = vmatpush.msrb.mxu1 %v7527_v58 }
 0x202   :  { %2785 = vmatpush.msra.mxu3 %v2784_v54  ;;  %v2801_v21 = vsub.f32 %v7578_v23, %v9605_v53  ;;  %v9867_v53 = vld [vmem:[#allocation52_spill] sm:$0xff]  ;;  %2916 = vmatpush.msrb.mxu0 %v7558_v14 }
 0x203   :  { %v1600_v38 = vadd.f32 %v1599_v42, %v1463_v51  ;;  %1880 = vmatmul.f32.gmra.mxu0 %v9864_v20  ;;  %2049 = vmatmul.f32.gmra.mxu1 %v9865_v22  ;;  %v2807_v56 = vsub.f32 %v7588_v13, %v2806_v18  ;;  %v1343_v51 = vadd.f32 %v1342_v46, %v7232_v63  ;;  %v9870_v46 = vld [vmem:[#allocation59_spill] sm:$0xff] }
 0x204   :  { %2791 = vmatpush.msra.mxu3 %v2790_v3  ;;  %v2802_v34 = vand.u32 4294901760, %v2801_v21  ;;  %2584 = vmatpush.msra.mxu2 %v7575_v43 }
 0x205   :  { %v7604_v54 = vadd.f32 %v1696_v57, %v1600_v38  ;;  %2305 = vmatmul.f32.gmra.mxu3 %v9867_v53  ;;  %v2808_v20 = vand.u32 4294901760, %v2807_v56  ;;  %v9872_v38 = vand.u32 4294901760, %v7371_v29  ;;  %v9874_v56 = vld [vmem:[#allocation56_spill] sm:$0xff]  ;;  %3031 = vmatpush.msrb.mxu1 %v7541_v44 }
 0x206   :  { %2179 = vmatmul.f32.gmra.mxu2 %v9868_v59  ;;  %2797 = vmatpush.msra.mxu3 %v2796_v52  ;;  %v9869_v59 = vand.u32 4294901760, %v7356_v62  ;;  %v9871_v52 = vld [vmem:[#allocation49_spill] sm:$0xff] }
 0x207   :  { %9866 = vst [vmem:[#allocation15_spill] sm:$0xff] %v7604_v54  ;;  %2919 = vmatpush.msrb.mxu0 %v7578_v23  ;;  %3033 = vmatpush.msrb.mxu1 %v7555_v48 }
 0x208   :  { %v1347_v3 = vpop.f32.mrf.mxu0  ;;  %v1468_v42 = vpop.f32.mrf.mxu1  ;;  %2803 = vmatpush.msra.mxu3 %v2802_v34  ;;  %3136 = vmatpush.msrb.mxu2 %v9869_v59  ;;  %v9883_v59 = vld [vmem:[#allocation58_spill] sm:$0xff] }
 0x209   :  { %v1469_v57 = vadd.f32 %v1468_v42, %v1343_v51  ;;  %v1603_v21 = vpop.f32.mrf.mxu2  ;;  %v1700_v53 = vpop.f32.mrf.mxu3  ;;  %v1348_v62 = vadd.f32 %v1347_v3, %v7249_v61  ;;  %v9876_v51 = vand.u32 4294901760, %v7389_v36  ;;  %2922 = vmatpush.msrb.mxu0 %v7588_v13  ;;  %v9879_v36 = vld [vmem:[#allocation53_spill] sm:$0xff]  ;;  %3035 = vmatpush.msrb.mxu1 %v7575_v43  ;;  %v9905_v13 = vld [vmem:[#allocation75_spill] sm:$0xff] }
 0x20a   :  { %2809 = vmatpush.msra.mxu3 %v2808_v20  ;;  %3140 = vmatpush.msrb.mxu2 %v9872_v38  ;;  %v9875_v20 = vld [vmem:[#allocation54_spill] sm:$0xff] }
 0x20b   :  { %v1604_v63 = vadd.f32 %v1603_v21, %v1469_v57  ;;  %1888 = vmatmul.f32.gmra.mxu0 %v9870_v46  ;;  %2053 = vmatmul.f32.gmra.mxu1 %v9871_v52 }
 0x20c   :  { %3263 = vmatpush.msrb.mxu3 %v7349_v12  ;;  %3144 = vmatpush.msrb.mxu2 %v9876_v51  ;;  %v9886_v51 = vld [vmem:[#allocation67_spill] sm:$0xff] }
 0x20d   :  { %v7622_v34 = vadd.f32 %v1700_v53, %v1604_v63  ;;  %2311 = vmatmul.f32.gmra.mxu3 %v9874_v56  ;;  %v9877_v53 = vand.u32 4294901760, %v7407_v8  ;;  %v9882_v8 = vld [vmem:[#allocation60_spill] sm:$0xff]  ;;  %v9884_v63 = vand.u32 4294901760, %v7432_v47 }
 0x20e   :  { %2184 = vmatmul.f32.gmra.mxu2 %v9875_v20  ;;  %3265 = vmatpush.msrb.mxu3 %v7358_v28  ;;  %v9878_v28 = vld [vmem:[#allocation63_spill] sm:$0xff]  ;;  %v9885_v20 = vand.u32 4294901760, %v7452_v9  ;;  %v9892_v9 = vand.u32 4294901760, %v7480_v6  ;;  %v9898_v6 = vld [vmem:[#allocation70_spill] sm:$0xff] }
 0x20f   :  { %9873 = vst [vmem:[#allocation5_spill] sm:$0xff] %v7622_v34  ;;  %3148 = vmatpush.msrb.mxu2 %v9877_v53 }
 0x210   :  { %v1352_v29 = vpop.f32.mrf.mxu0  ;;  %v1474_v42 = vpop.f32.mrf.mxu1  ;;  %3267 = vmatpush.msrb.mxu3 %v7368_v27  ;;  %v9880_v27 = vand.u32 4294901760, %v7419_v15 }
 0x211   :  { %v1475_v12 = vadd.f32 %v1474_v42, %v1348_v62  ;;  %v1607_v57 = vpop.f32.mrf.mxu2  ;;  %v1704_v21 = vpop.f32.mrf.mxu3 }
 0x212   :  { %3269 = vmatpush.msrb.mxu3 %v7386_v39  ;;  %3152 = vmatpush.msrb.mxu2 %v9880_v27  ;;  %v1353_v39 = vadd.f32 %v1352_v29, %v7266_v55  ;;  %v9888_v55 = vand.u32 4294901760, %v7469_v2  ;;  %v9891_v29 = vld [vmem:[#allocation62_spill] sm:$0xff] }
 0x213   :  { %v1608_v61 = vadd.f32 %v1607_v57, %v1475_v12  ;;  %1896 = vmatmul.f32.gmra.mxu0 %v9878_v28  ;;  %2057 = vmatmul.f32.gmra.mxu1 %v9879_v36 }
 0x214   :  { %3271 = vmatpush.msrb.mxu3 %v7402_v26  ;;  %3156 = vmatpush.msrb.mxu2 %v9884_v63 }
 0x215   :  { %v7644_v3 = vadd.f32 %v1704_v21, %v1608_v61  ;;  %2317 = vmatmul.f32.gmra.mxu3 %v9882_v8  ;;  %v9893_v21 = vand.u32 4294901760, %v7495_v1  ;;  %v9894_v61 = vld [vmem:[#allocation61_spill] sm:$0xff]  ;;  %v9899_v1 = vand.u32 4294901760, %v7532_v0  ;;  %v9901_v0 = vand.u32 4294901760, %v7558_v14 }
 0x216   :  { %2189 = vmatmul.f32.gmra.mxu2 %v9883_v59  ;;  %3273 = vmatpush.msrb.mxu3 %v7416_v37  ;;  %v9887_v37 = vld [vmem:[#allocation57_spill] sm:$0xff] }
 0x217   :  { %9881 = vst [vmem:[#allocation12_spill] sm:$0xff] %v7644_v3  ;;  %3160 = vmatpush.msrb.mxu2 %v9885_v20 }
 0x218   :  { %v1357_v46 = vpop.f32.mrf.mxu0  ;;  %v1480_v15 = vpop.f32.mrf.mxu1  ;;  %3275 = vmatpush.msrb.mxu3 %v7429_v16  ;;  %v9890_v16 = vld [vmem:[#allocation64_spill] sm:$0xff] }
 0x219   :  { %v1481_v26 = vadd.f32 %v1480_v15, %v1353_v39  ;;  %v1611_v38 = vpop.f32.mrf.mxu2  ;;  %v1708_v56 = vpop.f32.mrf.mxu3  ;;  %3164 = vmatpush.msrb.mxu2 %v9888_v55  ;;  %v9903_v39 = vand.u32 4294901760, %v7578_v23 }
 0x21a   :  { %3277 = vmatpush.msrb.mxu3 %v7449_v31  ;;  %v1358_v31 = vadd.f32 %v1357_v46, %v7283_v17  ;;  %v9895_v17 = vand.u32 4294901760, %v7515_v45 }
 0x21b   :  { %v1612_v62 = vadd.f32 %v1611_v38, %v1481_v26  ;;  %1904 = vmatmul.f32.gmra.mxu0 %v9886_v51  ;;  %2061 = vmatmul.f32.gmra.mxu1 %v9887_v37  ;;  %v9904_v26 = vld [vmem:[#allocation77_spill] sm:$0xff] }
 0x21c   :  { %3279 = vmatpush.msrb.mxu3 %v7464_v60  ;;  %3168 = vmatpush.msrb.mxu2 %v9892_v9 }
 0x21d   :  { %v7662_v47 = vadd.f32 %v1708_v56, %v1612_v62  ;;  %2323 = vmatmul.f32.gmra.mxu3 %v9890_v16 }
 0x21e   :  { %2194 = vmatmul.f32.gmra.mxu2 %v9891_v29  ;;  %3281 = vmatpush.msrb.mxu3 %v7477_v10 }
 0x21f   :  { %9889 = vst [vmem:[#allocation10_spill] sm:$0xff] %v7662_v47  ;;  %3172 = vmatpush.msrb.mxu2 %v9893_v21 }
 0x220   :  { %v1486_v42 = vpop.f32.mrf.mxu1  ;;  %v1785_v12 = vpop.f32.mrf.mxu0  ;;  %3283 = vmatpush.msrb.mxu3 %v7492_v4  ;;  %v9897_v4 = vld [vmem:[#allocation65_spill] sm:$0xff] }
 0x221   :  { %v1487_v2 = vadd.f32 %v1486_v42, %v1358_v31  ;;  %v1615_v57 = vpop.f32.mrf.mxu2  ;;  %v1712_v60 = vpop.f32.mrf.mxu3  ;;  %3176 = vmatpush.msrb.mxu2 %v9895_v17 }
 0x222   :  { %3285 = vmatpush.msrb.mxu3 %v7512_v40 }
 0x223   :  { %v1616_v53 = vadd.f32 %v1615_v57, %v1487_v2  ;;  %2065 = vmatmul.f32.gmra.mxu1 %v9894_v61  ;;  %2392 = vmatmul.f32.vlgmr.msra.gmra.mxu0 %v9809_v32  ;;  %v9907_v2 = vld [vmem:[#allocation79_spill] sm:$0xff] }
 0x224   :  { %3287 = vmatpush.msrb.mxu3 %v7527_v58  ;;  %3180 = vmatpush.msrb.mxu2 %v9899_v1  ;;  %v9900_v58 = vand.u32 4294901760, %v7544_v35 }
 0x225   :  { %v7679_v10 = vadd.f32 %v1712_v60, %v1616_v53  ;;  %2811 = vmatmul.f32.vlgmr.msra.gmra.mxu3 %v9897_v4 }
 0x226   :  { %2590 = vmatmul.f32.vlgmr.msra.gmra.mxu2 %v9898_v6  ;;  %3289 = vmatpush.msrb.mxu3 %v7541_v44 }
 0x227   :  { %9896 = vst [vmem:[#allocation19_spill] sm:$0xff] %v7679_v10  ;;  %3184 = vmatpush.msrb.mxu2 %v9900_v58 }
 0x228   :  { %v1793_v40 = vpop.f32.mrf.mxu0  ;;  %v2006_v28 = vpop.f32.mrf.mxu1  ;;  %3291 = vmatpush.msrb.mxu3 %v7555_v48  ;;  %v9902_v48 = vld [vmem:[#allocation73_spill] sm:$0xff] }
 0x229   :  { %v2007_v27 = vadd.f32 %v2006_v28, %v1785_v12  ;;  %v2120_v45 = vpop.f32.mrf.mxu2  ;;  %v2234_v8 = vpop.f32.mrf.mxu3  ;;  %3188 = vmatpush.msrb.mxu2 %v9901_v0 }
 0x22a   :  { %3293 = vmatpush.msrb.mxu3 %v7575_v43 }
 0x22b   :  { %v2121_v59 = vadd.f32 %v2120_v45, %v2007_v27  ;;  %2396 = vmatmul.f32.gmra.mxu0 %v9814_v5  ;;  %2489 = vmatmul.f32.vlgmr.msra.gmra.mxu1 %v9809_v32 }
 0x22c   :  { %3192 = vmatpush.msrb.mxu2 %v9903_v39 }
 0x22d   :  { %v7694_v44 = vadd.f32 %v2234_v8, %v2121_v59  ;;  %2815 = vmatmul.f32.gmra.mxu3 %v6539_v50 }
 0x22e   :  { %2598 = vmatmul.f32.gmra.mxu2 %v9902_v48  ;;  %v9911_v48 = vld [vmem:[#allocation87_spill] sm:$0xff] }
 0x22f   :  { %3196 = vmatpush.msrb.mxu2 %v2806_v18 }
 0x230   :  { %v1801_v35 = vpop.f32.mrf.mxu0  ;;  %v2010_v63 = vpop.f32.mrf.mxu1 }
 0x231   :  { %v2011_v43 = vadd.f32 %v2010_v63, %v1793_v40  ;;  %v2125_v46 = vpop.f32.mrf.mxu2  ;;  %v2240_v15 = vpop.f32.mrf.mxu3  ;;  %v9909_v40 = vld [vmem:[#allocation83_spill] sm:$0xff] }
 0x233   :  { %v2126_v32 = vadd.f32 %v2125_v46, %v2011_v43  ;;  %2400 = vmatmul.f32.gmra.mxu0 %v9819_v11  ;;  %2493 = vmatmul.f32.gmra.mxu1 %v9814_v5  ;;  %v9906_v5 = vld [vmem:[#allocation81_spill] sm:$0xff] }
 0x235   :  { %v7704_v14 = vadd.f32 %v2240_v15, %v2126_v32  ;;  %2819 = vmatmul.f32.gmra.mxu3 %v6568_v19 }
 0x236   :  { %2606 = vmatmul.f32.gmra.mxu2 %v9904_v26  ;;  %v9913_v26 = vld [vmem:[#allocation91_spill] sm:$0xff] }
 0x238   :  { %v1809_v23 = vpop.f32.mrf.mxu0  ;;  %v2014_v38 = vpop.f32.mrf.mxu1 }
 0x239   :  { %v2015_v56 = vadd.f32 %v2014_v38, %v1801_v35  ;;  %v2130_v20 = vpop.f32.mrf.mxu2  ;;  %v2246_v62 = vpop.f32.mrf.mxu3 }
 0x23b   :  { %v2131_v51 = vadd.f32 %v2130_v20, %v2015_v56  ;;  %2404 = vmatmul.f32.gmra.mxu0 %v9824_v49  ;;  %2497 = vmatmul.f32.gmra.mxu1 %v9819_v11  ;;  %v9908_v11 = vld [vmem:[#allocation85_spill] sm:$0xff] }
 0x23d   :  { %v7710_v18 = vadd.f32 %v2246_v62, %v2131_v51  ;;  %2823 = vmatmul.f32.gmra.mxu3 %v9905_v13 }
 0x23e   :  { %2614 = vmatmul.f32.gmra.mxu2 %v9906_v5 }
 0x240   :  { %v1817_v55 = vpop.f32.mrf.mxu0  ;;  %v2018_v16 = vpop.f32.mrf.mxu1 }
 0x241   :  { %v2019_v29 = vadd.f32 %v2018_v16, %v1809_v23  ;;  %v2135_v31 = vpop.f32.mrf.mxu2  ;;  %v2252_v9 = vpop.f32.mrf.mxu3 }
 0x243   :  { %v2136_v42 = vadd.f32 %v2135_v31, %v2019_v29  ;;  %2408 = vmatmul.f32.gmra.mxu0 %v9829_v7  ;;  %2501 = vmatmul.f32.gmra.mxu1 %v9824_v49  ;;  %v9910_v49 = vld [vmem:[#allocation89_spill] sm:$0xff] }
 0x245   :  { %v7716_v12 = vadd.f32 %v2252_v9, %v2136_v42  ;;  %2827 = vmatmul.f32.gmra.mxu3 %v9907_v2 }
 0x246   :  { %2622 = vmatmul.f32.gmra.mxu2 %v9908_v11 }
 0x248   :  { %v1825_v57 = vpop.f32.mrf.mxu0  ;;  %v2022_v60 = vpop.f32.mrf.mxu1 }
 0x249   :  { %v2023_v21 = vadd.f32 %v2022_v60, %v1817_v55  ;;  %v2140_v53 = vpop.f32.mrf.mxu2  ;;  %v2258_v17 = vpop.f32.mrf.mxu3  ;;  %v9915_v55 = vld [vmem:[#allocation95_spill] sm:$0xff] }
 0x24a   :  { %v9917_v60 = vld [vmem:[#allocation99_spill] sm:$0xff] }
 0x24b   :  { %v2141_v6 = vadd.f32 %v2140_v53, %v2023_v21  ;;  %2412 = vmatmul.f32.gmra.mxu0 %v9834_v24  ;;  %2505 = vmatmul.f32.gmra.mxu1 %v9829_v7  ;;  %v9912_v7 = vld [vmem:[#allocation93_spill] sm:$0xff] }
 0x24d   :  { %v7722_v1 = vadd.f32 %v2258_v17, %v2141_v6  ;;  %2831 = vmatmul.f32.gmra.mxu3 %v9909_v40 }
 0x24e   :  { %2630 = vmatmul.f32.gmra.mxu2 %v9910_v49 }
 0x250   :  { %v1833_v28 = vpop.f32.mrf.mxu0  ;;  %v2026_v27 = vpop.f32.mrf.mxu1 }
 0x251   :  { %v2027_v45 = vadd.f32 %v2026_v27, %v1825_v57  ;;  %v2145_v8 = vpop.f32.mrf.mxu2  ;;  %v2264_v58 = vpop.f32.mrf.mxu3  ;;  %v9919_v27 = vld [vmem:[#allocation41_spill] sm:$0xff] }
 0x253   :  { %v2146_v59 = vadd.f32 %v2145_v8, %v2027_v45  ;;  %2416 = vmatmul.f32.gmra.mxu0 %v9839_v30  ;;  %2509 = vmatmul.f32.gmra.mxu1 %v9834_v24  ;;  %v9914_v24 = vld [vmem:[#allocation97_spill] sm:$0xff]  ;;  %v9920_v8 = vld [vmem:[#allocation103_spill] sm:$0xff] }
 0x255   :  { %v7728_v0 = vadd.f32 %v2264_v58, %v2146_v59  ;;  %2835 = vmatmul.f32.gmra.mxu3 %v9911_v48 }
 0x256   :  { %2638 = vmatmul.f32.gmra.mxu2 %v9912_v7 }
 0x258   :  { %v1841_v39 = vpop.f32.mrf.mxu0  ;;  %v2030_v35 = vpop.f32.mrf.mxu1 }
 0x259   :  { %v2031_v63 = vadd.f32 %v2030_v35, %v1833_v28  ;;  %v2150_v43 = vpop.f32.mrf.mxu2  ;;  %v2270_v46 = vpop.f32.mrf.mxu3 }
 0x25b   :  { %v2151_v15 = vadd.f32 %v2150_v43, %v2031_v63  ;;  %2420 = vmatmul.f32.gmra.mxu0 %v9844_v25  ;;  %2513 = vmatmul.f32.gmra.mxu1 %v9839_v30  ;;  %v9916_v30 = vld [vmem:[#allocation101_spill] sm:$0xff] }
 0x25d   :  { %v7734_v32 = vadd.f32 %v2270_v46, %v2151_v15  ;;  %2839 = vmatmul.f32.gmra.mxu3 %v9913_v26  ;;  %v9922_v46 = vld [vmem:[#allocation107_spill] sm:$0xff] }
 0x25e   :  { %2646 = vmatmul.f32.gmra.mxu2 %v9914_v24 }
 0x260   :  { %v1849_v23 = vpop.f32.mrf.mxu0  ;;  %v2034_v38 = vpop.f32.mrf.mxu1 }
 0x261   :  { %v2035_v56 = vadd.f32 %v2034_v38, %v1841_v39  ;;  %v2155_v20 = vpop.f32.mrf.mxu2  ;;  %v2276_v62 = vpop.f32.mrf.mxu3 }
 0x263   :  { %v2156_v51 = vadd.f32 %v2155_v20, %v2035_v56  ;;  %2424 = vmatmul.f32.gmra.mxu0 %v9849_v41  ;;  %2517 = vmatmul.f32.gmra.mxu1 %v9844_v25  ;;  %v9918_v25 = vld [vmem:[#allocation105_spill] sm:$0xff] }
 0x265   :  { %v7740_v5 = vadd.f32 %v2276_v62, %v2156_v51  ;;  %2843 = vmatmul.f32.gmra.mxu3 %v9915_v55  ;;  %v9924_v51 = vld [vmem:[#allocation111_spill] sm:$0xff] }
 0x266   :  { %2654 = vmatmul.f32.gmra.mxu2 %v9916_v30  ;;  %v9925_v30 = vld [vmem:[#allocation117_spill] sm:$0xff] }
 0x268   :  { %v1857_v16 = vpop.f32.mrf.mxu0  ;;  %v2038_v29 = vpop.f32.mrf.mxu1 }
 0x269   :  { %v2039_v31 = vadd.f32 %v2038_v29, %v1849_v23  ;;  %v2160_v9 = vpop.f32.mrf.mxu2  ;;  %v2282_v42 = vpop.f32.mrf.mxu3 }
 0x26b   :  { %v2161_v11 = vadd.f32 %v2160_v9, %v2039_v31  ;;  %2428 = vmatmul.f32.gmra.mxu0 %v9854_v33  ;;  %2521 = vmatmul.f32.gmra.mxu1 %v9849_v41  ;;  %v9921_v41 = vld [vmem:[#allocation109_spill] sm:$0xff] }
 0x26d   :  { %v7746_v57 = vadd.f32 %v2282_v42, %v2161_v11  ;;  %2847 = vmatmul.f32.gmra.mxu3 %v9917_v60  ;;  %v3375_v11 = vld [vmem:[%s9384_s2] sm:$0xff] }
 0x26e   :  { %2662 = vmatmul.f32.gmra.mxu2 %v9918_v25  ;;  %v3440_v25 = vand.u32 4294901760, %v3375_v11 }
 0x270   :  { %v1865_v21 = vpop.f32.mrf.mxu0  ;;  %v2042_v53 = vpop.f32.mrf.mxu1  ;;  %3441 = vmatpush.msra.mxu0 %v3440_v25  ;;  %3772 = vmatpush.msra.mxu3 %v3440_v25 }
 0x271   :  { %v2043_v17 = vadd.f32 %v2042_v53, %v1857_v16  ;;  %v2165_v6 = vpop.f32.mrf.mxu2  ;;  %v2288_v49 = vpop.f32.mrf.mxu3 }
 0x273   :  { %v2166_v28 = vadd.f32 %v2165_v6, %v2043_v17  ;;  %2432 = vmatmul.f32.gmra.mxu0 %v9919_v27  ;;  %2525 = vmatmul.f32.gmra.mxu1 %v9854_v33  ;;  %v9923_v33 = vld [vmem:[#allocation113_spill] sm:$0xff]  ;;  %v9926_v17 = vld [vmem:[#allocation115_spill] sm:$0xff]  ;;  %v9927_v6 = vld [vmem:[#allocation122_spill] sm:$0xff] }
 0x275   :  { %v7752_v45 = vadd.f32 %v2288_v49, %v2166_v28  ;;  %2851 = vmatmul.f32.gmra.mxu3 %v9920_v8 }
 0x276   :  { %2670 = vmatmul.f32.gmra.mxu2 %v9921_v41 }
 0x278   :  { %v1873_v58 = vpop.f32.mrf.mxu0  ;;  %v2046_v59 = vpop.f32.mrf.mxu1 }
 0x279   :  { %v2047_v7 = vadd.f32 %v2046_v59, %v1865_v21  ;;  %v2170_v39 = vpop.f32.mrf.mxu2  ;;  %v2294_v35 = vpop.f32.mrf.mxu3 }
 0x27b   :  { %v2171_v63 = vadd.f32 %v2170_v39, %v2047_v7  ;;  %2436 = vmatmul.f32.gmra.mxu0 %v9865_v22  ;;  %2529 = vmatmul.f32.gmra.mxu1 %v9919_v27 }
 0x27d   :  { %v7758_v43 = vadd.f32 %v2294_v35, %v2171_v63  ;;  %2855 = vmatmul.f32.gmra.mxu3 %v9922_v46  ;;  %v9928_v63 = vld [vmem:[#allocation119_spill] sm:$0xff] }
 0x27e   :  { %2678 = vmatmul.f32.gmra.mxu2 %v9923_v33  ;;  %v9929_v33 = vld [vmem:[#allocation128_spill] sm:$0xff] }
 0x280   :  { %v1881_v15 = vpop.f32.mrf.mxu0  ;;  %v2050_v24 = vpop.f32.mrf.mxu1 }
 0x281   :  { %v2051_v23 = vadd.f32 %v2050_v24, %v1873_v58  ;;  %v2175_v38 = vpop.f32.mrf.mxu2  ;;  %v2300_v56 = vpop.f32.mrf.mxu3 }
 0x283   :  { %v2176_v20 = vadd.f32 %v2175_v38, %v2051_v23  ;;  %2440 = vmatmul.f32.gmra.mxu0 %v9871_v52  ;;  %2533 = vmatmul.f32.gmra.mxu1 %v9865_v22  ;;  %v3587_v22 = vsub.f32 %v3375_v11, %v3440_v25 }
 0x285   :  { %v7764_v62 = vadd.f32 %v2300_v56, %v2176_v20  ;;  %2859 = vmatmul.f32.gmra.mxu3 %v9924_v51  ;;  %v3588_v49 = vand.u32 4294901760, %v3587_v22  ;;  %3674 = vmatpush.msra.mxu2 %v3587_v22 }
 0x286   :  { %2686 = vmatmul.f32.gmra.mxu2 %v9925_v30 }
 0x287   :  { %v3589_v41 = vsub.f32 %v3587_v22, %v3588_v49  ;;  %v9932_v22 = vld [vmem:[#allocation66_spill] sm:$0xff] }
 0x288   :  { %v1889_v16 = vpop.f32.mrf.mxu0  ;;  %v2054_v29 = vpop.f32.mrf.mxu1 }
 0x289   :  { %v2055_v31 = vadd.f32 %v2054_v29, %v1881_v15  ;;  %v2180_v9 = vpop.f32.mrf.mxu2  ;;  %v2306_v42 = vpop.f32.mrf.mxu3  ;;  %v3590_v39 = vand.u32 4294901760, %v3589_v41 }
 0x28b   :  { %v2181_v21 = vadd.f32 %v2180_v9, %v2055_v31  ;;  %2444 = vmatmul.f32.gmra.mxu0 %v9879_v36  ;;  %2537 = vmatmul.f32.gmra.mxu1 %v9871_v52 }
 0x28c   :  { %3591 = vmatpush.msra.mxu1 %v3590_v39  ;;  %v9933_v39 = vld [vmem:[#allocation69_spill] sm:$0xff] }
 0x28d   :  { %v7773_v53 = vadd.f32 %v2306_v42, %v2181_v21  ;;  %2863 = vmatmul.f32.gmra.mxu3 %v9926_v17 }
 0x28e   :  { %2694 = vmatmul.f32.gmra.mxu2 %v9927_v6 }
 0x290   :  { %v1897_v28 = vpop.f32.mrf.mxu0  ;;  %v2058_v27 = vpop.f32.mrf.mxu1 }
 0x291   :  { %v2059_v58 = vadd.f32 %v2058_v27, %v1889_v16  ;;  %v2185_v59 = vpop.f32.mrf.mxu2  ;;  %v2312_v7 = vpop.f32.mrf.mxu3  ;;  %v9931_v16 = vld [vmem:[#allocation130_spill] sm:$0xff] }
 0x293   :  { %v2186_v35 = vadd.f32 %v2185_v59, %v2059_v58  ;;  %2448 = vmatmul.f32.gmra.mxu0 %v9887_v37  ;;  %2541 = vmatmul.f32.gmra.mxu1 %v9879_v36  ;;  %v9930_v36 = vld [vmem:[#allocation124_spill] sm:$0xff] }
 0x295   :  { %v7779_v52 = vadd.f32 %v2312_v7, %v2186_v35  ;;  %2867 = vmatmul.f32.gmra.mxu3 %v9928_v63 }
 0x296   :  { %2702 = vmatmul.f32.gmra.mxu2 %v9929_v33 }
 0x298   :  { %v1905_v15 = vpop.f32.mrf.mxu0  ;;  %v2062_v24 = vpop.f32.mrf.mxu1 }
 0x299   :  { %v2063_v23 = vadd.f32 %v2062_v24, %v1897_v28  ;;  %v2190_v38 = vpop.f32.mrf.mxu2  ;;  %v2318_v56 = vpop.f32.mrf.mxu3 }
 0x29b   :  { %v2191_v20 = vadd.f32 %v2190_v38, %v2063_v23  ;;  %2452 = vmatmul.f32.gmra.mxu0 %v9894_v61  ;;  %2545 = vmatmul.f32.gmra.mxu1 %v9887_v37  ;;  %v9935_v38 = vld [vmem:[#allocation72_spill] sm:$0xff] }
 0x29d   :  { %v7785_v30 = vadd.f32 %v2318_v56, %v2191_v20  ;;  %2871 = vmatmul.f32.gmra.mxu3 %v9930_v36  ;;  %v9936_v56 = vld [vmem:[#allocation71_spill] sm:$0xff] }
 0x29e   :  { %2710 = vmatmul.f32.gmra.mxu2 %v9931_v16 }
 0x2a0   :  { %v2066_v29 = vpop.f32.mrf.mxu1  ;;  %v2393_v31 = vpop.f32.mrf.mxu0 }
 0x2a1   :  { %v2067_v9 = vadd.f32 %v2066_v29, %v1905_v15  ;;  %v2195_v42 = vpop.f32.mrf.mxu2  ;;  %v2324_v11 = vpop.f32.mrf.mxu3  ;;  %v2394_v37 = vadd.f32 %v2393_v31, %v7694_v44 }
 0x2a3   :  { %v2196_v21 = vadd.f32 %v2195_v42, %v2067_v9  ;;  %2549 = vmatmul.f32.gmra.mxu1 %v9894_v61  ;;  %2925 = vmatmul.f32.vlgmr.msrb.gmra.mxu0 %v9932_v22  ;;  %v9934_v61 = vld [vmem:[#allocation68_spill] sm:$0xff] }
 0x2a4   :  { %3888 = vmatpush.msrb.mxu0 %v3588_v49  ;;  %v9937_v42 = vld [vmem:[#allocation76_spill] sm:$0xff] }
 0x2a5   :  { %v7791_v6 = vadd.f32 %v2324_v11, %v2196_v21  ;;  %3295 = vmatmul.f32.vlgmr.msrb.gmra.mxu3 %v9897_v4  ;;  %v9938_v11 = vld [vmem:[#allocation74_spill] sm:$0xff] }
 0x2a6   :  { %3198 = vmatmul.f32.vlgmr.msrb.gmra.mxu2 %v9897_v4 }
 0x2a8   :  { %v2397_v28 = vpop.f32.mrf.mxu0  ;;  %v2490_v27 = vpop.f32.mrf.mxu1 }
 0x2a9   :  { %v2491_v41 = vadd.f32 %v2490_v27, %v2394_v37  ;;  %v2591_v58 = vpop.f32.mrf.mxu2  ;;  %v2812_v59 = vpop.f32.mrf.mxu3  ;;  %v2398_v4 = vadd.f32 %v2397_v28, %v7704_v14 }
 0x2ab   :  { %v2592_v7 = vadd.f32 %v2591_v58, %v2491_v41  ;;  %2930 = vmatmul.f32.gmra.mxu0 %v9933_v39  ;;  %3039 = vmatmul.f32.vlgmr.msrb.gmra.mxu1 %v9934_v61  ;;  %v9939_v58 = vld [vmem:[#allocation80_spill] sm:$0xff] }
 0x2ac   :  { %3970 = vmatpush.msrb.mxu1 %v3440_v25 }
 0x2ad   :  { %v7798_v49 = vadd.f32 %v2812_v59, %v2592_v7  ;;  %3299 = vmatmul.f32.gmra.mxu3 %v6539_v50  ;;  %v9940_v59 = vld [vmem:[#allocation78_spill] sm:$0xff] }
 0x2ae   :  { %3202 = vmatmul.f32.gmra.mxu2 %v6539_v50 }
 0x2b0   :  { %v2401_v44 = vpop.f32.mrf.mxu0  ;;  %v2494_v35 = vpop.f32.mrf.mxu1 }
 0x2b1   :  { %v2495_v33 = vadd.f32 %v2494_v35, %v2398_v4  ;;  %v2599_v15 = vpop.f32.mrf.mxu2  ;;  %v2816_v24 = vpop.f32.mrf.mxu3  ;;  %v2402_v50 = vadd.f32 %v2401_v44, %v7710_v18 }
 0x2b3   :  { %v2600_v23 = vadd.f32 %v2599_v15, %v2495_v33  ;;  %2935 = vmatmul.f32.gmra.mxu0 %v9935_v38  ;;  %3045 = vmatmul.f32.gmra.mxu1 %v9936_v56  ;;  %v9941_v33 = vld [vmem:[#allocation84_spill] sm:$0xff]  ;;  %v9942_v15 = vld [vmem:[#allocation82_spill] sm:$0xff] }
 0x2b5   :  { %v7805_v20 = vadd.f32 %v2816_v24, %v2600_v23  ;;  %3303 = vmatmul.f32.gmra.mxu3 %v6568_v19 }
 0x2b6   :  { %3206 = vmatmul.f32.gmra.mxu2 %v6568_v19 }
 0x2b8   :  { %v2405_v25 = vpop.f32.mrf.mxu0  ;;  %v2498_v14 = vpop.f32.mrf.mxu1 }
 0x2b9   :  { %v2499_v16 = vadd.f32 %v2498_v14, %v2402_v50  ;;  %v2607_v29 = vpop.f32.mrf.mxu2  ;;  %v2820_v31 = vpop.f32.mrf.mxu3  ;;  %v2406_v19 = vadd.f32 %v2405_v25, %v7716_v12  ;;  %v9943_v14 = vld [vmem:[#allocation88_spill] sm:$0xff] }
 0x2bb   :  { %v2608_v9 = vadd.f32 %v2607_v29, %v2499_v16  ;;  %2940 = vmatmul.f32.gmra.mxu0 %v9937_v42  ;;  %3051 = vmatmul.f32.gmra.mxu1 %v9938_v11  ;;  %v9944_v16 = vld [vmem:[#allocation86_spill] sm:$0xff] }
 0x2bd   :  { %v7812_v21 = vadd.f32 %v2820_v31, %v2608_v9  ;;  %3307 = vmatmul.f32.gmra.mxu3 %v9905_v13 }
 0x2be   :  { %3210 = vmatmul.f32.gmra.mxu2 %v9905_v13 }
 0x2c0   :  { %v2409_v22 = vpop.f32.mrf.mxu0  ;;  %v2502_v18 = vpop.f32.mrf.mxu1 }
 0x2c1   :  { %v2503_v37 = vadd.f32 %v2502_v18, %v2406_v19  ;;  %v2615_v28 = vpop.f32.mrf.mxu2  ;;  %v2824_v27 = vpop.f32.mrf.mxu3  ;;  %v2410_v13 = vadd.f32 %v2409_v22, %v7722_v1  ;;  %v9945_v22 = vld [vmem:[#allocation92_spill] sm:$0xff]  ;;  %v9946_v18 = vld [vmem:[#allocation90_spill] sm:$0xff] }
 0x2c3   :  { %v2616_v41 = vadd.f32 %v2615_v28, %v2503_v37  ;;  %2945 = vmatmul.f32.gmra.mxu0 %v9939_v58  ;;  %3057 = vmatmul.f32.gmra.mxu1 %v9940_v59 }
 0x2c5   :  { %v7819_v7 = vadd.f32 %v2824_v27, %v2616_v41  ;;  %3311 = vmatmul.f32.gmra.mxu3 %v9907_v2 }
 0x2c6   :  { %3214 = vmatmul.f32.gmra.mxu2 %v9907_v2 }
 0x2c8   :  { %v2413_v39 = vpop.f32.mrf.mxu0  ;;  %v2506_v12 = vpop.f32.mrf.mxu1 }
 0x2c9   :  { %v2507_v61 = vadd.f32 %v2506_v12, %v2410_v13  ;;  %v2623_v4 = vpop.f32.mrf.mxu2  ;;  %v2828_v44 = vpop.f32.mrf.mxu3  ;;  %v2414_v2 = vadd.f32 %v2413_v39, %v7728_v0  ;;  %v9947_v13 = vld [vmem:[#allocation96_spill] sm:$0xff]  ;;  %v9948_v39 = vld [vmem:[#allocation94_spill] sm:$0xff] }
 0x2cb   :  { %v2624_v35 = vadd.f32 %v2623_v4, %v2507_v61  ;;  %2950 = vmatmul.f32.gmra.mxu0 %v9941_v33  ;;  %3063 = vmatmul.f32.gmra.mxu1 %v9942_v15  ;;  %v9949_v15 = vld [vmem:[#allocation100_spill] sm:$0xff] }
 0x2cd   :  { %v7826_v24 = vadd.f32 %v2828_v44, %v2624_v35  ;;  %3315 = vmatmul.f32.gmra.mxu3 %v9909_v40 }
 0x2ce   :  { %3218 = vmatmul.f32.gmra.mxu2 %v9909_v40 }
 0x2d0   :  { %v2417_v23 = vpop.f32.mrf.mxu0  ;;  %v2510_v1 = vpop.f32.mrf.mxu1 }
 0x2d1   :  { %v2511_v38 = vadd.f32 %v2510_v1, %v2414_v2  ;;  %v2631_v56 = vpop.f32.mrf.mxu2  ;;  %v2832_v50 = vpop.f32.mrf.mxu3  ;;  %v2418_v40 = vadd.f32 %v2417_v23, %v7734_v32  ;;  %v9950_v2 = vld [vmem:[#allocation98_spill] sm:$0xff] }
 0x2d3   :  { %v2632_v25 = vadd.f32 %v2631_v56, %v2511_v38  ;;  %2955 = vmatmul.f32.gmra.mxu0 %v9943_v14  ;;  %3069 = vmatmul.f32.gmra.mxu1 %v9944_v16  ;;  %v9952_v14 = vld [vmem:[#allocation104_spill] sm:$0xff]  ;;  %v9953_v16 = vld [vmem:[#allocation102_spill] sm:$0xff] }
 0x2d5   :  { %v7833_v29 = vadd.f32 %v2832_v50, %v2632_v25  ;;  %3319 = vmatmul.f32.gmra.mxu3 %v9911_v48 }
 0x2d6   :  { %3222 = vmatmul.f32.gmra.mxu2 %v9911_v48 }
 0x2d8   :  { %v2421_v31 = vpop.f32.mrf.mxu0  ;;  %v2514_v0 = vpop.f32.mrf.mxu1 }
 0x2d9   :  { %v2515_v9 = vadd.f32 %v2514_v0, %v2418_v40  ;;  %v2639_v42 = vpop.f32.mrf.mxu2  ;;  %v2836_v11 = vpop.f32.mrf.mxu3  ;;  %v2422_v48 = vadd.f32 %v2421_v31, %v7740_v5 }
 0x2db   :  { %v2640_v19 = vadd.f32 %v2639_v42, %v2515_v9  ;;  %2960 = vmatmul.f32.gmra.mxu0 %v9945_v22  ;;  %3075 = vmatmul.f32.gmra.mxu1 %v9946_v18  ;;  %v9956_v22 = vld [vmem:[#allocation106_spill] sm:$0xff] }
 0x2dd   :  { %v7840_v37 = vadd.f32 %v2836_v11, %v2640_v19  ;;  %3323 = vmatmul.f32.gmra.mxu3 %v9913_v26  ;;  %v9955_v19 = vld [vmem:[#allocation108_spill] sm:$0xff] }
 0x2de   :  { %3226 = vmatmul.f32.gmra.mxu2 %v9913_v26 }
 0x2e0   :  { %v2425_v28 = vpop.f32.mrf.mxu0  ;;  %v2518_v32 = vpop.f32.mrf.mxu1 }
 0x2e1   :  { %v2519_v27 = vadd.f32 %v2518_v32, %v2422_v48  ;;  %v2647_v41 = vpop.f32.mrf.mxu2  ;;  %v2840_v58 = vpop.f32.mrf.mxu3  ;;  %v2426_v26 = vadd.f32 %v2425_v28, %v7746_v57 }
 0x2e3   :  { %v2648_v59 = vadd.f32 %v2647_v41, %v2519_v27  ;;  %2965 = vmatmul.f32.gmra.mxu0 %v9947_v13  ;;  %3081 = vmatmul.f32.gmra.mxu1 %v9948_v39 }
 0x2e5   :  { %v7847_v12 = vadd.f32 %v2840_v58, %v2648_v59  ;;  %3327 = vmatmul.f32.gmra.mxu3 %v9915_v55  ;;  %v9958_v58 = vld [vmem:[#allocation112_spill] sm:$0xff]  ;;  %v9959_v59 = vld [vmem:[#allocation110_spill] sm:$0xff] }
 0x2e6   :  { %3230 = vmatmul.f32.gmra.mxu2 %v9915_v55 }
 0x2e8   :  { %v2429_v61 = vpop.f32.mrf.mxu0  ;;  %v2522_v5 = vpop.f32.mrf.mxu1 }
 0x2e9   :  { %v2523_v4 = vadd.f32 %v2522_v5, %v2426_v26  ;;  %v2655_v44 = vpop.f32.mrf.mxu2  ;;  %v2844_v35 = vpop.f32.mrf.mxu3  ;;  %v2430_v55 = vadd.f32 %v2429_v61, %v7752_v45 }
 0x2eb   :  { %v2656_v33 = vadd.f32 %v2655_v44, %v2523_v4  ;;  %2970 = vmatmul.f32.gmra.mxu0 %v9949_v15  ;;  %3087 = vmatmul.f32.gmra.mxu1 %v9950_v2  ;;  %v3359_v4 = vld [vmem:[%s9385_s0] sm:$0xff] }
 0x2ec   :  { %v3378_v15 = vsel %vm3376_vm0, %v3359_v4, 0  ;;  %v3362_v4 = vld [vmem:[%s9385_s0 + $0x18] sm:$0xff] }
 0x2ed   :  { %v7854_v23 = vadd.f32 %v2844_v35, %v2656_v33  ;;  %3331 = vmatmul.f32.gmra.mxu3 %v9917_v60  ;;  %v9961_v35 = vld [vmem:[#allocation116_spill] sm:$0xff]  ;;  %v9962_v33 = vld [vmem:[#allocation114_spill] sm:$0xff]  ;;  %v7891_v2 = vand.u32 4294901760, %v3378_v15 }
 0x2ee   :  { %3234 = vmatmul.f32.gmra.mxu2 %v9917_v60 }
 0x2ef   :  { %9951 = vst [vmem:[#allocation9_spill] sm:$0xff] %v7854_v23 }
 0x2f0   :  { %v2433_v1 = vpop.f32.mrf.mxu0  ;;  %v2526_v57 = vpop.f32.mrf.mxu1 }
 0x2f1   :  { %v2527_v38 = vadd.f32 %v2526_v57, %v2430_v55  ;;  %v2663_v56 = vpop.f32.mrf.mxu2  ;;  %v2848_v50 = vpop.f32.mrf.mxu3  ;;  %v2434_v60 = vadd.f32 %v2433_v1, %v7758_v43 }
 0x2f3   :  { %v2664_v25 = vadd.f32 %v2663_v56, %v2527_v38  ;;  %2975 = vmatmul.f32.gmra.mxu0 %v9952_v14  ;;  %3093 = vmatmul.f32.gmra.mxu1 %v9953_v16  ;;  %v9964_v14 = vld [vmem:[#allocation121_spill] sm:$0xff]  ;;  %v9965_v16 = vld [vmem:[#allocation118_spill] sm:$0xff] }
 0x2f5   :  { %v7861_v40 = vadd.f32 %v2848_v50, %v2664_v25  ;;  %3335 = vmatmul.f32.gmra.mxu3 %v9920_v8  ;;  %v3360_v50 = vld [vmem:[%s9385_s0 + $0x8] sm:$0xff] }
 0x2f6   :  { %3238 = vmatmul.f32.gmra.mxu2 %v9920_v8 }
 0x2f7   :  { %9954 = vst [vmem:[#allocation16_spill] sm:$0xff] %v7861_v40 }
 0x2f8   :  { %v2437_v31 = vpop.f32.mrf.mxu0  ;;  %v2530_v45 = vpop.f32.mrf.mxu1 }
 0x2f9   :  { %v2531_v0 = vadd.f32 %v2530_v45, %v2434_v60  ;;  %v2671_v9 = vpop.f32.mrf.mxu2  ;;  %v2852_v42 = vpop.f32.mrf.mxu3  ;;  %v2438_v8 = vadd.f32 %v2437_v31, %v7764_v62 }
 0x2fb   :  { %v2672_v11 = vadd.f32 %v2671_v9, %v2531_v0  ;;  %2980 = vmatmul.f32.gmra.mxu0 %v9955_v19  ;;  %3099 = vmatmul.f32.gmra.mxu1 %v9956_v22 }
 0x2fd   :  { %v7868_v18 = vadd.f32 %v2852_v42, %v2672_v11  ;;  %3339 = vmatmul.f32.gmra.mxu3 %v9922_v46 }
 0x2fe   :  { %3242 = vmatmul.f32.gmra.mxu2 %v9922_v46 }
 0x2ff   :  { %9957 = vst [vmem:[#allocation14_spill] sm:$0xff] %v7868_v18 }
 0x300   :  { %v2441_v48 = vpop.f32.mrf.mxu0  ;;  %v2534_v43 = vpop.f32.mrf.mxu1 }
 0x301   :  { %v2535_v28 = vadd.f32 %v2534_v43, %v2438_v8  ;;  %v2679_v32 = vpop.f32.mrf.mxu2  ;;  %v2856_v27 = vpop.f32.mrf.mxu3  ;;  %v2442_v46 = vadd.f32 %v2441_v48, %v7773_v53  ;;  %v3361_v8 = vld [vmem:[%s9385_s0 + $0x10] sm:$0xff]  ;;  %v9967_v43 = vld [vmem:[#allocation127_spill] sm:$0xff] }
 0x303   :  { %v2680_v41 = vadd.f32 %v2679_v32, %v2535_v28  ;;  %2985 = vmatmul.f32.gmra.mxu0 %v9958_v58  ;;  %3105 = vmatmul.f32.gmra.mxu1 %v9959_v59  ;;  %v9968_v28 = vld [vmem:[#allocation123_spill] sm:$0xff]  ;;  %v3384_v32 = vsel %vm3376_vm0, %v3361_v8, 0 }
 0x305   :  { %v7875_v13 = vadd.f32 %v2856_v27, %v2680_v41  ;;  %3343 = vmatmul.f32.gmra.mxu3 %v9924_v51 }
 0x306   :  { %3246 = vmatmul.f32.gmra.mxu2 %v9924_v51 }
 0x307   :  { %9960 = vst [vmem:[#allocation23_spill] sm:$0xff] %v7875_v13 }
 0x308   :  { %v2445_v39 = vpop.f32.mrf.mxu0  ;;  %v2538_v62 = vpop.f32.mrf.mxu1 }
 0x309   :  { %v2539_v26 = vadd.f32 %v2538_v62, %v2442_v46  ;;  %v2687_v61 = vpop.f32.mrf.mxu2  ;;  %v2860_v5 = vpop.f32.mrf.mxu3  ;;  %v2446_v53 = vadd.f32 %v2445_v39, %v7779_v52  ;;  %v3381_v52 = vsel %vm3376_vm0, %v3360_v50, 0  ;;  %v7919_v46 = vand.u32 4294901760, %v3384_v32 }
 0x30a   :  { %v7905_v0 = vand.u32 4294901760, %v3381_v52 }
 0x30b   :  { %v2688_v44 = vadd.f32 %v2687_v61, %v2539_v26  ;;  %2990 = vmatmul.f32.gmra.mxu0 %v9961_v35  ;;  %3111 = vmatmul.f32.gmra.mxu1 %v9962_v33  ;;  %v9970_v35 = vld [vmem:[#allocation129_spill] sm:$0xff]  ;;  %v3387_v33 = vsel %vm3376_vm0, %v3362_v4, 0 }
 0x30d   :  { %v7886_v51 = vadd.f32 %v2860_v5, %v2688_v44  ;;  %3347 = vmatmul.f32.gmra.mxu3 %v9926_v17 }
 0x30e   :  { %3250 = vmatmul.f32.gmra.mxu2 %v9926_v17  ;;  %v3443_v17 = vsub.f32 %v3378_v15, %v7891_v2 }
 0x30f   :  { %9963 = vst [vmem:[#allocation13_spill] sm:$0xff] %v7886_v51 }
 0x310   :  { %v2449_v55 = vpop.f32.mrf.mxu0  ;;  %v2542_v1 = vpop.f32.mrf.mxu1  ;;  %v3444_v45 = vand.u32 4294901760, %v3443_v17 }
 0x311   :  { %v2543_v57 = vadd.f32 %v2542_v1, %v2446_v53  ;;  %v2695_v38 = vpop.f32.mrf.mxu2  ;;  %v2864_v56 = vpop.f32.mrf.mxu3  ;;  %v2450_v31 = vadd.f32 %v2449_v55, %v7785_v30  ;;  %v3451_v30 = vsub.f32 %v3381_v52, %v7905_v0 }
 0x313   :  { %v2696_v25 = vadd.f32 %v2695_v38, %v2543_v57  ;;  %2995 = vmatmul.f32.gmra.mxu0 %v9964_v14  ;;  %3117 = vmatmul.f32.gmra.mxu1 %v9965_v16  ;;  %v3452_v59 = vand.u32 4294901760, %v3451_v30  ;;  %v7930_v57 = vand.u32 4294901760, %v3387_v33  ;;  %v3363_v16 = vld [vmem:[%s9385_s0 + $0x20] sm:$0xff] }
 0x315   :  { %v7900_v60 = vadd.f32 %v2864_v56, %v2696_v25  ;;  %3351 = vmatmul.f32.gmra.mxu3 %v9928_v63 }
 0x316   :  { %3254 = vmatmul.f32.gmra.mxu2 %v9928_v63  ;;  %v3445_v63 = vsub.f32 %v3443_v17, %v3444_v45 }
 0x317   :  { %9966 = vst [vmem:[#allocation20_spill] sm:$0xff] %v7900_v60 }
 0x318   :  { %v2453_v9 = vpop.f32.mrf.mxu0  ;;  %v2546_v42 = vpop.f32.mrf.mxu1  ;;  %v3446_v58 = vand.u32 4294901760, %v3445_v63  ;;  %v3364_v63 = vld [vmem:[%s9385_s0 + $0x28] sm:$0xff] }
 0x319   :  { %v2547_v11 = vadd.f32 %v2546_v42, %v2450_v31  ;;  %v2703_v19 = vpop.f32.mrf.mxu2  ;;  %v2868_v22 = vpop.f32.mrf.mxu3  ;;  %v2454_v41 = vadd.f32 %v2453_v9, %v7791_v6  ;;  %v3459_v6 = vsub.f32 %v3384_v32, %v7919_v46  ;;  %v3390_v31 = vsel %vm3376_vm0, %v3363_v16, 0 }
 0x31b   :  { %v2704_v48 = vadd.f32 %v2703_v19, %v2547_v11  ;;  %3000 = vmatmul.f32.gmra.mxu0 %v9967_v43  ;;  %3123 = vmatmul.f32.gmra.mxu1 %v9968_v28  ;;  %v3460_v1 = vand.u32 4294901760, %v3459_v6  ;;  %v7941_v19 = vand.u32 4294901760, %v3390_v31 }
 0x31d   :  { %v7914_v27 = vadd.f32 %v2868_v22, %v2704_v48  ;;  %3355 = vmatmul.f32.gmra.mxu3 %v9930_v36 }
 0x31e   :  { %3258 = vmatmul.f32.gmra.mxu2 %v9930_v36  ;;  %v3453_v36 = vsub.f32 %v3451_v30, %v3452_v59 }
 0x31f   :  { %9969 = vst [vmem:[#allocation18_spill] sm:$0xff] %v7914_v27 }
 0x320   :  { %v2550_v39 = vpop.f32.mrf.mxu1  ;;  %v2926_v62 = vpop.f32.mrf.mxu0  ;;  %v3454_v55 = vand.u32 4294901760, %v3453_v36  ;;  %v3365_v36 = vld [vmem:[%s9385_s0 + $0x30] sm:$0xff] }
 0x321   :  { %v2551_v26 = vadd.f32 %v2550_v39, %v2454_v41  ;;  %v2711_v61 = vpop.f32.mrf.mxu2  ;;  %v2872_v5 = vpop.f32.mrf.mxu3  ;;  %v2927_v53 = vadd.f32 %v2926_v62, %v7798_v49  ;;  %v3467_v49 = vsub.f32 %v3387_v33, %v7930_v57  ;;  %v3393_v41 = vsel %vm3376_vm0, %v3364_v63, 0 }
 0x323   :  { %v2712_v44 = vadd.f32 %v2711_v61, %v2551_v26  ;;  %3129 = vmatmul.f32.gmra.mxu1 %v9970_v35  ;;  %3447 = vmatmul.f32.vlgmr.msra.gmra.mxu0 %v3446_v58  ;;  %v3468_v11 = vand.u32 4294901760, %v3467_v49  ;;  %v7952_v26 = vand.u32 4294901760, %v3393_v41 }
 0x325   :  { %v7927_v15 = vadd.f32 %v2872_v5, %v2712_v44  ;;  %3776 = vmatmul.f32.vlgmr.msra.gmra.mxu3 %v3444_v45 }
 0x326   :  { %3677 = vmatmul.f32.vlgmr.msra.gmra.mxu2 %v3443_v17  ;;  %v3461_v17 = vsub.f32 %v3459_v6, %v3460_v1 }
 0x327   :  { %9971 = vst [vmem:[#allocation27_spill] sm:$0xff] %v7927_v15 }
 0x328   :  { %v2931_v38 = vpop.f32.mrf.mxu0  ;;  %v3040_v56 = vpop.f32.mrf.mxu1  ;;  %v3462_v42 = vand.u32 4294901760, %v3461_v17 }
 0x329   :  { %v3041_v50 = vadd.f32 %v3040_v56, %v2927_v53  ;;  %v3199_v25 = vpop.f32.mrf.mxu2  ;;  %v3296_v14 = vpop.f32.mrf.mxu3  ;;  %v2932_v9 = vadd.f32 %v2931_v38, %v7805_v20  ;;  %v3475_v20 = vsub.f32 %v3390_v31, %v7941_v19  ;;  %v3396_v53 = vsel %vm3376_vm0, %v3365_v36, 0  ;;  %v3366_v31 = vld [vmem:[%s9385_s0 + $0x38] sm:$0xff] }
 0x32b   :  { %v3200_v52 = vadd.f32 %v3199_v25, %v3041_v50  ;;  %3455 = vmatmul.f32.gmra.mxu0 %v3454_v55  ;;  %3593 = vmatmul.f32.vlgmr.msra.gmra.mxu1 %v7891_v2  ;;  %v3476_v62 = vand.u32 4294901760, %v3475_v20  ;;  %v7963_v50 = vand.u32 4294901760, %v3396_v53 }
 0x32d   :  { %v7938_v45 = vadd.f32 %v3296_v14, %v3200_v52  ;;  %3782 = vmatmul.f32.gmra.mxu3 %v3452_v59 }
 0x32e   :  { %3682 = vmatmul.f32.gmra.mxu2 %v3451_v30  ;;  %v3469_v30 = vsub.f32 %v3467_v49, %v3468_v11 }
 0x330   :  { %v2936_v22 = vpop.f32.mrf.mxu0  ;;  %v3046_v8 = vpop.f32.mrf.mxu1  ;;  %v3470_v39 = vand.u32 4294901760, %v3469_v30 }
 0x331   :  { %v3047_v48 = vadd.f32 %v3046_v8, %v2932_v9  ;;  %v3203_v43 = vpop.f32.mrf.mxu2  ;;  %v3300_v28 = vpop.f32.mrf.mxu3  ;;  %v2937_v59 = vadd.f32 %v2936_v22, %v7812_v21  ;;  %v3483_v21 = vsub.f32 %v3393_v41, %v7952_v26 }
 0x333   :  { %v3204_v32 = vadd.f32 %v3203_v43, %v3047_v48  ;;  %3463 = vmatmul.f32.gmra.mxu0 %v3462_v42  ;;  %3597 = vmatmul.f32.gmra.mxu1 %v7905_v0  ;;  %v3484_v56 = vand.u32 4294901760, %v3483_v21  ;;  %v3399_v42 = vsel %vm3376_vm0, %v3366_v31, 0 }
 0x334   :  { %v7974_v43 = vand.u32 4294901760, %v3399_v42 }
 0x335   :  { %v7949_v58 = vadd.f32 %v3300_v28, %v3204_v32  ;;  %3788 = vmatmul.f32.gmra.mxu3 %v3460_v1 }
 0x336   :  { %3687 = vmatmul.f32.gmra.mxu2 %v3459_v6  ;;  %v3477_v6 = vsub.f32 %v3475_v20, %v3476_v62 }
 0x338   :  { %v2941_v61 = vpop.f32.mrf.mxu0  ;;  %v3052_v5 = vpop.f32.mrf.mxu1  ;;  %v3478_v38 = vand.u32 4294901760, %v3477_v6 }
 0x339   :  { %v3053_v4 = vadd.f32 %v3052_v5, %v2937_v59  ;;  %v3207_v44 = vpop.f32.mrf.mxu2  ;;  %v3304_v35 = vpop.f32.mrf.mxu3  ;;  %v2942_v1 = vadd.f32 %v2941_v61, %v7819_v7  ;;  %v3491_v7 = vsub.f32 %v3396_v53, %v7963_v50  ;;  %v3367_v59 = vld [vmem:[%s9385_s0 + $0x40] sm:$0xff] }
 0x33b   :  { %v3208_v33 = vadd.f32 %v3207_v44, %v3053_v4  ;;  %3471 = vmatmul.f32.gmra.mxu0 %v3470_v39  ;;  %3601 = vmatmul.f32.gmra.mxu1 %v7919_v46  ;;  %v3492_v48 = vand.u32 4294901760, %v3491_v7 }
 0x33d   :  { %v7960_v55 = vadd.f32 %v3304_v35, %v3208_v33  ;;  %3794 = vmatmul.f32.gmra.mxu3 %v3468_v11 }
 0x33e   :  { %3692 = vmatmul.f32.gmra.mxu2 %v3467_v49  ;;  %v3485_v49 = vsub.f32 %v3483_v21, %v3484_v56 }
 0x340   :  { %v2946_v25 = vpop.f32.mrf.mxu0  ;;  %v3058_v14 = vpop.f32.mrf.mxu1  ;;  %v3486_v8 = vand.u32 4294901760, %v3485_v49 }
 0x341   :  { %v3059_v16 = vadd.f32 %v3058_v14, %v2942_v1  ;;  %v3211_v52 = vpop.f32.mrf.mxu2  ;;  %v3308_v17 = vpop.f32.mrf.mxu3  ;;  %v2947_v22 = vadd.f32 %v2946_v25, %v7826_v24  ;;  %v3499_v24 = vsub.f32 %v3399_v42, %v7974_v43 }
 0x343   :  { %v3212_v9 = vadd.f32 %v3211_v52, %v3059_v16  ;;  %3479 = vmatmul.f32.gmra.mxu0 %v3478_v38  ;;  %3605 = vmatmul.f32.gmra.mxu1 %v7930_v57  ;;  %v3500_v44 = vand.u32 4294901760, %v3499_v24  ;;  %v3368_v38 = vld [vmem:[%s9385_s0 + $0x48] sm:$0xff] }
 0x345   :  { %v7971_v11 = vadd.f32 %v3308_v17, %v3212_v9  ;;  %3800 = vmatmul.f32.gmra.mxu3 %v3476_v62  ;;  %v3402_v62 = vsel %vm3376_vm0, %v3367_v59, 0 }
 0x346   :  { %3697 = vmatmul.f32.gmra.mxu2 %v3475_v20  ;;  %v3493_v20 = vsub.f32 %v3491_v7, %v3492_v48  ;;  %v7985_v35 = vand.u32 4294901760, %v3402_v62 }
 0x348   :  { %v2951_v28 = vpop.f32.mrf.mxu0  ;;  %v3064_v63 = vpop.f32.mrf.mxu1  ;;  %v3494_v4 = vand.u32 4294901760, %v3493_v20 }
 0x349   :  { %v3065_v32 = vadd.f32 %v3064_v63, %v2947_v22  ;;  %v3215_v30 = vpop.f32.mrf.mxu2  ;;  %v3312_v41 = vpop.f32.mrf.mxu3  ;;  %v2952_v5 = vadd.f32 %v2951_v28, %v7833_v29  ;;  %v3507_v29 = vsub.f32 %v3402_v62, %v7985_v35  ;;  %v3369_v28 = vld [vmem:[%s9385_s0 + $0x50] sm:$0xff] }
 0x34b   :  { %v3216_v39 = vadd.f32 %v3215_v30, %v3065_v32  ;;  %3487 = vmatmul.f32.gmra.mxu0 %v3486_v8  ;;  %3609 = vmatmul.f32.gmra.mxu1 %v7941_v19  ;;  %v3508_v17 = vand.u32 4294901760, %v3507_v29 }
 0x34d   :  { %v7982_v61 = vadd.f32 %v3312_v41, %v3216_v39  ;;  %3806 = vmatmul.f32.gmra.mxu3 %v3484_v56  ;;  %v3405_v56 = vsel %vm3376_vm0, %v3368_v38, 0 }
 0x34e   :  { %3702 = vmatmul.f32.gmra.mxu2 %v3483_v21  ;;  %v3501_v21 = vsub.f32 %v3499_v24, %v3500_v44  ;;  %v7996_v31 = vand.u32 4294901760, %v3405_v56 }
 0x350   :  { %v2956_v36 = vpop.f32.mrf.mxu0  ;;  %v3070_v33 = vpop.f32.mrf.mxu1  ;;  %v3502_v52 = vand.u32 4294901760, %v3501_v21 }
 0x351   :  { %v3071_v6 = vadd.f32 %v3070_v33, %v2952_v5  ;;  %v3219_v53 = vpop.f32.mrf.mxu2  ;;  %v3316_v1 = vpop.f32.mrf.mxu3  ;;  %v2957_v16 = vadd.f32 %v2956_v36, %v7840_v37  ;;  %v3515_v37 = vsub.f32 %v3405_v56, %v7996_v31  ;;  %v3370_v36 = vld [vmem:[%s9385_s0 + $0x58] sm:$0xff] }
 0x353   :  { %v3220_v25 = vadd.f32 %v3219_v53, %v3071_v6  ;;  %3495 = vmatmul.f32.gmra.mxu0 %v3494_v4  ;;  %3613 = vmatmul.f32.gmra.mxu1 %v7952_v26  ;;  %v3516_v59 = vand.u32 4294901760, %v3515_v37 }
 0x355   :  { %v7993_v14 = vadd.f32 %v3316_v1, %v3220_v25  ;;  %3812 = vmatmul.f32.gmra.mxu3 %v3492_v48  ;;  %v3408_v48 = vsel %vm3376_vm0, %v3369_v28, 0  ;;  %v3372_v28 = vld [vmem:[%s9385_s0 + $0x68] sm:$0xff] }
 0x356   :  { %3707 = vmatmul.f32.gmra.mxu2 %v3491_v7  ;;  %v3509_v7 = vsub.f32 %v3507_v29, %v3508_v17  ;;  %v8007_v39 = vand.u32 4294901760, %v3408_v48 }
 0x358   :  { %v2961_v9 = vpop.f32.mrf.mxu0  ;;  %v3076_v49 = vpop.f32.mrf.mxu1  ;;  %v3510_v41 = vand.u32 4294901760, %v3509_v7 }
 0x359   :  { %v3077_v42 = vadd.f32 %v3076_v49, %v2957_v16  ;;  %v3223_v22 = vpop.f32.mrf.mxu2  ;;  %v3320_v8 = vpop.f32.mrf.mxu3  ;;  %v2962_v30 = vadd.f32 %v2961_v9, %v7847_v12  ;;  %v3523_v12 = vsub.f32 %v3408_v48, %v8007_v39  ;;  %v3371_v16 = vld [vmem:[%s9385_s0 + $0x60] sm:$0xff] }
 0x35b   :  { %v3224_v63 = vadd.f32 %v3223_v22, %v3077_v42  ;;  %3503 = vmatmul.f32.gmra.mxu0 %v3502_v52  ;;  %3617 = vmatmul.f32.gmra.mxu1 %v7963_v50  ;;  %v3524_v38 = vand.u32 4294901760, %v3523_v12 }
 0x35d   :  { %v8004_v32 = vadd.f32 %v3320_v8, %v3224_v63  ;;  %3818 = vmatmul.f32.gmra.mxu3 %v3500_v44  ;;  %v3411_v44 = vsel %vm3376_vm0, %v3370_v36, 0  ;;  %v3525_v52 = vsub.f32 %v3523_v12, %v3524_v38 }
 0x35e   :  { %3712 = vmatmul.f32.gmra.mxu2 %v3499_v24  ;;  %v3517_v24 = vsub.f32 %v3515_v37, %v3516_v59  ;;  %v8019_v25 = vand.u32 4294901760, %v3411_v44 }
 0x35f   :  { %9972 = vst [vmem:[#allocation17_spill] sm:$0xff] %v8004_v32 }
 0x360   :  { %v8009_v20 = vpop.f32.mrf.mxu0  ;;  %v3082_v62 = vpop.f32.mrf.mxu1  ;;  %v3518_v1 = vand.u32 4294901760, %v3517_v24  ;;  %v3531_v9 = vsub.f32 %v3411_v44, %v8019_v25 }
 0x361   :  { %9973 = vst [vmem:[#allocation24_spill] sm:$0xff] %v8009_v20  ;;  %v3083_v5 = vadd.f32 %v3082_v62, %v2962_v30  ;;  %v3227_v4 = vpop.f32.mrf.mxu2  ;;  %v3324_v33 = vpop.f32.mrf.mxu3 }
 0x362   :  { %v3532_v49 = vand.u32 4294901760, %v3531_v9 }
 0x363   :  { %v3228_v6 = vadd.f32 %v3227_v4, %v3083_v5  ;;  %3511 = vmatmul.f32.gmra.mxu0 %v3510_v41  ;;  %3621 = vmatmul.f32.gmra.mxu1 %v7974_v43  ;;  %v3373_v5 = vld [vmem:[%s9385_s0 + $0x70] sm:$0xff] }
 0x364   :  { %v3533_v63 = vsub.f32 %v3531_v9, %v3532_v49 }
 0x365   :  { %v8017_v53 = vadd.f32 %v3324_v33, %v3228_v6  ;;  %3824 = vmatmul.f32.gmra.mxu3 %v3508_v17  ;;  %v3526_v17 = vand.u32 4294901760, %v3525_v52  ;;  %v3420_v33 = vsel %vm3376_vm0, %v3373_v5, 0 }
 0x366   :  { %3717 = vmatmul.f32.gmra.mxu2 %v3507_v29  ;;  %v3414_v29 = vsel %vm3376_vm0, %v3371_v16, 0  ;;  %v3534_v48 = vand.u32 4294901760, %v3533_v63 }
 0x367   :  { %9974 = vst [vmem:[#allocation22_spill] sm:$0xff] %v8017_v53  ;;  %v8031_v42 = vand.u32 4294901760, %v3414_v29 }
 0x368   :  { %v8021_v21 = vpop.f32.mrf.mxu0  ;;  %v8023_v56 = vpop.f32.mrf.mxu1 }
 0x369   :  { %9975 = vst [vmem:[#allocation31_spill] sm:$0xff] %v8021_v21  ;;  %v3539_v7 = vsub.f32 %v3414_v29, %v8031_v42  ;;  %v8132_v10 = vpop.f32.mrf.mxu2  ;;  %v8143_v34 = vpop.f32.mrf.mxu3 }
 0x36a   :  { %9976 = vst [vmem:[#allocation21_spill] sm:$0xff] %v8023_v56 }
 0x36b   :  { %3519 = vmatmul.f32.gmra.mxu0 %v3518_v1  ;;  %3625 = vmatmul.f32.gmra.mxu1 %v7985_v35  ;;  %v3540_v30 = vand.u32 4294901760, %v3539_v7  ;;  %9990 = vst [vmem:[#allocation38_spill] sm:$0xff] %v8132_v10 }
 0x36c   :  { %9991 = vst [vmem:[#allocation47_spill] sm:$0xff] %v8143_v34 }
 0x36d   :  { %3830 = vmatmul.f32.gmra.mxu3 %v3516_v59  ;;  %v3541_v4 = vsub.f32 %v3539_v7, %v3540_v30 }
 0x36e   :  { %3722 = vmatmul.f32.gmra.mxu2 %v3515_v37  ;;  %v3417_v37 = vsel %vm3376_vm0, %v3372_v28, 0 }
 0x36f   :  { %v8043_v41 = vand.u32 4294901760, %v3417_v37  ;;  %v3542_v6 = vand.u32 4294901760, %v3541_v4 }
 0x370   :  { %v8033_v22 = vpop.f32.mrf.mxu0  ;;  %v8035_v8 = vpop.f32.mrf.mxu1 }
 0x371   :  { %9977 = vst [vmem:[#allocation28_spill] sm:$0xff] %v8033_v22  ;;  %v3547_v36 = vsub.f32 %v3417_v37, %v8043_v41 }
 0x372   :  { %9978 = vst [vmem:[#allocation26_spill] sm:$0xff] %v8035_v8 }
 0x373   :  { %3527 = vmatmul.f32.gmra.mxu0 %v3526_v17  ;;  %3629 = vmatmul.f32.gmra.mxu1 %v7996_v31  ;;  %v3548_v24 = vand.u32 4294901760, %v3547_v36 }
 0x375   :  { %3836 = vmatmul.f32.gmra.mxu3 %v3524_v38  ;;  %v3374_v38 = vld [vmem:[%s9385_s0 + $0x78] sm:$0xff]  ;;  %v3549_v16 = vsub.f32 %v3547_v36, %v3548_v24 }
 0x376   :  { %3727 = vmatmul.f32.gmra.mxu2 %v3523_v12  ;;  %v8055_v12 = vand.u32 4294901760, %v3420_v33 }
 0x377   :  { %v3550_v29 = vand.u32 4294901760, %v3549_v16 }
 0x378   :  { %v8045_v59 = vpop.f32.mrf.mxu0  ;;  %v8047_v62 = vpop.f32.mrf.mxu1  ;;  %v3555_v52 = vsub.f32 %v3420_v33, %v8055_v12 }
 0x379   :  { %9979 = vst [vmem:[#allocation35_spill] sm:$0xff] %v8045_v59 }
 0x37a   :  { %9980 = vst [vmem:[#allocation25_spill] sm:$0xff] %v8047_v62  ;;  %v3556_v17 = vand.u32 4294901760, %v3555_v52 }
 0x37b   :  { %3535 = vmatmul.f32.gmra.mxu0 %v3534_v48  ;;  %3633 = vmatmul.f32.gmra.mxu1 %v8007_v39 }
 0x37c   :  { %v3557_v37 = vsub.f32 %v3555_v52, %v3556_v17 }
 0x37d   :  { %3842 = vmatmul.f32.gmra.mxu3 %v3532_v49 }
 0x37e   :  { %3732 = vmatmul.f32.gmra.mxu2 %v3531_v9  ;;  %v3423_v9 = vsel %vm3376_vm0, %v3374_v38, 0  ;;  %v3558_v5 = vand.u32 4294901760, %v3557_v37 }
 0x37f   :  { %v8067_v49 = vand.u32 4294901760, %v3423_v9 }
 0x380   :  { %v8057_v44 = vpop.f32.mrf.mxu0  ;;  %v8059_v1 = vpop.f32.mrf.mxu1 }
 0x381   :  { %9981 = vst [vmem:[#allocation32_spill] sm:$0xff] %v8057_v44  ;;  %v3563_v48 = vsub.f32 %v3423_v9, %v8067_v49 }
 0x382   :  { %9982 = vst [vmem:[#allocation30_spill] sm:$0xff] %v8059_v1 }
 0x383   :  { %3543 = vmatmul.f32.gmra.mxu0 %v3542_v6  ;;  %3637 = vmatmul.f32.gmra.mxu1 %v8019_v25  ;;  %v3564_v4 = vand.u32 4294901760, %v3563_v48 }
 0x385   :  { %3848 = vmatmul.f32.gmra.mxu3 %v3540_v30  ;;  %v3565_v33 = vsub.f32 %v3563_v48, %v3564_v4 }
 0x386   :  { %3737 = vmatmul.f32.gmra.mxu2 %v3539_v7 }
 0x387   :  { %v3566_v6 = vand.u32 4294901760, %v3565_v33 }
 0x388   :  { %v8069_v28 = vpop.f32.mrf.mxu0  ;;  %v8071_v63 = vpop.f32.mrf.mxu1 }
 0x389   :  { %9983 = vst [vmem:[#allocation39_spill] sm:$0xff] %v8069_v28 }
 0x38a   :  { %9984 = vst [vmem:[#allocation29_spill] sm:$0xff] %v8071_v63 }
 0x38b   :  { %3551 = vmatmul.f32.gmra.mxu0 %v3550_v29  ;;  %3641 = vmatmul.f32.gmra.mxu1 %v8031_v42 }
 0x38d   :  { %3854 = vmatmul.f32.gmra.mxu3 %v3548_v24 }
 0x38e   :  { %3742 = vmatmul.f32.gmra.mxu2 %v3547_v36  ;;  %v4211_v36 = vld [vmem:[%s9386_s5 + $0x78] sm:$0xff] }
 0x38f   :  { %v8088_v24 = vand.u32 4294901760, %v4211_v36 }
 0x390   :  { %v8075_v30 = vpop.f32.mrf.mxu0  ;;  %v8077_v7 = vpop.f32.mrf.mxu1 }
 0x391   :  { %9985 = vst [vmem:[#allocation36_spill] sm:$0xff] %v8075_v30  ;;  %4213 = vmatpush.msrb.mxu2 %v8088_v24  ;;  %4664 = vmatpush.msra.mxu1 %v8088_v24 }
 0x392   :  { %9986 = vst [vmem:[#allocation34_spill] sm:$0xff] %v8077_v7 }
 0x393   :  { %3559 = vmatmul.f32.gmra.mxu0 %v3558_v5  ;;  %3645 = vmatmul.f32.gmra.mxu1 %v8043_v41 }
 0x395   :  { %3860 = vmatmul.f32.gmra.mxu3 %v3556_v17 }
 0x396   :  { %3747 = vmatmul.f32.gmra.mxu2 %v3555_v52  ;;  %v8096_v52 = vsub.f32 %v4211_v36, %v8088_v24 }
 0x398   :  { %v8080_v38 = vpop.f32.mrf.mxu0  ;;  %v8082_v16 = vpop.f32.mrf.mxu1  ;;  %v9606_v17 = vand.u32 4294901760, %v8096_v52  ;;  %4536 = vmatpush.msra.mxu0 %v8096_v52 }
 0x399   :  { %9987 = vst [vmem:[#allocation43_spill] sm:$0xff] %v8080_v38 }
 0x39a   :  { %9988 = vst [vmem:[#allocation33_spill] sm:$0xff] %v8082_v16  ;;  %v4376_v37 = vsub.f32 %v8096_v52, %v9606_v17  ;;  %v8172_v16 = vpop.f32.mrf.mxu3 }
 0x39b   :  { %3567 = vmatmul.f32.gmra.mxu0 %v3566_v6  ;;  %3649 = vmatmul.f32.gmra.mxu1 %v8055_v12  ;;  %9993 = vst [vmem:[#allocation44_spill] sm:$0xff] %v8172_v16 }
 0x39c   :  { %v4377_v5 = vand.u32 4294901760, %v4376_v37 }
 0x39d   :  { %3866 = vmatmul.f32.gmra.mxu3 %v3564_v4 }
 0x39e   :  { %3752 = vmatmul.f32.gmra.mxu2 %v3563_v48  ;;  %v4210_v48 = vld [vmem:[%s9386_s5 + $0x70] sm:$0xff]  ;;  %4378 = vmatpush.msrb.mxu3 %v4377_v5  ;;  %v4209_v5 = vld [vmem:[%s9386_s5 + $0x68] sm:$0xff] }
 0x39f   :  { %v8109_v4 = vand.u32 4294901760, %v4210_v48 }
 0x3a0   :  { %v8090_v9 = vpop.f32.mrf.mxu1  ;;  %v8092_v29 = vpop.f32.mrf.mxu0 }
 0x3a1   :  { %9989 = vst [vmem:[#allocation40_spill] sm:$0xff] %v8090_v9  ;;  %4215 = vmatpush.msrb.mxu2 %v8109_v4  ;;  %v8117_v36 = vsub.f32 %v4210_v48, %v8109_v4  ;;  %4666 = vmatpush.msra.mxu1 %v8109_v4  ;;  %v8130_v48 = vand.u32 4294901760, %v4209_v5 }
 0x3a2   :  { %v8205_v63 = vpop.f32.mrf.mxu3 }
 0x3a3   :  { %3653 = vmatmul.f32.gmra.mxu1 %v8067_v49  ;;  %3890 = vmatmul.f32.vlgmr.msrb.gmra.mxu0 %v7891_v2  ;;  %v9607_v37 = vand.u32 4294901760, %v8117_v36  ;;  %9995 = vst [vmem:[#allocation51_spill] sm:$0xff] %v8205_v63 }
 0x3a4   :  { %4539 = vmatpush.msra.mxu0 %v8117_v36  ;;  %4217 = vmatpush.msrb.mxu2 %v8130_v48 }
 0x3a5   :  { %v4382_v17 = vsub.f32 %v8117_v36, %v9607_v37  ;;  %4668 = vmatpush.msra.mxu1 %v8130_v48  ;;  %v8141_v37 = vsub.f32 %v4209_v5, %v8130_v48 }
 0x3a7   :  { %v4383_v47 = vand.u32 4294901760, %v4382_v17  ;;  %v9608_v17 = vand.u32 4294901760, %v8141_v37  ;;  %4542 = vmatpush.msra.mxu0 %v8141_v37 }
 0x3a8   :  { %v8111_v33 = vpop.f32.mrf.mxu0  ;;  %v8113_v6 = vpop.f32.mrf.mxu1 }
 0x3a9   :  { %4384 = vmatpush.msrb.mxu3 %v4383_v47  ;;  %v4388_v54 = vsub.f32 %v8141_v37, %v9608_v17  ;;  %v4208_v47 = vld [vmem:[%s9386_s5 + $0x60] sm:$0xff] }
 0x3aa   :  { %v8155_v5 = vand.u32 4294901760, %v4208_v47 }
 0x3ab   :  { %3894 = vmatmul.f32.gmra.mxu0 %v7905_v0  ;;  %3972 = vmatmul.f32.vlgmr.msrb.gmra.mxu1 %v7891_v2  ;;  %v4389_v9 = vand.u32 4294901760, %v4388_v54 }
 0x3ac   :  { %4219 = vmatpush.msrb.mxu2 %v8155_v5  ;;  %4670 = vmatpush.msra.mxu1 %v8155_v5  ;;  %v8166_v17 = vsub.f32 %v4208_v47, %v8155_v5 }
 0x3ad   :  { %4390 = vmatpush.msrb.mxu3 %v4389_v9  ;;  %v4207_v9 = vld [vmem:[%s9386_s5 + $0x58] sm:$0xff] }
 0x3ae   :  { %v9609_v54 = vand.u32 4294901760, %v8166_v17  ;;  %4545 = vmatpush.msra.mxu0 %v8166_v17  ;;  %v8180_v47 = vand.u32 4294901760, %v4207_v9 }
 0x3b0   :  { %v8134_v3 = vpop.f32.mrf.mxu0  ;;  %v8136_v2 = vpop.f32.mrf.mxu1  ;;  %v4394_v30 = vsub.f32 %v8166_v17, %v9609_v54  ;;  %4221 = vmatpush.msrb.mxu2 %v8180_v47  ;;  %4672 = vmatpush.msra.mxu1 %v8180_v47  ;;  %v8189_v28 = vsub.f32 %v4207_v9, %v8180_v47 }
 0x3b2   :  { %v4395_v27 = vand.u32 4294901760, %v4394_v30  ;;  %v9610_v30 = vand.u32 4294901760, %v8189_v28  ;;  %4548 = vmatpush.msra.mxu0 %v8189_v28 }
 0x3b3   :  { %3898 = vmatmul.f32.gmra.mxu0 %v7919_v46  ;;  %3976 = vmatmul.f32.gmra.mxu1 %v7905_v0  ;;  %v8163_v0 = vpop.f32.mrf.mxu2 }
 0x3b4   :  { %9992 = vst [vmem:[#allocation37_spill] sm:$0xff] %v8163_v0  ;;  %4396 = vmatpush.msrb.mxu3 %v4395_v27  ;;  %v4400_v60 = vsub.f32 %v8189_v28, %v9610_v30  ;;  %v4206_v27 = vld [vmem:[%s9386_s5 + $0x50] sm:$0xff] }
 0x3b5   :  { %v8203_v9 = vand.u32 4294901760, %v4206_v27 }
 0x3b6   :  { %v4401_v44 = vand.u32 4294901760, %v4400_v60 }
 0x3b7   :  { %4223 = vmatpush.msrb.mxu2 %v8203_v9  ;;  %4674 = vmatpush.msra.mxu1 %v8203_v9  ;;  %v8214_v30 = vsub.f32 %v4206_v27, %v8203_v9 }
 0x3b8   :  { %v8157_v38 = vpop.f32.mrf.mxu0  ;;  %v8159_v15 = vpop.f32.mrf.mxu1  ;;  %4402 = vmatpush.msrb.mxu3 %v4401_v44  ;;  %v4205_v44 = vld [vmem:[%s9386_s5 + $0x48] sm:$0xff] }
 0x3b9   :  { %v9611_v1 = vand.u32 4294901760, %v8214_v30  ;;  %4551 = vmatpush.msra.mxu0 %v8214_v30  ;;  %v8228_v27 = vand.u32 4294901760, %v4205_v44 }
 0x3bb   :  { %3902 = vmatmul.f32.gmra.mxu0 %v7930_v57  ;;  %3980 = vmatmul.f32.gmra.mxu1 %v7919_v46  ;;  %v8191_v54 = vpop.f32.mrf.mxu2  ;;  %v4406_v63 = vsub.f32 %v8214_v30, %v9611_v1  ;;  %v8239_v1 = vsub.f32 %v4205_v44, %v8228_v27 }
 0x3bc   :  { %9994 = vst [vmem:[#allocation42_spill] sm:$0xff] %v8191_v54  ;;  %4225 = vmatpush.msrb.mxu2 %v8228_v27  ;;  %4676 = vmatpush.msra.mxu1 %v8228_v27 }
 0x3bd   :  { %v4407_v59 = vand.u32 4294901760, %v4406_v63  ;;  %v9612_v63 = vand.u32 4294901760, %v8239_v1  ;;  %4554 = vmatpush.msra.mxu0 %v8239_v1 }
 0x3bf   :  { %4408 = vmatpush.msrb.mxu3 %v4407_v59  ;;  %v4412_v54 = vsub.f32 %v8239_v1, %v9612_v63 }
 0x3c0   :  { %v8182_v7 = vpop.f32.mrf.mxu0  ;;  %v8184_v46 = vpop.f32.mrf.mxu1 }
 0x3c1   :  { %v4413_v62 = vand.u32 4294901760, %v4412_v54 }
 0x3c3   :  { %3906 = vmatmul.f32.gmra.mxu0 %v7941_v19  ;;  %3984 = vmatmul.f32.gmra.mxu1 %v7930_v57  ;;  %v8220_v60 = vpop.f32.mrf.mxu2 }
 0x3c4   :  { %9998 = vst [vmem:[#allocation55_spill] sm:$0xff] %v8220_v60  ;;  %v8236_v60 = vpop.f32.mrf.mxu3  ;;  %4414 = vmatpush.msrb.mxu3 %v4413_v62  ;;  %v4203_v62 = vld [vmem:[%s9386_s5 + $0x38] sm:$0xff] }
 0x3c5   :  { %10001 = vst [vmem:[#allocation50_spill] sm:$0xff] %v8236_v60  ;;  %v4204_v60 = vld [vmem:[%s9386_s5 + $0x40] sm:$0xff] }
 0x3c6   :  { %v8251_v59 = vand.u32 4294901760, %v4204_v60 }
 0x3c8   :  { %v8207_v51 = vpop.f32.mrf.mxu0  ;;  %v8209_v57 = vpop.f32.mrf.mxu1  ;;  %4227 = vmatpush.msrb.mxu2 %v8251_v59  ;;  %4678 = vmatpush.msra.mxu1 %v8251_v59  ;;  %v8262_v63 = vsub.f32 %v4204_v60, %v8251_v59  ;;  %v8276_v60 = vand.u32 4294901760, %v4203_v62 }
 0x3c9   :  { %9996 = vst [vmem:[#allocation48_spill] sm:$0xff] %v8207_v51  ;;  %v10025_v51 = vand.u32 4294901760, %v8117_v36  ;;  %v4036_v36 = vmax.f32 %v7938_v45, -7.0  ;;  %v10029_v45 = vand.u32 4294901760, %v8214_v30 }
 0x3ca   :  { %9997 = vst [vmem:[#allocation46_spill] sm:$0xff] %v8209_v57  ;;  %v9613_v54 = vand.u32 4294901760, %v8262_v63  ;;  %4557 = vmatpush.msra.mxu0 %v8262_v63  ;;  %4229 = vmatpush.msrb.mxu2 %v8276_v60  ;;  %v10031_v30 = vand.u32 4294901760, %v8262_v63 }
 0x3cb   :  { %3910 = vmatmul.f32.gmra.mxu0 %v7952_v26  ;;  %3988 = vmatmul.f32.gmra.mxu1 %v7941_v19  ;;  %v8253_v44 = vpop.f32.mrf.mxu2 }
 0x3cc   :  { %10002 = vst [vmem:[#allocation59_spill] sm:$0xff] %v8253_v44  ;;  %v8264_v22 = vpop.f32.mrf.mxu3  ;;  %v4418_v44 = vsub.f32 %v8262_v63, %v9613_v54  ;;  %4680 = vmatpush.msra.mxu1 %v8276_v60  ;;  %v8287_v54 = vsub.f32 %v4203_v62, %v8276_v60  ;;  %v3599_v63 = vadd.f32 %v8136_v2, %v8111_v33 }
 0x3cd   :  { %10005 = vst [vmem:[#allocation54_spill] sm:$0xff] %v8264_v22 }
 0x3ce   :  { %v4419_v18 = vand.u32 4294901760, %v4418_v44  ;;  %v9614_v44 = vand.u32 4294901760, %v8287_v54  ;;  %4560 = vmatpush.msra.mxu0 %v8287_v54 }
 0x3d0   :  { %v8230_v13 = vpop.f32.mrf.mxu0  ;;  %v8232_v19 = vpop.f32.mrf.mxu1  ;;  %4420 = vmatpush.msrb.mxu3 %v4419_v18  ;;  %v4202_v18 = vld [vmem:[%s9386_s5 + $0x30] sm:$0xff] }
 0x3d1   :  { %9999 = vst [vmem:[#allocation45_spill] sm:$0xff] %v8230_v13  ;;  %v8301_v62 = vand.u32 4294901760, %v4202_v18 }
 0x3d2   :  { %10000 = vst [vmem:[#allocation52_spill] sm:$0xff] %v8232_v19 }
 0x3d3   :  { %3914 = vmatmul.f32.gmra.mxu0 %v7963_v50  ;;  %3992 = vmatmul.f32.gmra.mxu1 %v7952_v26 }
 0x3d4   :  { %4231 = vmatpush.msrb.mxu2 %v8301_v62  ;;  %4682 = vmatpush.msra.mxu1 %v8301_v62 }
 0x3d8   :  { %v8255_v16 = vpop.f32.mrf.mxu0  ;;  %v8257_v26 = vpop.f32.mrf.mxu1 }
 0x3d9   :  { %10003 = vst [vmem:[#allocation49_spill] sm:$0xff] %v8255_v16 }
 0x3da   :  { %10004 = vst [vmem:[#allocation56_spill] sm:$0xff] %v8257_v26 }
 0x3db   :  { %3918 = vmatmul.f32.gmra.mxu0 %v7974_v43  ;;  %3996 = vmatmul.f32.gmra.mxu1 %v7963_v50  ;;  %v8284_v50 = vpop.f32.mrf.mxu2 }
 0x3dc   :  { %10008 = vst [vmem:[#allocation60_spill] sm:$0xff] %v8284_v50 }
 0x3e0   :  { %v8278_v22 = vpop.f32.mrf.mxu0  ;;  %v8280_v16 = vpop.f32.mrf.mxu1 }
 0x3e1   :  { %10006 = vst [vmem:[#allocation63_spill] sm:$0xff] %v8278_v22  ;;  %v8293_v22 = vpop.f32.mrf.mxu3 }
 0x3e2   :  { %10007 = vst [vmem:[#allocation53_spill] sm:$0xff] %v8280_v16  ;;  %v4424_v16 = vsub.f32 %v8287_v54, %v9614_v44 }
 0x3e3   :  { %3922 = vmatmul.f32.gmra.mxu0 %v7985_v35  ;;  %4000 = vmatmul.f32.gmra.mxu1 %v7974_v43  ;;  %10009 = vst [vmem:[#allocation58_spill] sm:$0xff] %v8293_v22  ;;  %v8310_v22 = vsub.f32 %v4202_v18, %v8301_v62  ;;  %v8312_v44 = vpop.f32.mrf.mxu2 }
 0x3e4   :  { %v4425_v50 = vand.u32 4294901760, %v4424_v16  ;;  %10012 = vst [vmem:[#allocation64_spill] sm:$0xff] %v8312_v44 }
 0x3e5   :  { %v9615_v16 = vand.u32 4294901760, %v8310_v22  ;;  %4563 = vmatpush.msra.mxu0 %v8310_v22 }
 0x3e6   :  { %4426 = vmatpush.msrb.mxu3 %v4425_v50  ;;  %v4201_v50 = vld [vmem:[%s9386_s5 + $0x28] sm:$0xff] }
 0x3e7   :  { %v8324_v18 = vand.u32 4294901760, %v4201_v50 }
 0x3e8   :  { %v8303_v0 = vpop.f32.mrf.mxu0  ;;  %v8305_v43 = vpop.f32.mrf.mxu1 }
 0x3e9   :  { %10010 = vst [vmem:[#allocation67_spill] sm:$0xff] %v8303_v0  ;;  %v4430_v0 = vsub.f32 %v8310_v22, %v9615_v16  ;;  %4233 = vmatpush.msrb.mxu2 %v8324_v18  ;;  %4684 = vmatpush.msra.mxu1 %v8324_v18  ;;  %v8335_v16 = vsub.f32 %v4201_v50, %v8324_v18 }
 0x3ea   :  { %10011 = vst [vmem:[#allocation57_spill] sm:$0xff] %v8305_v43  ;;  %v8326_v43 = vpop.f32.mrf.mxu3 }
 0x3eb   :  { %3926 = vmatmul.f32.gmra.mxu0 %v7996_v31  ;;  %4004 = vmatmul.f32.gmra.mxu1 %v7985_v35  ;;  %10013 = vst [vmem:[#allocation62_spill] sm:$0xff] %v8326_v43  ;;  %v4431_v44 = vand.u32 4294901760, %v4430_v0  ;;  %v9616_v8 = vand.u32 4294901760, %v8335_v16  ;;  %v8341_v0 = vpop.f32.mrf.mxu2 }
 0x3ec   :  { %4566 = vmatpush.msra.mxu0 %v8335_v16  ;;  %10016 = vst [vmem:[#allocation70_spill] sm:$0xff] %v8341_v0 }
 0x3ed   :  { %4432 = vmatpush.msrb.mxu3 %v4431_v44  ;;  %v4436_v43 = vsub.f32 %v8335_v16, %v9616_v8  ;;  %v4200_v44 = vld [vmem:[%s9386_s5 + $0x20] sm:$0xff] }
 0x3ee   :  { %v8349_v50 = vand.u32 4294901760, %v4200_v44 }
 0x3f0   :  { %v8328_v34 = vpop.f32.mrf.mxu0  ;;  %v8330_v35 = vpop.f32.mrf.mxu1  ;;  %4235 = vmatpush.msrb.mxu2 %v8349_v50  ;;  %4686 = vmatpush.msra.mxu1 %v8349_v50  ;;  %v8360_v8 = vsub.f32 %v4200_v44, %v8349_v50 }
 0x3f1   :  { %10014 = vst [vmem:[#allocation61_spill] sm:$0xff] %v8328_v34  ;;  %v4437_v34 = vand.u32 4294901760, %v4436_v43 }
 0x3f2   :  { %10015 = vst [vmem:[#allocation65_spill] sm:$0xff] %v8330_v35  ;;  %v8357_v0 = vpop.f32.mrf.mxu3  ;;  %v9617_v43 = vand.u32 4294901760, %v8360_v8  ;;  %4569 = vmatpush.msra.mxu0 %v8360_v8 }
 0x3f3   :  { %3930 = vmatmul.f32.gmra.mxu0 %v8007_v39  ;;  %4008 = vmatmul.f32.gmra.mxu1 %v7996_v31  ;;  %10019 = vst [vmem:[#allocation75_spill] sm:$0xff] %v8357_v0  ;;  %v4199_v0 = vld [vmem:[%s9386_s5 + $0x18] sm:$0xff]  ;;  %v8374_v44 = vpop.f32.mrf.mxu2 }
 0x3f4   :  { %4438 = vmatpush.msrb.mxu3 %v4437_v34  ;;  %v8372_v34 = vand.u32 4294901760, %v4199_v0 }
 0x3f6   :  { %4237 = vmatpush.msrb.mxu2 %v8372_v34  ;;  %4688 = vmatpush.msra.mxu1 %v8372_v34 }
 0x3f8   :  { %v8351_v35 = vpop.f32.mrf.mxu0  ;;  %v8353_v31 = vpop.f32.mrf.mxu1 }
 0x3f9   :  { %10017 = vst [vmem:[#allocation73_spill] sm:$0xff] %v8351_v35  ;;  %v4442_v35 = vsub.f32 %v8360_v8, %v9617_v43  ;;  %v8383_v43 = vsub.f32 %v4199_v0, %v8372_v34 }
 0x3fa   :  { %10018 = vst [vmem:[#allocation77_spill] sm:$0xff] %v8353_v31  ;;  %v8385_v21 = vpop.f32.mrf.mxu3 }
 0x3fb   :  { %3934 = vmatmul.f32.gmra.mxu0 %v8019_v25  ;;  %4012 = vmatmul.f32.gmra.mxu1 %v8007_v39  ;;  %v4443_v31 = vand.u32 4294901760, %v4442_v35  ;;  %v9618_v35 = vand.u32 4294901760, %v8383_v43 }
 0x3fc   :  { %4572 = vmatpush.msra.mxu0 %v8383_v43 }
 0x3fd   :  { %4444 = vmatpush.msrb.mxu3 %v4443_v31  ;;  %v4198_v31 = vld [vmem:[%s9386_s5 + $0x10] sm:$0xff] }
 0x3fe   :  { %v8397_v0 = vand.u32 4294901760, %v4198_v31 }
 0x400   :  { %v8376_v10 = vpop.f32.mrf.mxu0  ;;  %v8378_v39 = vpop.f32.mrf.mxu1  ;;  %4239 = vmatpush.msrb.mxu2 %v8397_v0  ;;  %4690 = vmatpush.msra.mxu1 %v8397_v0  ;;  %v8411_v26 = vsub.f32 %v4198_v31, %v8397_v0 }
 0x401   :  { %10020 = vst [vmem:[#allocation81_spill] sm:$0xff] %v8376_v10  ;;  %v4448_v10 = vsub.f32 %v8383_v43, %v9618_v35  ;;  %v4197_v35 = vld [vmem:[%s9386_s5 + $0x8] sm:$0xff] }
 0x402   :  { %10021 = vst [vmem:[#allocation79_spill] sm:$0xff] %v8378_v39  ;;  %v8413_v13 = vand.u32 4294901760, %v4197_v35  ;;  %4575 = vmatpush.msra.mxu0 %v8411_v26 }
 0x403   :  { %3938 = vmatmul.f32.gmra.mxu0 %v8031_v42  ;;  %4016 = vmatmul.f32.gmra.mxu1 %v8019_v25  ;;  %v4449_v39 = vand.u32 4294901760, %v4448_v10  ;;  %v8405_v25 = vpop.f32.mrf.mxu2  ;;  %v4196_v10 = vld [vmem:[%s9386_s5] sm:$0xff] }
 0x404   :  { %4241 = vmatpush.msrb.mxu2 %v8413_v13  ;;  %v8426_v31 = vand.u32 4294901760, %v4196_v10  ;;  %4692 = vmatpush.msra.mxu1 %v8413_v13  ;;  %v3684_v33 = vadd.f32 %v8405_v25, %v3599_v63  ;;  %v3603_v25 = vadd.f32 %v8159_v15, %v8134_v3 }
 0x405   :  { %4450 = vmatpush.msrb.mxu3 %v4449_v39  ;;  %v8423_v39 = vsub.f32 %v4197_v35, %v8413_v13  ;;  %v10024_v35 = vand.u32 4294901760, %v8096_v52 }
 0x406   :  { %v8436_v20 = vsub.f32 %v4196_v10, %v8426_v31  ;;  %4243 = vmatpush.msrb.mxu2 %v8426_v31  ;;  %4694 = vmatpush.msra.mxu1 %v8426_v31 }
 0x407   :  { %v9620_v56 = vand.u32 4294901760, %v8423_v39  ;;  %4578 = vmatpush.msra.mxu0 %v8423_v39 }
 0x408   :  { %v8399_v40 = vpop.f32.mrf.mxu0  ;;  %v8401_v53 = vpop.f32.mrf.mxu1  ;;  %4795 = vmatpush.msra.mxu2 %v10024_v35  ;;  %v9621_v10 = vand.u32 4294901760, %v8436_v20 }
 0x409   :  { %10022 = vst [vmem:[#allocation85_spill] sm:$0xff] %v8399_v40  ;;  %v9619_v40 = vand.u32 4294901760, %v8411_v26  ;;  %4581 = vmatpush.msra.mxu0 %v8436_v20 }
 0x40a   :  { %10023 = vst [vmem:[#allocation83_spill] sm:$0xff] %v8401_v53  ;;  %v8428_v53 = vpop.f32.mrf.mxu3  ;;  %4799 = vmatpush.msra.mxu2 %v10025_v51  ;;  %v4466_v52 = vsub.f32 %v8436_v20, %v9621_v10 }
 0x40b   :  { %3942 = vmatmul.f32.gmra.mxu0 %v8043_v41  ;;  %4020 = vmatmul.f32.gmra.mxu1 %v8031_v42  ;;  %v4454_v42 = vsub.f32 %v8411_v26, %v9619_v40  ;;  %v4460_v40 = vsub.f32 %v8423_v39, %v9620_v56  ;;  %v8457_v35 = vpop.f32.mrf.mxu2  ;;  %v10026_v56 = vand.u32 4294901760, %v8141_v37 }
 0x40d   :  { %v4455_v19 = vand.u32 4294901760, %v4454_v42  ;;  %v4461_v57 = vand.u32 4294901760, %v4460_v40  ;;  %v4467_v42 = vand.u32 4294901760, %v4466_v52  ;;  %4803 = vmatpush.msra.mxu2 %v10026_v56  ;;  %v10027_v40 = vand.u32 4294901760, %v8166_v17 }
 0x40e   :  { %v8476_v56 = vmin.f32 %v4036_v36, 5.0  ;;  %v4037_v17 = vmax.f32 %v7949_v58, -7.0  ;;  %v10033_v58 = vand.u32 4294901760, %v8310_v22  ;;  %v10035_v22 = vand.u32 4294901760, %v8360_v8  ;;  %v10038_v36 = vld [vmem:[#allocation120_spill] sm:$0xff] }
 0x40f   :  { %4456 = vmatpush.msrb.mxu3 %v4455_v19  ;;  %4807 = vmatpush.msra.mxu2 %v10027_v40  ;;  %v10037_v8 = vand.u32 4294901760, %v8411_v26 }
 0x410   :  { %v8443_v23 = vpop.f32.mrf.mxu0  ;;  %v8445_v32 = vpop.f32.mrf.mxu1  ;;  %v8502_v52 = vmin.f32 %v4037_v17, 5.0 }
 0x411   :  { %4462 = vmatpush.msrb.mxu3 %v4461_v57 }
 0x412   :  { %v8466_v51 = vpop.f32.mrf.mxu3 }
 0x413   :  { %3946 = vmatmul.f32.gmra.mxu0 %v8055_v12  ;;  %4024 = vmatmul.f32.gmra.mxu1 %v8043_v41  ;;  %v10028_v41 = vand.u32 4294901760, %v8189_v28  ;;  %v3595_v28 = vadd.f32 %v8113_v6, %v8092_v29  ;;  %v8487_v37 = vpop.f32.mrf.mxu2 }
 0x414   :  { %4468 = vmatpush.msrb.mxu3 %v4467_v42 }
 0x415   :  { %4811 = vmatpush.msra.mxu2 %v10028_v41  ;;  %v3679_v29 = vadd.f32 %v8374_v44, %v3595_v28 }
 0x416   :  { %4922 = vmatpush.msra.mxu3 %v8088_v24  ;;  %v10030_v24 = vand.u32 4294901760, %v8239_v1  ;;  %v10032_v1 = vand.u32 4294901760, %v8287_v54  ;;  %v4085_v54 = vsub.f32 0.0, %v8502_v52 }
 0x417   :  { %4815 = vmatpush.msra.mxu2 %v10029_v45 }
 0x418   :  { %v8469_v19 = vpop.f32.mrf.mxu0  ;;  %v8471_v10 = vpop.f32.mrf.mxu1  ;;  %4924 = vmatpush.msra.mxu3 %v8109_v4  ;;  %v4084_v4 = vsub.f32 0.0, %v8476_v56  ;;  %v4102_v42 = vmul.f32 1.442695, %v4085_v54 }
 0x419   :  { %4819 = vmatpush.msra.mxu2 %v10030_v24  ;;  %v10040_v24 = vand.u32 4294901760, %v8436_v20  ;;  %v10041_v20 = vld [vmem:[#allocation126_spill] sm:$0xff] }
 0x41a   :  { %4926 = vmatpush.msra.mxu3 %v8130_v48  ;;  %v8500_v6 = vpop.f32.mrf.mxu3  ;;  %v4100_v57 = vmul.f32 1.442695, %v4084_v4 }
 0x41b   :  { %3950 = vmatmul.f32.gmra.mxu0 %v8067_v49  ;;  %4028 = vmatmul.f32.gmra.mxu1 %v8055_v12 }
 0x41c   :  { %4928 = vmatpush.msra.mxu3 %v8155_v5  ;;  %4823 = vmatpush.msra.mxu2 %v10031_v30  ;;  %v10034_v5 = vand.u32 4294901760, %v8335_v16  ;;  %5472 = vpow2.f32 %v4100_v57 }
 0x41d   :  { %5474 = vpow2.f32 %v4102_v42 }
 0x41e   :  { %4930 = vmatpush.msra.mxu3 %v8180_v47  ;;  %4827 = vmatpush.msra.mxu2 %v10032_v1  ;;  %v3778_v47 = vadd.f32 %v8385_v21, %v3679_v29  ;;  %v10036_v21 = vand.u32 4294901760, %v8383_v43  ;;  %v3784_v43 = vadd.f32 %v8428_v53, %v3684_v33  ;;  %v3689_v53 = vadd.f32 %v8457_v35, %v3603_v25 }
 0x41f   :  { %v3607_v35 = vadd.f32 %v8184_v46, %v8157_v38 }
 0x420   :  { %v8494_v12 = vpop.f32.mrf.mxu1  ;;  %v3891_v48 = vpop.f32.mrf.mxu0  ;;  %4932 = vmatpush.msra.mxu3 %v8203_v9  ;;  %4831 = vmatpush.msra.mxu2 %v10033_v58  ;;  %v4038_v9 = vmax.f32 %v7960_v55, -7.0 }
 0x421   :  { %v3694_v46 = vadd.f32 %v8487_v37, %v3607_v35  ;;  %v10043_v37 = vld [vmem:[#allocation46_spill] sm:$0xff] }
 0x422   :  { %4934 = vmatpush.msra.mxu3 %v8228_v27  ;;  %4835 = vmatpush.msra.mxu2 %v10034_v5  ;;  %v3892_v27 = vadd.f32 %v3891_v48, %v3778_v47  ;;  %v8525_v55 = vmin.f32 %v4038_v9, 5.0  ;;  %v5473_v41 = vpop.eup %5472  ;;  %v3611_v42 = vadd.f32 %v10043_v37, %v8182_v7 }
 0x423   :  { %4032 = vmatmul.f32.gmra.mxu1 %v8067_v49  ;;  %v8519_v49 = vpop.f32.mrf.mxu2  ;;  %v5475_v1 = vpop.eup %5474 }
 0x424   :  { %4936 = vmatpush.msra.mxu3 %v8251_v59  ;;  %4839 = vmatpush.msra.mxu2 %v10035_v22  ;;  %v8530_v59 = vpop.f32.mrf.mxu3  ;;  %v4086_v26 = vsub.f32 0.0, %v8525_v55  ;;  %v3699_v7 = vadd.f32 %v8519_v49, %v3611_v42  ;;  %v10046_v49 = vld [vmem:[#allocation52_spill] sm:$0xff] }
 0x426   :  { %4938 = vmatpush.msra.mxu3 %v8276_v60  ;;  %4843 = vmatpush.msra.mxu2 %v10036_v21  ;;  %v10039_v60 = vand.u32 4294901760, %v8423_v39  ;;  %v4104_v30 = vmul.f32 1.442695, %v4086_v26 }
 0x428   :  { %v3895_v16 = vpop.f32.mrf.mxu0  ;;  %v3973_v44 = vpop.f32.mrf.mxu1  ;;  %4940 = vmatpush.msra.mxu3 %v8301_v62  ;;  %4847 = vmatpush.msra.mxu2 %v10037_v8  ;;  %v4039_v62 = vmax.f32 %v7971_v11, -7.0  ;;  %5476 = vpow2.f32 %v4104_v30  ;;  %v3796_v8 = vadd.f32 %v8500_v6, %v3694_v46 }
 0x429   :  { %v3974_v2 = vadd.f32 %v3973_v44, %v3892_v27 }
 0x42a   :  { %4942 = vmatpush.msra.mxu3 %v8324_v18  ;;  %4851 = vmatpush.msra.mxu2 %v10039_v60  ;;  %v3896_v18 = vadd.f32 %v3895_v16, %v3784_v43  ;;  %v8548_v48 = vmin.f32 %v4039_v62, 5.0 }
 0x42b   :  { %v4068_v40 = vsub.f32 %v3974_v2, %v10038_v36  ;;  %v8546_v3 = vpop.f32.mrf.mxu2  ;;  %v4041_v2 = vmax.f32 %v7993_v14, -7.0 }
 0x42c   :  { %4944 = vmatpush.msra.mxu3 %v8349_v50  ;;  %4855 = vmatpush.msra.mxu2 %v10040_v24  ;;  %v8557_v29 = vpop.f32.mrf.mxu3 }
 0x42d   :  { %v4132_v45 = vmul.f32 %v5473_v41, %v4068_v40 }
 0x42e   :  { %4946 = vmatpush.msra.mxu3 %v8372_v34  ;;  %v3790_v34 = vadd.f32 %v8466_v51, %v3689_v53  ;;  %v5477_v33 = vpop.eup %5476 }
 0x42f   :  { %v4148_v28 = vmul.f32 0.5, %v4132_v45 }
 0x430   :  { %v3899_v39 = vpop.f32.mrf.mxu0  ;;  %v3977_v4 = vpop.f32.mrf.mxu1  ;;  %4948 = vmatpush.msra.mxu3 %v8397_v0  ;;  %v4087_v0 = vsub.f32 0.0, %v8548_v48 }
 0x431   :  { %v4164_v15 = vmul.f32 %v4148_v28, %v4132_v45  ;;  %v3978_v17 = vadd.f32 %v3977_v4, %v3896_v18 }
 0x432   :  { %4950 = vmatpush.msra.mxu3 %v8413_v13  ;;  %v3900_v13 = vadd.f32 %v3899_v39, %v3790_v34  ;;  %v4106_v22 = vmul.f32 1.442695, %v4087_v0  ;;  %v10044_v39 = vld [vmem:[#allocation131_spill] sm:$0xff]  ;;  %v10047_v0 = vld [vmem:[#allocation17_spill] sm:$0xff] }
 0x433   :  { %v4180_v11 = vadd.f32 %v4164_v15, %v8476_v56  ;;  %v4069_v50 = vsub.f32 %v3978_v17, %v10041_v20  ;;  %v4040_v56 = vmax.f32 %v7982_v61, -7.0  ;;  %v8569_v61 = vpop.f32.mrf.mxu2  ;;  %v10045_v20 = vld [vmem:[#allocation48_spill] sm:$0xff] }
 0x434   :  { %4952 = vmatpush.msra.mxu3 %v8426_v31  ;;  %v10042_v31 = vld [vmem:[#allocation125_spill] sm:$0xff]  ;;  %5478 = vpow2.f32 %v4106_v22  ;;  %v8580_v43 = vpop.f32.mrf.mxu3 }
 0x435   :  { %v8559_v57 = vand.u32 4294901760, %v4180_v11  ;;  %v4133_v58 = vmul.f32 %v5475_v1, %v4069_v50  ;;  %v8567_v27 = vmin.f32 %v4040_v56, 5.0  ;;  %v3615_v50 = vadd.f32 %v10046_v49, %v10045_v20 }
 0x436   :  { %v4042_v56 = vmax.f32 %v10047_v0, -7.0  ;;  %v8629_v0 = vld [vmem:[%s9382_s1 + $0x28] sm:$0xff] }
 0x437   :  { %v4245_v5 = vsub.f32 %v4180_v11, %v8559_v57  ;;  %v4149_v47 = vmul.f32 0.5, %v4133_v58  ;;  %4470 = vmatmul.f32.vlgmr.msrb.gmra.mxu3 %v8559_v57  ;;  %v4088_v60 = vsub.f32 0.0, %v8567_v27  ;;  %v3802_v11 = vadd.f32 %v8530_v59, %v3699_v7 }
 0x438   :  { %v3903_v51 = vpop.f32.mrf.mxu0  ;;  %v3981_v38 = vpop.f32.mrf.mxu1 }
 0x439   :  { %v4165_v63 = vmul.f32 %v4149_v47, %v4133_v58  ;;  %v3982_v54 = vadd.f32 %v3981_v38, %v3900_v13  ;;  %4584 = vmatmul.f32.vlgmr.msra.gmra.mxu0 %v4245_v5  ;;  %v4246_v9 = vand.u32 4294901760, %v4245_v5  ;;  %v3904_v25 = vadd.f32 %v3903_v51, %v3796_v8  ;;  %v10048_v47 = vld [vmem:[#allocation9_spill] sm:$0xff]  ;;  %v10049_v51 = vld [vmem:[#allocation24_spill] sm:$0xff] }
 0x43a   :  { %v4108_v28 = vmul.f32 1.442695, %v4088_v60  ;;  %v5479_v17 = vpop.eup %5478  ;;  %v2967_v38 = vadd.f32 %v10049_v51, %v10048_v47  ;;  %v10060_v51 = vld [vmem:[#allocation4_spill] sm:$0xff] }
 0x43b   :  { %v4070_v16 = vsub.f32 %v3982_v54, %v10042_v31  ;;  %4698 = vmatmul.f32.vlgmr.msra.gmra.mxu1 %v4246_v9  ;;  %v4247_v44 = vsub.f32 %v4245_v5, %v4246_v9  ;;  %v4181_v21 = vadd.f32 %v4165_v63, %v8502_v52  ;;  %v8584_v52 = vmin.f32 %v4041_v2, 5.0  ;;  %v8593_v1 = vpop.f32.mrf.mxu2  ;;  %v10051_v2 = vld [vmem:[#allocation7_spill] sm:$0xff] }
 0x43c   :  { %5480 = vpow2.f32 %v4108_v28  ;;  %v3704_v54 = vadd.f32 %v8546_v3, %v3615_v50  ;;  %v8603_v9 = vpop.f32.mrf.mxu3  ;;  %v10053_v3 = vld [vmem:[#allocation56_spill] sm:$0xff] }
 0x43d   :  { %v4134_v36 = vmul.f32 %v5477_v33, %v4070_v16  ;;  %v4248_v40 = vand.u32 4294901760, %v4247_v44  ;;  %v8577_v41 = vand.u32 4294901760, %v4181_v21  ;;  %v4089_v30 = vsub.f32 0.0, %v8584_v52 }
 0x43e   :  { %v8605_v44 = vmin.f32 %v4042_v56, 5.0  ;;  %v8634_v56 = vld [vmem:[%s9382_s1 + $0x10] sm:$0xff] }
 0x43f   :  { %v4150_v45 = vmul.f32 0.5, %v4134_v36  ;;  %4249 = vmatmul.f32.vlgmr.msrb.gmra.mxu2 %v4248_v40  ;;  %4474 = vmatmul.f32.gmra.mxu3 %v8577_v41  ;;  %v4253_v14 = vsub.f32 %v4181_v21, %v8577_v41  ;;  %v4110_v59 = vmul.f32 1.442695, %v4089_v30  ;;  %v10050_v21 = vld [vmem:[#allocation21_spill] sm:$0xff] }
 0x440   :  { %v3907_v6 = vpop.f32.mrf.mxu0  ;;  %v3985_v26 = vpop.f32.mrf.mxu1  ;;  %v3089_v33 = vadd.f32 %v10050_v21, %v2967_v38  ;;  %v10052_v40 = vld [vmem:[#allocation45_spill] sm:$0xff]  ;;  %v5243_v21 = vsel %vm5050_vm1, %v8634_v56, -inf }
 0x441   :  { %v4166_v62 = vmul.f32 %v4150_v45, %v4134_v36  ;;  %v3986_v24 = vadd.f32 %v3985_v26, %v3904_v25  ;;  %4589 = vmatmul.f32.gmra.mxu0 %v4253_v14  ;;  %v4254_v18 = vand.u32 4294901760, %v4253_v14  ;;  %v3908_v5 = vadd.f32 %v3907_v6, %v3802_v11  ;;  %v10054_v26 = vld [vmem:[#allocation22_spill] sm:$0xff]  ;;  %5244 = vmax.xlane.f32.xlu2 %v5243_v21 }
 0x442   :  { %v5481_v36 = vpop.eup %5480  ;;  %5482 = vpow2.f32 %v4110_v59  ;;  %v3619_v60 = vadd.f32 %v10053_v3, %v10052_v40  ;;  %v3808_v25 = vadd.f32 %v8557_v29, %v3704_v54  ;;  %v4090_v6 = vsub.f32 0.0, %v8605_v44  ;;  %v10064_v3 = vld [vmem:[#allocation14_spill] sm:$0xff] }
 0x443   :  { %v4071_v4 = vsub.f32 %v3986_v24, %v10044_v39  ;;  %4704 = vmatmul.f32.gmra.mxu1 %v4254_v18  ;;  %v4255_v53 = vsub.f32 %v4253_v14, %v4254_v18  ;;  %v4182_v15 = vadd.f32 %v4166_v62, %v8525_v55  ;;  %v4043_v62 = vmax.f32 %v10054_v26, -7.0  ;;  %v10055_v24 = vld [vmem:[#allocation16_spill] sm:$0xff]  ;;  %v10056_v18 = vld [vmem:[#allocation31_spill] sm:$0xff]  ;;  %v10057_v39 = vld [vmem:[#allocation38_spill] sm:$0xff] }
 0x444   :  { %v2972_v28 = vadd.f32 %v10056_v18, %v10055_v24  ;;  %v3709_v11 = vadd.f32 %v8569_v61, %v3619_v60  ;;  %v10059_v61 = vld [vmem:[#allocation47_spill] sm:$0xff]  ;;  %v8639_v47 = vpop.f32.mrf.mxu3  ;;  %v5246_v54 = vsel %vm5050_vm1, %v8629_v0, -inf  ;;  %v10065_v60 = vld [vmem:[#allocation28_spill] sm:$0xff] }
 0x445   :  { %v4135_v34 = vmul.f32 %v5479_v17, %v4071_v4  ;;  %v4256_v35 = vand.u32 4294901760, %v4255_v53  ;;  %v8595_v58 = vand.u32 4294901760, %v4182_v15  ;;  %v8620_v4 = vpop.f32.mrf.mxu2  ;;  %v10058_v17 = vld [vmem:[#allocation26_spill] sm:$0xff]  ;;  %5247 = vmax.xlane.f32.xlu0 %v5246_v54 }
 0x446   :  { %v3095_v30 = vadd.f32 %v10058_v17, %v2972_v28  ;;  %v8666_v17 = vld [vmem:[%s9382_s1 + $0x70] sm:$0xff] }
 0x447   :  { %v4151_v13 = vmul.f32 0.5, %v4135_v34  ;;  %4257 = vmatmul.f32.gmra.mxu2 %v4256_v35  ;;  %4478 = vmatmul.f32.gmra.mxu3 %v8595_v58  ;;  %v4261_v55 = vsub.f32 %v4182_v15, %v8595_v58 }
 0x448   :  { %v3911_v46 = vpop.f32.mrf.mxu0  ;;  %v3989_v63 = vpop.f32.mrf.mxu1 }
 0x449   :  { %v4167_v22 = vmul.f32 %v4151_v13, %v4135_v34  ;;  %v3990_v31 = vadd.f32 %v3989_v63, %v3908_v5  ;;  %4594 = vmatmul.f32.gmra.mxu0 %v4261_v55  ;;  %v4262_v16 = vand.u32 4294901760, %v4261_v55  ;;  %v3912_v53 = vadd.f32 %v3911_v46, %v3808_v25  ;;  %v5483_v5 = vpop.eup %5482 }
 0x44a   :  { %v4112_v13 = vmul.f32 1.442695, %v4090_v6  ;;  %v2977_v25 = vadd.f32 %v10065_v60, %v10064_v3  ;;  %v10066_v6 = vld [vmem:[#allocation44_spill] sm:$0xff]  ;;  %v10075_v60 = vld [vmem:[#allocation30_spill] sm:$0xff] }
 0x44b   :  { %v4072_v37 = vsub.f32 %v3990_v31, %v10051_v2  ;;  %4710 = vmatmul.f32.gmra.mxu1 %v4262_v16  ;;  %v4263_v42 = vsub.f32 %v4261_v55, %v4262_v16  ;;  %v4183_v8 = vadd.f32 %v4167_v22, %v8548_v48  ;;  %v3232_v48 = vadd.f32 %v10057_v39, %v3089_v33  ;;  %v10061_v22 = vld [vmem:[#allocation37_spill] sm:$0xff] }
 0x44c   :  { %v8636_v55 = vmin.f32 %v4043_v62, 5.0  ;;  %v3236_v31 = vadd.f32 %v10061_v22, %v3095_v30  ;;  %v3814_v16 = vadd.f32 %v8580_v43, %v3709_v11  ;;  %v10062_v33 = vld [vmem:[#allocation49_spill] sm:$0xff]  ;;  %5484 = vpow2.f32 %v4112_v13  ;;  %v8685_v22 = vpop.f32.mrf.mxu3 }
 0x44d   :  { %v4136_v45 = vmul.f32 %v5481_v36, %v4072_v37  ;;  %v4264_v14 = vand.u32 4294901760, %v4263_v42  ;;  %v8613_v7 = vand.u32 4294901760, %v4183_v8  ;;  %v3329_v59 = vadd.f32 %v10059_v61, %v3232_v48  ;;  %v10063_v2 = vld [vmem:[#allocation53_spill] sm:$0xff]  ;;  %v8661_v48 = vpop.f32.mrf.mxu2 }
 0x44e   :  { %v3623_v37 = vadd.f32 %v10063_v2, %v10062_v33  ;;  %v3333_v26 = vadd.f32 %v10066_v6, %v3236_v31  ;;  %v10067_v62 = vld [vmem:[#allocation25_spill] sm:$0xff]  ;;  %v10072_v33 = vld [vmem:[#allocation23_spill] sm:$0xff] }
 0x44f   :  { %v4152_v15 = vmul.f32 0.5, %v4136_v45  ;;  %4265 = vmatmul.f32.gmra.mxu2 %v4264_v14  ;;  %4482 = vmatmul.f32.gmra.mxu3 %v8613_v7  ;;  %v4269_v29 = vsub.f32 %v4183_v8, %v8613_v7  ;;  %v4044_v40 = vmax.f32 %v3329_v59, -7.0  ;;  %v3101_v24 = vadd.f32 %v10067_v62, %v2977_v25  ;;  %v8671_v30 = vld [vmem:[%s9382_s1 + $0x58] sm:$0xff]  ;;  %v10069_v59 = vld [vmem:[#allocation42_spill] sm:$0xff]  ;;  %v10073_v2 = vld [vmem:[#allocation35_spill] sm:$0xff] }
 0x450   :  { %v3915_v20 = vpop.f32.mrf.mxu0  ;;  %v3993_v49 = vpop.f32.mrf.mxu1  ;;  %v3714_v39 = vadd.f32 %v8593_v1, %v3623_v37  ;;  %v5255_v1 = vsel %vm5050_vm1, %v8666_v17, -inf  ;;  %v4045_v61 = vmax.f32 %v3333_v26, -7.0  ;;  %v2982_v37 = vadd.f32 %v10073_v2, %v10072_v33 }
 0x451   :  { %v4168_v50 = vmul.f32 %v4152_v15, %v4136_v45  ;;  %v3994_v34 = vadd.f32 %v3993_v49, %v3912_v53  ;;  %4599 = vmatmul.f32.gmra.mxu0 %v4269_v29  ;;  %v4270_v35 = vand.u32 4294901760, %v4269_v29  ;;  %v3916_v43 = vadd.f32 %v3915_v20, %v3814_v16  ;;  %5256 = vmax.xlane.f32.xlu0 %v5255_v1 }
 0x452   :  { %v8673_v20 = vmin.f32 %v4044_v40, 5.0  ;;  %v5252_v49 = vsel %vm5050_vm1, %v8671_v30, -inf  ;;  %v5485_v13 = vpop.eup %5484  ;;  %v3820_v54 = vadd.f32 %v8603_v9, %v3714_v39  ;;  %v10074_v40 = vld [vmem:[#allocation51_spill] sm:$0xff]  ;;  %v3107_v25 = vadd.f32 %v10075_v60, %v2982_v37  ;;  %v10080_v37 = vld [vmem:[#allocation13_spill] sm:$0xff] }
 0x453   :  { %v4073_v38 = vsub.f32 %v3994_v34, %v10060_v51  ;;  %4716 = vmatmul.f32.gmra.mxu1 %v4270_v35  ;;  %v4271_v46 = vsub.f32 %v4269_v29, %v4270_v35  ;;  %v4184_v63 = vadd.f32 %v4168_v50, %v8567_v27  ;;  %v4091_v27 = vsub.f32 0.0, %v8636_v55  ;;  %v10068_v50 = vld [vmem:[#allocation3_spill] sm:$0xff]  ;;  %5253 = vmax.xlane.f32.xlu2 %v5252_v49 }
 0x454   :  { %v3240_v51 = vadd.f32 %v10069_v59, %v3101_v24  ;;  %v8702_v24 = vld [vmem:[%s9382_s1 + $0x40] sm:$0xff] }
 0x455   :  { %v4137_v42 = vmul.f32 %v5483_v5, %v4073_v38  ;;  %v4272_v8 = vand.u32 4294901760, %v4271_v46  ;;  %v8651_v36 = vand.u32 4294901760, %v4184_v63  ;;  %v4114_v11 = vmul.f32 1.442695, %v4091_v27  ;;  %v10070_v38 = vld [vmem:[#allocation63_spill] sm:$0xff]  ;;  %v10071_v46 = vld [vmem:[#allocation57_spill] sm:$0xff] }
 0x456   :  { %v8694_v27 = vmin.f32 %v4045_v61, 5.0  ;;  %v3337_v3 = vadd.f32 %v10074_v40, %v3240_v51  ;;  %v5249_v39 = vsel %vm5050_vm1, %v8702_v24, -inf  ;;  %v10078_v51 = vld [vmem:[#allocation67_spill] sm:$0xff] }
 0x457   :  { %v4153_v45 = vmul.f32 0.5, %v4137_v42  ;;  %4273 = vmatmul.f32.gmra.mxu2 %v4272_v8  ;;  %4486 = vmatmul.f32.gmra.mxu3 %v8651_v36  ;;  %v4277_v14 = vsub.f32 %v4184_v63, %v8651_v36  ;;  %v3627_v63 = vadd.f32 %v10071_v46, %v10070_v38  ;;  %5486 = vpow2.f32 %v4114_v11  ;;  %v10076_v11 = vld [vmem:[#allocation11_spill] sm:$0xff]  ;;  %v10079_v38 = vld [vmem:[#allocation65_spill] sm:$0xff] }
 0x458   :  { %v3919_v18 = vpop.f32.mrf.mxu0  ;;  %v3997_v28 = vpop.f32.mrf.mxu1  ;;  %5250 = vmax.xlane.f32.xlu1 %v5249_v39  ;;  %v3631_v46 = vadd.f32 %v10079_v38, %v10078_v51 }
 0x459   :  { %v4169_v53 = vmul.f32 %v4153_v45, %v4137_v42  ;;  %v3998_v15 = vadd.f32 %v3997_v28, %v3916_v43  ;;  %4604 = vmatmul.f32.gmra.mxu0 %v4277_v14  ;;  %v4278_v29 = vand.u32 4294901760, %v4277_v14  ;;  %v3920_v42 = vadd.f32 %v3919_v18, %v3820_v54  ;;  %v8707_v18 = vld [vmem:[%s9382_s1 + $0xb8] sm:$0xff] }
 0x45a   :  { %v3719_v43 = vadd.f32 %v8620_v4, %v3627_v63  ;;  %v8712_v4 = vld [vmem:[%s9382_s1 + $0xa0] sm:$0xff] }
 0x45b   :  { %v4074_v34 = vsub.f32 %v3998_v15, %v10068_v50  ;;  %4722 = vmatmul.f32.gmra.mxu1 %v4278_v29  ;;  %v4279_v35 = vsub.f32 %v4277_v14, %v4278_v29  ;;  %v4185_v5 = vadd.f32 %v4169_v53, %v8584_v52  ;;  %v4092_v52 = vsub.f32 0.0, %v8673_v20  ;;  %v8720_v29 = vpop.f32.mrf.mxu2 }
 0x45c   :  { %v5264_v53 = vsel %vm5050_vm1, %v8707_v18, -inf  ;;  %v5261_v15 = vsel %vm5050_vm1, %v8712_v4, -inf  ;;  %v3826_v59 = vadd.f32 %v8639_v47, %v3719_v43 }
 0x45d   :  { %v4138_v31 = vmul.f32 %v5485_v13, %v4074_v34  ;;  %v4280_v16 = vand.u32 4294901760, %v4279_v35  ;;  %v8687_v21 = vand.u32 4294901760, %v4185_v5  ;;  %v4116_v28 = vmul.f32 1.442695, %v4092_v52  ;;  %v5487_v34 = vpop.eup %5486  ;;  %v10077_v13 = vld [vmem:[#allocation55_spill] sm:$0xff]  ;;  %5265 = vmax.xlane.f32.xlu0 %v5264_v53  ;;  %5262 = vmax.xlane.f32.xlu2 %v5261_v15 }
 0x45e   :  { %v4093_v35 = vsub.f32 0.0, %v8694_v27  ;;  %v3244_v61 = vadd.f32 %v10077_v13, %v3107_v25  ;;  %v3724_v25 = vadd.f32 %v8661_v48, %v3631_v46  ;;  %v10083_v48 = vld [vmem:[#allocation29_spill] sm:$0xff] }
 0x45f   :  { %v4154_v8 = vmul.f32 0.5, %v4138_v31  ;;  %4281 = vmatmul.f32.gmra.mxu2 %v4280_v16  ;;  %4490 = vmatmul.f32.gmra.mxu3 %v8687_v21  ;;  %v4285_v9 = vsub.f32 %v4185_v5, %v8687_v21  ;;  %v4046_v5 = vmax.f32 %v3337_v3, -7.0  ;;  %5488 = vpow2.f32 %v4116_v28  ;;  %v10086_v13 = vld [vmem:[#allocation77_spill] sm:$0xff] }
 0x460   :  { %v3923_v45 = vpop.f32.mrf.mxu0  ;;  %v4001_v14 = vpop.f32.mrf.mxu1  ;;  %v4118_v47 = vmul.f32 1.442695, %v4093_v35 }
 0x461   :  { %v4170_v6 = vmul.f32 %v4154_v8, %v4138_v31  ;;  %v4002_v26 = vadd.f32 %v4001_v14, %v3920_v42  ;;  %4609 = vmatmul.f32.gmra.mxu0 %v4285_v9  ;;  %v4286_v62 = vand.u32 4294901760, %v4285_v9  ;;  %v3924_v16 = vadd.f32 %v3923_v45, %v3826_v59  ;;  %v10081_v42 = vld [vmem:[#allocation32_spill] sm:$0xff] }
 0x462   :  { %v8735_v2 = vmin.f32 %v4046_v5, 5.0  ;;  %v2987_v8 = vadd.f32 %v10081_v42, %v10080_v37  ;;  %v10085_v5 = vld [vmem:[#allocation61_spill] sm:$0xff]  ;;  %v3832_v59 = vadd.f32 %v8685_v22, %v3724_v25  ;;  %5490 = vpow2.f32 %v4118_v47  ;;  %v10088_v42 = vld [vmem:[#allocation20_spill] sm:$0xff] }
 0x463   :  { %v4075_v1 = vsub.f32 %v4002_v26, %v10076_v11  ;;  %4728 = vmatmul.f32.gmra.mxu1 %v4286_v62  ;;  %v4287_v49 = vsub.f32 %v4285_v9, %v4286_v62  ;;  %v4186_v50 = vadd.f32 %v4170_v6, %v8605_v44  ;;  %v8731_v44 = vpop.f32.mrf.mxu3  ;;  %v10082_v9 = vld [vmem:[#allocation50_spill] sm:$0xff]  ;;  %v8744_v6 = vld [vmem:[%s9382_s1 + $0x88] sm:$0xff]  ;;  %v3733_v51 = vpop.f32.mrf.mxu2 }
 0x464   :  { %v3341_v40 = vadd.f32 %v10082_v9, %v3244_v61  ;;  %v8749_v26 = vld [vmem:[%s9382_s1 + $0x100] sm:$0xff]  ;;  %v8754_v62 = vld [vmem:[%s9382_s1 + $0xe8] sm:$0xff]  ;;  %v3113_v28 = vadd.f32 %v10083_v48, %v2987_v8  ;;  %v5258_v39 = vsel %vm5050_vm1, %v8744_v6, -inf  ;;  %v4094_v35 = vsub.f32 0.0, %v8735_v2 }
 0x465   :  { %v4139_v63 = vmul.f32 %v5487_v34, %v4075_v1  ;;  %v4288_v54 = vand.u32 4294901760, %v4287_v49  ;;  %v8729_v31 = vand.u32 4294901760, %v4186_v50  ;;  %v5273_v53 = vsel %vm5050_vm1, %v8749_v26, -inf  ;;  %v10084_v11 = vld [vmem:[#allocation2_spill] sm:$0xff]  ;;  %5259 = vmax.xlane.f32.xlu1 %v5258_v39  ;;  %v5489_v34 = vpop.eup %5488  ;;  %v10089_v8 = vld [vmem:[#allocation39_spill] sm:$0xff] }
 0x466   :  { %v5270_v15 = vsel %vm5050_vm1, %v8754_v62, -inf  ;;  %v3635_v61 = vadd.f32 %v10086_v13, %v10085_v5  ;;  %5274 = vmax.xlane.f32.xlu0 %v5273_v53  ;;  %v2992_v22 = vadd.f32 %v10089_v8, %v10088_v42  ;;  %v10090_v48 = vld [vmem:[#allocation54_spill] sm:$0xff]  ;;  %v10093_v5 = vld [vmem:[#allocation73_spill] sm:$0xff]  ;;  %v10094_v13 = vld [vmem:[#allocation79_spill] sm:$0xff] }
 0x467   :  { %v4155_v52 = vmul.f32 0.5, %v4139_v63  ;;  %4289 = vmatmul.f32.gmra.mxu2 %v4288_v54  ;;  %4494 = vmatmul.f32.gmra.mxu3 %v8729_v31  ;;  %v4293_v33 = vsub.f32 %v4186_v50, %v8729_v31  ;;  %v4047_v54 = vmax.f32 %v3341_v40, -7.0  ;;  %v10091_v39 = vld [vmem:[#allocation34_spill] sm:$0xff]  ;;  %v10097_v8 = vld [vmem:[#allocation36_spill] sm:$0xff] }
 0x468   :  { %v3927_v3 = vpop.f32.mrf.mxu0  ;;  %v4005_v60 = vpop.f32.mrf.mxu1  ;;  %5271 = vmax.xlane.f32.xlu2 %v5270_v15  ;;  %v3729_v9 = vadd.f32 %v8720_v29, %v3635_v61  ;;  %v3119_v53 = vadd.f32 %v10091_v39, %v2992_v22  ;;  %v3639_v61 = vadd.f32 %v10094_v13, %v10093_v5  ;;  %v10096_v42 = vld [vmem:[#allocation18_spill] sm:$0xff] }
 0x469   :  { %v4171_v43 = vmul.f32 %v4155_v52, %v4139_v63  ;;  %v4006_v45 = vadd.f32 %v4005_v60, %v3924_v16  ;;  %4614 = vmatmul.f32.gmra.mxu0 %v4293_v33  ;;  %v4294_v14 = vand.u32 4294901760, %v4293_v33  ;;  %v10087_v16 = vld [vmem:[#allocation59_spill] sm:$0xff]  ;;  %v3928_v52 = vadd.f32 %v3927_v3, %v3832_v59  ;;  %v8780_v3 = vld [vmem:[%s9382_s1 + $0xd0] sm:$0xff] }
 0x46a   :  { %v5267_v29 = vsel %vm5050_vm1, %v8780_v3, -inf  ;;  %v2997_v22 = vadd.f32 %v10097_v8, %v10096_v42  ;;  %v10104_v42 = vld [vmem:[#allocation27_spill] sm:$0xff] }
 0x46b   :  { %v4076_v1 = vsub.f32 %v4006_v45, %v10084_v11  ;;  %4734 = vmatmul.f32.gmra.mxu1 %v4294_v14  ;;  %v4295_v49 = vsub.f32 %v4293_v33, %v4294_v14  ;;  %v4187_v50 = vadd.f32 %v4171_v43, %v8636_v55  ;;  %v3248_v55 = vadd.f32 %v10087_v16, %v3113_v28  ;;  %v3843_v15 = vpop.f32.mrf.mxu3  ;;  %v10105_v8 = vld [vmem:[#allocation43_spill] sm:$0xff] }
 0x46c   :  { %v4120_v43 = vmul.f32 1.442695, %v4094_v35  ;;  %v8782_v14 = vmin.f32 %v4047_v54, 5.0  ;;  %v3838_v35 = vadd.f32 %v8731_v44, %v3729_v9 }
 0x46d   :  { %v4140_v38 = vmul.f32 %v5489_v34, %v4076_v1  ;;  %v4296_v46 = vand.u32 4294901760, %v4295_v49  ;;  %v8769_v63 = vand.u32 4294901760, %v4187_v50  ;;  %v3345_v28 = vadd.f32 %v10090_v48, %v3248_v55  ;;  %v10092_v1 = vld [vmem:[#allocation8_spill] sm:$0xff]  ;;  %5268 = vmax.xlane.f32.xlu1 %v5267_v29  ;;  %v5491_v34 = vpop.eup %5490 }
 0x46e   :  { %5492 = vpow2.f32 %v4120_v43  ;;  %v4095_v54 = vsub.f32 0.0, %v8782_v14 }
 0x46f   :  { %v4156_v33 = vmul.f32 0.5, %v4140_v38  ;;  %4297 = vmatmul.f32.gmra.mxu2 %v4296_v46  ;;  %4498 = vmatmul.f32.gmra.mxu3 %v8769_v63  ;;  %v4301_v37 = vsub.f32 %v4187_v50, %v8769_v63  ;;  %v4048_v16 = vmax.f32 %v3345_v28, -7.0 }
 0x470   :  { %v3931_v60 = vpop.f32.mrf.mxu0  ;;  %v4009_v25 = vpop.f32.mrf.mxu1  ;;  %v4122_v48 = vmul.f32 1.442695, %v4095_v54 }
 0x471   :  { %v4172_v45 = vmul.f32 %v4156_v33, %v4140_v38  ;;  %v4010_v47 = vadd.f32 %v4009_v25, %v3928_v52  ;;  %4619 = vmatmul.f32.gmra.mxu0 %v4301_v37  ;;  %v4302_v40 = vand.u32 4294901760, %v4301_v37  ;;  %v3738_v52 = vpop.f32.mrf.mxu2  ;;  %v3932_v33 = vadd.f32 %v3931_v60, %v3838_v35  ;;  %v10098_v60 = vld [vmem:[#allocation58_spill] sm:$0xff]  ;;  %v10101_v35 = vld [vmem:[#allocation81_spill] sm:$0xff] }
 0x472   :  { %v8801_v28 = vmin.f32 %v4048_v16, 5.0  ;;  %5494 = vpow2.f32 %v4122_v48 }
 0x473   :  { %v4188_v11 = vadd.f32 %v4172_v45, %v8673_v20  ;;  %v4077_v49 = vsub.f32 %v4010_v47, %v10092_v1  ;;  %4740 = vmatmul.f32.gmra.mxu1 %v4302_v40  ;;  %v4303_v50 = vsub.f32 %v4301_v37, %v4302_v40  ;;  %v10095_v20 = vld [vmem:[#allocation60_spill] sm:$0xff]  ;;  %v3734_v45 = vadd.f32 %v3733_v51, %v3639_v61  ;;  %v10102_v51 = vld [vmem:[#allocation83_spill] sm:$0xff]  ;;  %v3849_v13 = vpop.f32.mrf.mxu3 }
 0x474   :  { %v3252_v55 = vadd.f32 %v10095_v20, %v3119_v53  ;;  %v10099_v53 = vld [vmem:[#allocation33_spill] sm:$0xff]  ;;  %v3643_v5 = vadd.f32 %v10102_v51, %v10101_v35  ;;  %v4096_v16 = vsub.f32 0.0, %v8801_v28 }
 0x475   :  { %v4141_v59 = vmul.f32 %v5491_v34, %v4077_v49  ;;  %v4304_v38 = vand.u32 4294901760, %v4303_v50  ;;  %v8793_v46 = vand.u32 4294901760, %v4188_v11  ;;  %v3125_v29 = vadd.f32 %v10099_v53, %v2997_v22  ;;  %v5493_v34 = vpop.eup %5492  ;;  %v10107_v53 = vld [vmem:[#allocation40_spill] sm:$0xff]  ;;  %v10109_v51 = vld [vmem:[#allocation85_spill] sm:$0xff] }
 0x476   :  { %v3349_v39 = vadd.f32 %v10098_v60, %v3252_v55  ;;  %v3844_v61 = vadd.f32 %v3843_v15, %v3734_v45  ;;  %v10103_v55 = vld [vmem:[#allocation64_spill] sm:$0xff]  ;;  %v3002_v15 = vadd.f32 %v10105_v8, %v10104_v42  ;;  %v3739_v22 = vadd.f32 %v3738_v52, %v3643_v5 }
 0x477   :  { %v4157_v37 = vmul.f32 0.5, %v4141_v59  ;;  %4305 = vmatmul.f32.gmra.mxu2 %v4304_v38  ;;  %4502 = vmatmul.f32.gmra.mxu3 %v8793_v46  ;;  %v4309_v44 = vsub.f32 %v4188_v11, %v8793_v46  ;;  %v10100_v11 = vld [vmem:[#allocation6_spill] sm:$0xff]  ;;  %v4124_v48 = vmul.f32 1.442695, %v4096_v16  ;;  %v3647_v5 = vadd.f32 %v8445_v32, %v10109_v51 }
 0x478   :  { %v3935_v9 = vpop.f32.mrf.mxu0  ;;  %v4013_v25 = vpop.f32.mrf.mxu1  ;;  %v4049_v20 = vmax.f32 %v3349_v39, -7.0  ;;  %v3850_v35 = vadd.f32 %v3849_v13, %v3739_v22 }
 0x479   :  { %v4173_v43 = vmul.f32 %v4157_v37, %v4141_v59  ;;  %v4014_v47 = vadd.f32 %v4013_v25, %v3932_v33  ;;  %4624 = vmatmul.f32.gmra.mxu0 %v4309_v44  ;;  %v4310_v40 = vand.u32 4294901760, %v4309_v44  ;;  %v3936_v33 = vadd.f32 %v3935_v9, %v3844_v61  ;;  %v10106_v9 = vld [vmem:[#allocation62_spill] sm:$0xff] }
 0x47a   :  { %v8817_v60 = vmin.f32 %v4049_v20, 5.0  ;;  %5496 = vpow2.f32 %v4124_v48  ;;  %v10112_v48 = vld [vmem:[#allocation5_spill] sm:$0xff] }
 0x47b   :  { %v4189_v1 = vadd.f32 %v4173_v43, %v8694_v27  ;;  %v4078_v49 = vsub.f32 %v4014_v47, %v10100_v11  ;;  %4746 = vmatmul.f32.gmra.mxu1 %v4310_v40  ;;  %v4311_v50 = vsub.f32 %v4309_v44, %v4310_v40  ;;  %v3256_v27 = vadd.f32 %v10103_v55, %v3125_v29  ;;  %v3743_v11 = vpop.f32.mrf.mxu2  ;;  %v10110_v55 = vld [vmem:[#allocation70_spill] sm:$0xff] }
 0x47c   :  { %v3131_v29 = vadd.f32 %v10107_v53, %v3002_v15  ;;  %v4097_v16 = vsub.f32 0.0, %v8817_v60  ;;  %v3744_v42 = vadd.f32 %v3743_v11, %v3647_v5 }
 0x47d   :  { %v4142_v59 = vmul.f32 %v5493_v34, %v4078_v49  ;;  %v4312_v38 = vand.u32 4294901760, %v4311_v50  ;;  %v8809_v54 = vand.u32 4294901760, %v4189_v1  ;;  %v3353_v39 = vadd.f32 %v10106_v9, %v3256_v27  ;;  %v10108_v49 = vld [vmem:[#allocation15_spill] sm:$0xff]  ;;  %v5495_v34 = vpop.eup %5494 }
 0x47e   :  { %v3260_v27 = vadd.f32 %v10110_v55, %v3131_v29  ;;  %v3651_v29 = vadd.f32 %v8471_v10, %v8443_v23 }
 0x47f   :  { %v4158_v37 = vmul.f32 0.5, %v4142_v59  ;;  %4313 = vmatmul.f32.gmra.mxu2 %v4312_v38  ;;  %4506 = vmatmul.f32.gmra.mxu3 %v8809_v54  ;;  %v4317_v44 = vsub.f32 %v4189_v1, %v8809_v54  ;;  %v4050_v20 = vmax.f32 %v3353_v39, -7.0 }
 0x480   :  { %v3939_v25 = vpop.f32.mrf.mxu0  ;;  %v4017_v45 = vpop.f32.mrf.mxu1 }
 0x481   :  { %v4174_v43 = vmul.f32 %v4158_v37, %v4142_v59  ;;  %v4018_v47 = vadd.f32 %v4017_v45, %v3936_v33  ;;  %4629 = vmatmul.f32.gmra.mxu0 %v4317_v44  ;;  %v4318_v40 = vand.u32 4294901760, %v4317_v44  ;;  %v3940_v33 = vadd.f32 %v3939_v25, %v3850_v35  ;;  %v5497_v53 = vpop.eup %5496 }
 0x482   :  { %v4126_v45 = vmul.f32 1.442695, %v4097_v16 }
 0x483   :  { %v4190_v1 = vadd.f32 %v4174_v43, %v8735_v2  ;;  %v4079_v50 = vsub.f32 %v4018_v47, %v10108_v49  ;;  %4752 = vmatmul.f32.gmra.mxu1 %v4318_v40  ;;  %v4319_v52 = vsub.f32 %v4317_v44, %v4318_v40  ;;  %v3855_v2 = vpop.f32.mrf.mxu3  ;;  %v8831_v43 = vmin.f32 %v4050_v20, 5.0  ;;  %v10111_v47 = vld [vmem:[#allocation75_spill] sm:$0xff]  ;;  %v3748_v11 = vpop.f32.mrf.mxu2 }
 0x484   :  { %v3357_v40 = vadd.f32 %v10111_v47, %v3260_v27  ;;  %5498 = vpow2.f32 %v4126_v45 }
 0x485   :  { %v4143_v61 = vmul.f32 %v5495_v34, %v4079_v50  ;;  %v4320_v59 = vand.u32 4294901760, %v4319_v52  ;;  %v8825_v38 = vand.u32 4294901760, %v4190_v1  ;;  %v4098_v34 = vsub.f32 0.0, %v8831_v43 }
 0x486   :  { %v4051_v35 = vmax.f32 %v3357_v40, -7.0 }
 0x487   :  { %v4159_v37 = vmul.f32 0.5, %v4143_v61  ;;  %4321 = vmatmul.f32.gmra.mxu2 %v4320_v59  ;;  %4510 = vmatmul.f32.gmra.mxu3 %v8825_v38  ;;  %v4325_v13 = vsub.f32 %v4190_v1, %v8825_v38  ;;  %v3856_v1 = vadd.f32 %v3855_v2, %v3744_v42  ;;  %v4128_v55 = vmul.f32 1.442695, %v4098_v34 }
 0x488   :  { %v3943_v44 = vpop.f32.mrf.mxu0  ;;  %v4021_v32 = vpop.f32.mrf.mxu1  ;;  %v8843_v27 = vmin.f32 %v4051_v35, 5.0 }
 0x489   :  { %v4175_v8 = vmul.f32 %v4159_v37, %v4143_v61  ;;  %v4022_v15 = vadd.f32 %v4021_v32, %v3940_v33  ;;  %4634 = vmatmul.f32.gmra.mxu0 %v4325_v13  ;;  %v4326_v22 = vand.u32 4294901760, %v4325_v13  ;;  %v3944_v51 = vadd.f32 %v3943_v44, %v3856_v1  ;;  %v10113_v37 = vld [vmem:[#allocation12_spill] sm:$0xff] }
 0x48a   :  { %v3749_v61 = vadd.f32 %v3748_v11, %v3651_v29  ;;  %v5499_v32 = vpop.eup %5498  ;;  %5500 = vpow2.f32 %v4128_v55  ;;  %v4099_v47 = vsub.f32 0.0, %v8843_v27 }
 0x48b   :  { %v4191_v25 = vadd.f32 %v4175_v8, %v8782_v14  ;;  %v4080_v9 = vsub.f32 %v4022_v15, %v10112_v48  ;;  %4758 = vmatmul.f32.gmra.mxu1 %v4326_v22  ;;  %v4327_v39 = vsub.f32 %v4325_v13, %v4326_v22  ;;  %v3861_v59 = vpop.f32.mrf.mxu3  ;;  %v3655_v8 = vadd.f32 %v8494_v12, %v8469_v19  ;;  %v3753_v40 = vpop.f32.mrf.mxu2 }
 0x48c   :  { %v3862_v42 = vadd.f32 %v3861_v59, %v3749_v61  ;;  %v4130_v12 = vmul.f32 1.442695, %v4099_v47 }
 0x48d   :  { %v4144_v49 = vmul.f32 %v5497_v53, %v4080_v9  ;;  %v4328_v50 = vand.u32 4294901760, %v4327_v39  ;;  %v8838_v52 = vand.u32 4294901760, %v4191_v25  ;;  %v3754_v39 = vadd.f32 %v3753_v40, %v3655_v8 }
 0x48e   :  { %5502 = vpow2.f32 %v4130_v12 }
 0x48f   :  { %v4160_v14 = vmul.f32 0.5, %v4144_v49  ;;  %4329 = vmatmul.f32.gmra.mxu2 %v4328_v50  ;;  %4514 = vmatmul.f32.gmra.mxu3 %v8838_v52  ;;  %v4333_v5 = vsub.f32 %v4191_v25, %v8838_v52 }
 0x490   :  { %v4025_v23 = vpop.f32.mrf.mxu1  ;;  %v3947_v2 = vpop.f32.mrf.mxu0 }
 0x491   :  { %v4176_v10 = vmul.f32 %v4160_v14, %v4144_v49  ;;  %v4026_v16 = vadd.f32 %v4025_v23, %v3944_v51  ;;  %4639 = vmatmul.f32.gmra.mxu0 %v4333_v5  ;;  %v4334_v20 = vand.u32 4294901760, %v4333_v5  ;;  %v3948_v25 = vadd.f32 %v3947_v2, %v3862_v42  ;;  %v10114_v49 = vld [vmem:[#allocation10_spill] sm:$0xff]  ;;  %v5501_v35 = vpop.eup %5500 }
 0x493   :  { %v4192_v33 = vadd.f32 %v4176_v10, %v8801_v28  ;;  %v4081_v13 = vsub.f32 %v4026_v16, %v10113_v37  ;;  %4764 = vmatmul.f32.gmra.mxu1 %v4334_v20  ;;  %v4335_v44 = vsub.f32 %v4333_v5, %v4334_v20  ;;  %v3867_v11 = vpop.f32.mrf.mxu3  ;;  %v10115_v37 = vld [vmem:[#allocation19_spill] sm:$0xff] }
 0x494   :  { %v3868_v14 = vadd.f32 %v3867_v11, %v3754_v39 }
 0x495   :  { %v4145_v15 = vmul.f32 %v5499_v32, %v4081_v13  ;;  %v4336_v22 = vand.u32 4294901760, %v4335_v44  ;;  %v8849_v45 = vand.u32 4294901760, %v4192_v33  ;;  %v5503_v32 = vpop.eup %5502 }
 0x497   :  { %v4161_v48 = vmul.f32 0.5, %v4145_v15  ;;  %4337 = vmatmul.f32.gmra.mxu2 %v4336_v22  ;;  %4518 = vmatmul.f32.gmra.mxu3 %v8849_v45  ;;  %v4341_v28 = vsub.f32 %v4192_v33, %v8849_v45 }
 0x498   :  { %v4029_v9 = vpop.f32.mrf.mxu1  ;;  %v3951_v51 = vpop.f32.mrf.mxu0 }
 0x499   :  { %v4177_v53 = vmul.f32 %v4161_v48, %v4145_v15  ;;  %v4030_v29 = vadd.f32 %v4029_v9, %v3948_v25  ;;  %4644 = vmatmul.f32.gmra.mxu0 %v4341_v28  ;;  %v4342_v19 = vand.u32 4294901760, %v4341_v28  ;;  %v3952_v23 = vadd.f32 %v3951_v51, %v3868_v14 }
 0x49b   :  { %v4193_v1 = vadd.f32 %v4177_v53, %v8817_v60  ;;  %v4082_v50 = vsub.f32 %v4030_v29, %v10114_v49  ;;  %4770 = vmatmul.f32.gmra.mxu1 %v4342_v19  ;;  %v4343_v34 = vsub.f32 %v4341_v28, %v4342_v19 }
 0x49d   :  { %v4146_v5 = vmul.f32 %v5501_v35, %v4082_v50  ;;  %v4344_v61 = vand.u32 4294901760, %v4343_v34  ;;  %v8856_v59 = vand.u32 4294901760, %v4193_v1 }
 0x49f   :  { %v4162_v10 = vmul.f32 0.5, %v4146_v5  ;;  %4345 = vmatmul.f32.gmra.mxu2 %v4344_v61  ;;  %4522 = vmatmul.f32.gmra.mxu3 %v8856_v59  ;;  %v4349_v16 = vsub.f32 %v4193_v1, %v8856_v59 }
 0x4a0   :  { %v4033_v60 = vpop.f32.mrf.mxu1 }
 0x4a1   :  { %v4178_v20 = vmul.f32 %v4162_v10, %v4146_v5  ;;  %v4034_v55 = vadd.f32 %v4033_v60, %v3952_v23  ;;  %4649 = vmatmul.f32.gmra.mxu0 %v4349_v16  ;;  %v4350_v2 = vand.u32 4294901760, %v4349_v16  ;;  %v8896_v5 = vld [vmem:[%s9382_s1 + $0x160] sm:$0xff] }
 0x4a3   :  { %v4194_v33 = vadd.f32 %v4178_v20, %v8831_v43  ;;  %v4083_v13 = vsub.f32 %v4034_v55, %v10115_v37  ;;  %4776 = vmatmul.f32.gmra.mxu1 %v4350_v2  ;;  %v4351_v44 = vsub.f32 %v4349_v16, %v4350_v2 }
 0x4a5   :  { %v4147_v42 = vmul.f32 %v5503_v32, %v4083_v13  ;;  %v4352_v8 = vand.u32 4294901760, %v4351_v44  ;;  %v8862_v15 = vand.u32 4294901760, %v4194_v33  ;;  %v8922_v13 = vld [vmem:[%s9382_s1 + $0x130] sm:$0xff] }
 0x4a7   :  { %v4163_v22 = vmul.f32 0.5, %v4147_v42  ;;  %4353 = vmatmul.f32.gmra.mxu2 %v4352_v8  ;;  %4526 = vmatmul.f32.gmra.mxu3 %v8862_v15  ;;  %v4357_v47 = vsub.f32 %v4194_v33, %v8862_v15  ;;  %v5279_v8 = vsel %vm5050_vm1, %v8922_v13, -inf }
 0x4a8   :  { %5280 = vmax.xlane.f32.xlu2 %v5279_v8 }
 0x4a9   :  { %v4179_v40 = vmul.f32 %v4163_v22, %v4147_v42  ;;  %4654 = vmatmul.f32.gmra.mxu0 %v4357_v47  ;;  %v4358_v25 = vand.u32 4294901760, %v4357_v47 }
 0x4ab   :  { %v4195_v43 = vadd.f32 %v4179_v40, %v8843_v27  ;;  %4782 = vmatmul.f32.gmra.mxu1 %v4358_v25  ;;  %v4359_v48 = vsub.f32 %v4357_v47, %v4358_v25  ;;  %v8877_v27 = vld [vmem:[%s9382_s1 + $0x118] sm:$0xff] }
 0x4ac   :  { %v5276_v49 = vsel %vm5050_vm1, %v8877_v27, -inf }
 0x4ad   :  { %v4360_v28 = vand.u32 4294901760, %v4359_v48  ;;  %v8867_v9 = vand.u32 4294901760, %v4195_v43  ;;  %5277 = vmax.xlane.f32.xlu1 %v5276_v49 }
 0x4af   :  { %4361 = vmatmul.f32.gmra.mxu2 %v4360_v28  ;;  %4530 = vmatmul.f32.gmra.mxu3 %v8867_v9  ;;  %v4365_v39 = vsub.f32 %v4195_v43, %v8867_v9 }
 0x4b1   :  { %4659 = vmatmul.f32.gmra.mxu0 %v4365_v39  ;;  %v4366_v53 = vand.u32 4294901760, %v4365_v39 }
 0x4b3   :  { %4788 = vmatmul.f32.gmra.mxu1 %v4366_v53  ;;  %v4367_v29 = vsub.f32 %v4365_v39, %v4366_v53 }
 0x4b4   :  { %v8889_v51 = vpop.xlane.xlu2 %5244 }
 0x4b5   :  { %v4368_v19 = vand.u32 4294901760, %v4367_v29  ;;  %v5291_v14 = vsub.f32 %v8634_v56, %v8889_v51 }
 0x4b7   :  { %4369 = vmatmul.f32.gmra.mxu2 %v4368_v19  ;;  %4954 = vmatmul.f32.vlgmr.msra.gmra.mxu3 %v8559_v57  ;;  %v5307_v60 = vmul.f32 1.442695, %v5291_v14 }
 0x4ba   :  { %v4471_v12 = vpop.f32.mrf.mxu3 }
 0x4bf   :  { %4857 = vmatmul.f32.vlgmr.msra.gmra.mxu2 %v8559_v57  ;;  %4958 = vmatmul.f32.gmra.mxu3 %v8577_v41  ;;  %v8885_v57 = vpop.xlane.xlu0 %5247 }
 0x4c0   :  { %v5292_v35 = vsub.f32 %v8629_v0, %v8885_v57  ;;  %v5285_v0 = vsel %vm5050_vm1, %v8896_v5, -inf }
 0x4c1   :  { %5286 = vmax.xlane.f32.xlu1 %v5285_v0 }
 0x4c2   :  { %v4250_v11 = vpop.f32.mrf.mxu2  ;;  %v4475_v1 = vpop.f32.mrf.mxu3  ;;  %v5309_v10 = vmul.f32 1.442695, %v5292_v35 }
 0x4c3   :  { %v4251_v50 = vadd.f32 7.351508, %v4250_v11 }
 0x4c4   :  { %5504 = vpow2.f32 %v5309_v10 }
 0x4c5   :  { %v8881_v34 = vadd.f32 %v4471_v12, %v4251_v50  ;;  %5506 = vpow2.f32 %v5307_v60 }
 0x4c6   :  { %v8915_v33 = vpop.xlane.xlu2 %5253 }
 0x4c7   :  { %4861 = vmatmul.f32.gmra.mxu2 %v8577_v41  ;;  %4962 = vmatmul.f32.gmra.mxu3 %v8595_v58  ;;  %v8901_v41 = vld [vmem:[%s9382_s1 + $0x148] sm:$0xff]  ;;  %v8911_v55 = vpop.xlane.xlu0 %5256  ;;  %v5294_v37 = vsub.f32 %v8671_v30, %v8915_v33 }
 0x4c8   :  { %v5282_v16 = vsel %vm5050_vm1, %v8901_v41, -inf  ;;  %v5295_v2 = vsub.f32 %v8666_v17, %v8911_v55 }
 0x4c9   :  { %5283 = vmax.xlane.f32.xlu0 %v5282_v16  ;;  %v5313_v17 = vmul.f32 1.442695, %v5294_v37 }
 0x4ca   :  { %v4258_v61 = vpop.f32.mrf.mxu2  ;;  %v4479_v23 = vpop.f32.mrf.mxu3  ;;  %v5315_v42 = vmul.f32 1.442695, %v5295_v2 }
 0x4cb   :  { %v4259_v56 = vadd.f32 7.351508, %v4258_v61  ;;  %v5505_v44 = vpop.eup %5504  ;;  %v8930_v43 = vpop.xlane.xlu1 %5250 }
 0x4cc   :  { %v5507_v22 = vpop.eup %5506  ;;  %v5342_v40 = vsel %vm5050_vm1, %v5505_v44, 0.0  ;;  %5508 = vpow2.f32 %v5315_v42  ;;  %v5293_v48 = vsub.f32 %v8702_v24, %v8930_v43 }
 0x4cd   :  { %v8907_v20 = vadd.f32 %v4475_v1, %v4259_v56  ;;  %5343 = vadd.xlane.f32.xlu1 %v5342_v40  ;;  %v5339_v30 = vsel %vm5050_vm1, %v5507_v22, 0.0  ;;  %5510 = vpow2.f32 %v5313_v17 }
 0x4ce   :  { %v5311_v29 = vmul.f32 1.442695, %v5293_v48 }
 0x4cf   :  { %4865 = vmatmul.f32.gmra.mxu2 %v8595_v58  ;;  %4966 = vmatmul.f32.gmra.mxu3 %v8613_v7 }
 0x4d0   :  { %v8936_v28 = vpop.xlane.xlu0 %5265  ;;  %v8940_v53 = vpop.xlane.xlu2 %5262  ;;  %5512 = vpow2.f32 %v5311_v29 }
 0x4d1   :  { %5340 = vadd.xlane.f32.xlu0 %v5339_v30  ;;  %v5298_v39 = vsub.f32 %v8707_v18, %v8936_v28  ;;  %v5297_v19 = vsub.f32 %v8712_v4, %v8940_v53 }
 0x4d2   :  { %v4266_v32 = vpop.f32.mrf.mxu2  ;;  %v4483_v58 = vpop.f32.mrf.mxu3 }
 0x4d3   :  { %v4267_v47 = vadd.f32 7.351508, %v4266_v32  ;;  %v5509_v12 = vpop.eup %5508  ;;  %v5321_v24 = vmul.f32 1.442695, %v5298_v39  ;;  %v5319_v35 = vmul.f32 1.442695, %v5297_v19 }
 0x4d4   :  { %v5511_v50 = vpop.eup %5510  ;;  %v5351_v14 = vsel %vm5050_vm1, %v5509_v12, 0.0 }
 0x4d5   :  { %v8928_v25 = vadd.f32 %v4479_v23, %v4267_v47  ;;  %5514 = vpow2.f32 %v5321_v24  ;;  %5352 = vadd.xlane.f32.xlu1 %v5351_v14  ;;  %v5348_v4 = vsel %vm5050_vm1, %v5511_v50, 0.0 }
 0x4d6   :  { %5516 = vpow2.f32 %v5319_v35  ;;  %v5513_v60 = vpop.eup %5512 }
 0x4d7   :  { %4869 = vmatmul.f32.gmra.mxu2 %v8613_v7  ;;  %4970 = vmatmul.f32.gmra.mxu3 %v8651_v36  ;;  %v8947_v7 = vld [vmem:[%s9382_s1 + $0x178] sm:$0xff]  ;;  %v5345_v42 = vsel %vm5050_vm1, %v5513_v60, 0.0 }
 0x4d8   :  { %v5288_v49 = vsel %vm5050_vm1, %v8947_v7, -inf  ;;  %v8955_v23 = vpop.xlane.xlu1 %5259 }
 0x4d9   :  { %5289 = vmax.xlane.f32.xlu2 %v5288_v49  ;;  %5349 = vadd.xlane.f32.xlu0 %v5348_v4  ;;  %v5296_v10 = vsub.f32 %v8744_v6, %v8955_v23  ;;  %v8961_v0 = vpop.xlane.xlu0 %5274 }
 0x4da   :  { %v4274_v11 = vpop.f32.mrf.mxu2  ;;  %v4487_v1 = vpop.f32.mrf.mxu3  ;;  %v5301_v16 = vsub.f32 %v8749_v26, %v8961_v0 }
 0x4db   :  { %v4275_v18 = vadd.f32 7.351508, %v4274_v11  ;;  %v8965_v56 = vpop.xlane.xlu2 %5271  ;;  %v5317_v2 = vmul.f32 1.442695, %v5296_v10  ;;  %v5515_v44 = vpop.eup %5514 }
 0x4dc   :  { %v5300_v37 = vsub.f32 %v8754_v62, %v8965_v56  ;;  %v5517_v8 = vpop.eup %5516  ;;  %v5360_v47 = vsel %vm5050_vm1, %v5515_v44, 0.0 }
 0x4dd   :  { %v8953_v61 = vadd.f32 %v4483_v58, %v4275_v18  ;;  %v5327_v58 = vmul.f32 1.442695, %v5301_v16  ;;  %5518 = vpow2.f32 %v5317_v2  ;;  %5361 = vadd.xlane.f32.xlu1 %v5360_v47  ;;  %v5357_v26 = vsel %vm5050_vm1, %v5517_v8, 0.0 }
 0x4de   :  { %v5325_v22 = vmul.f32 1.442695, %v5300_v37 }
 0x4df   :  { %4873 = vmatmul.f32.gmra.mxu2 %v8651_v36  ;;  %4974 = vmatmul.f32.gmra.mxu3 %v8687_v21  ;;  %5520 = vpow2.f32 %v5327_v58 }
 0x4e0   :  { %5522 = vpow2.f32 %v5325_v22  ;;  %v8974_v62 = vpop.xlane.xlu1 %5268 }
 0x4e1   :  { %5346 = vadd.xlane.f32.xlu2 %v5345_v42  ;;  %5358 = vadd.xlane.f32.xlu0 %v5357_v26  ;;  %v5299_v40 = vsub.f32 %v8780_v3, %v8974_v62 }
 0x4e2   :  { %v4282_v32 = vpop.f32.mrf.mxu2  ;;  %v4491_v36 = vpop.f32.mrf.mxu3 }
 0x4e3   :  { %v4283_v6 = vadd.f32 7.351508, %v4282_v32  ;;  %v5519_v30 = vpop.eup %5518  ;;  %v5323_v48 = vmul.f32 1.442695, %v5299_v40 }
 0x4e4   :  { %v5354_v12 = vsel %vm5050_vm1, %v5519_v30, 0.0  ;;  %v4585_v30 = vpop.f32.mrf.mxu0 }
 0x4e5   :  { %v8972_v17 = vadd.f32 %v4487_v1, %v4283_v6  ;;  %v5521_v39 = vpop.eup %5520  ;;  %5524 = vpow2.f32 %v5323_v48 }
 0x4e6   :  { %v5523_v11 = vpop.eup %5522  ;;  %v5369_v24 = vsel %vm5050_vm1, %v5521_v39, 0.0 }
 0x4e7   :  { %4877 = vmatmul.f32.gmra.mxu2 %v8687_v21  ;;  %4978 = vmatmul.f32.gmra.mxu3 %v8729_v31  ;;  %v5366_v21 = vsel %vm5050_vm1, %v5523_v11, 0.0 }
 0x4e8   :  { %5370 = vadd.xlane.f32.xlu1 %v5369_v24 }
 0x4e9   :  { %5355 = vadd.xlane.f32.xlu2 %v5354_v12  ;;  %5367 = vadd.xlane.f32.xlu0 %v5366_v21 }
 0x4ea   :  { %v4290_v29 = vpop.f32.mrf.mxu2  ;;  %v4495_v19 = vpop.f32.mrf.mxu3 }
 0x4eb   :  { %v4291_v1 = vadd.f32 7.351508, %v4290_v29  ;;  %v5525_v50 = vpop.eup %5524 }
 0x4ec   :  { %v5363_v14 = vsel %vm5050_vm1, %v5525_v50, 0.0  ;;  %v4590_v11 = vpop.f32.mrf.mxu0 }
 0x4ed   :  { %v8983_v49 = vadd.f32 %v4491_v36, %v4291_v1 }
 0x4ef   :  { %4881 = vmatmul.f32.gmra.mxu2 %v8729_v31  ;;  %4982 = vmatmul.f32.gmra.mxu3 %v8769_v63 }
 0x4f1   :  { %5364 = vadd.xlane.f32.xlu2 %v5363_v14 }
 0x4f2   :  { %v4298_v18 = vpop.f32.mrf.mxu2  ;;  %v4499_v35 = vpop.f32.mrf.mxu3 }
 0x4f3   :  { %v4299_v4 = vadd.f32 7.351508, %v4298_v18 }
 0x4f5   :  { %v8988_v10 = vadd.f32 %v4495_v19, %v4299_v4 }
 0x4f7   :  { %4885 = vmatmul.f32.gmra.mxu2 %v8769_v63  ;;  %4986 = vmatmul.f32.gmra.mxu3 %v8793_v46 }
 0x4fa   :  { %v4306_v16 = vpop.f32.mrf.mxu2  ;;  %v4503_v60 = vpop.f32.mrf.mxu3 }
 0x4fb   :  { %v4307_v2 = vadd.f32 7.351508, %v4306_v16 }
 0x4fd   :  { %v8992_v37 = vadd.f32 %v4499_v35, %v4307_v2 }
 0x4ff   :  { %4889 = vmatmul.f32.gmra.mxu2 %v8793_v46  ;;  %4990 = vmatmul.f32.gmra.mxu3 %v8809_v54 }
 0x502   :  { %v4314_v31 = vpop.f32.mrf.mxu2  ;;  %v4507_v44 = vpop.f32.mrf.mxu3 }
 0x503   :  { %v4315_v32 = vadd.f32 7.351508, %v4314_v31 }
 0x505   :  { %v8996_v36 = vadd.f32 %v4503_v60, %v4315_v32  ;;  %v4586_v32 = vadd.f32 %v4585_v30, %v8881_v34 }
 0x507   :  { %4893 = vmatmul.f32.gmra.mxu2 %v8809_v54  ;;  %4994 = vmatmul.f32.gmra.mxu3 %v8825_v38 }
 0x50a   :  { %v4322_v63 = vpop.f32.mrf.mxu2  ;;  %v4511_v58 = vpop.f32.mrf.mxu3 }
 0x50b   :  { %v4323_v42 = vadd.f32 7.351508, %v4322_v63 }
 0x50d   :  { %v9000_v8 = vadd.f32 %v4507_v44, %v4323_v42 }
 0x50f   :  { %4897 = vmatmul.f32.gmra.mxu2 %v8825_v38  ;;  %4998 = vmatmul.f32.gmra.mxu3 %v8838_v52  ;;  %v4699_v38 = vpop.f32.mrf.mxu1 }
 0x510   :  { %v4700_v63 = vadd.f32 %v4699_v38, %v4586_v32 }
 0x512   :  { %v4330_v46 = vpop.f32.mrf.mxu2  ;;  %v4515_v6 = vpop.f32.mrf.mxu3 }
 0x513   :  { %v4331_v22 = vadd.f32 7.351508, %v4330_v46 }
 0x515   :  { %v9004_v47 = vadd.f32 %v4511_v58, %v4331_v22 }
 0x517   :  { %4901 = vmatmul.f32.gmra.mxu2 %v8838_v52  ;;  %5002 = vmatmul.f32.gmra.mxu3 %v8849_v45  ;;  %v4705_v24 = vpop.f32.mrf.mxu1 }
 0x51a   :  { %v4338_v54 = vpop.f32.mrf.mxu2  ;;  %v4519_v26 = vpop.f32.mrf.mxu3 }
 0x51b   :  { %v4339_v40 = vadd.f32 7.351508, %v4338_v54  ;;  %v4591_v54 = vadd.f32 %v4590_v11, %v8907_v20 }
 0x51d   :  { %v9008_v48 = vadd.f32 %v4515_v6, %v4339_v40 }
 0x51f   :  { %4905 = vmatmul.f32.gmra.mxu2 %v8849_v45  ;;  %5006 = vmatmul.f32.gmra.mxu3 %v8856_v59  ;;  %v4595_v45 = vpop.f32.mrf.mxu0  ;;  %v4711_v4 = vpop.f32.mrf.mxu1 }
 0x522   :  { %v4346_v39 = vpop.f32.mrf.mxu2  ;;  %v4523_v29 = vpop.f32.mrf.mxu3 }
 0x523   :  { %v4347_v19 = vadd.f32 7.351508, %v4346_v39  ;;  %v5632_v39 = vld [vmem:[%s9382_s1 + $0x10] sm:$0xff] }
 0x525   :  { %v9012_v12 = vadd.f32 %v4519_v26, %v4347_v19 }
 0x527   :  { %4909 = vmatmul.f32.gmra.mxu2 %v8856_v59  ;;  %5010 = vmatmul.f32.gmra.mxu3 %v8862_v15  ;;  %v4600_v2 = vpop.f32.mrf.mxu0 }
 0x52a   :  { %v4354_v52 = vpop.f32.mrf.mxu2  ;;  %v4527_v1 = vpop.f32.mrf.mxu3 }
 0x52b   :  { %v4355_v21 = vadd.f32 7.351508, %v4354_v52 }
 0x52d   :  { %v9016_v50 = vadd.f32 %v4523_v29, %v4355_v21 }
 0x52f   :  { %4913 = vmatmul.f32.gmra.mxu2 %v8862_v15  ;;  %5014 = vmatmul.f32.gmra.mxu3 %v8867_v9  ;;  %v4717_v15 = vpop.f32.mrf.mxu1  ;;  %v4605_v6 = vpop.f32.mrf.mxu0 }
 0x532   :  { %v4362_v18 = vpop.f32.mrf.mxu2  ;;  %v4531_v35 = vpop.f32.mrf.mxu3 }
 0x533   :  { %v4363_v14 = vadd.f32 7.351508, %v4362_v18 }
 0x535   :  { %v9020_v16 = vadd.f32 %v4527_v1, %v4363_v14  ;;  %v4596_v1 = vadd.f32 %v4595_v45, %v8928_v25  ;;  %v4601_v25 = vadd.f32 %v4600_v2, %v8953_v61  ;;  %v4606_v61 = vadd.f32 %v4605_v6, %v8972_v17 }
 0x537   :  { %4917 = vmatmul.f32.gmra.mxu2 %v8867_v9  ;;  %v4723_v40 = vpop.f32.mrf.mxu1  ;;  %v4706_v9 = vadd.f32 %v4705_v24, %v4591_v54  ;;  %v4610_v20 = vpop.f32.mrf.mxu0  ;;  %v4712_v21 = vadd.f32 %v4711_v4, %v4596_v1  ;;  %v5633_v24 = vld [vmem:[%s9382_s1 + $0x28] sm:$0xff]  ;;  %v4718_v4 = vadd.f32 %v4717_v15, %v4601_v25  ;;  %v5635_v15 = vld [vmem:[%s9382_s1 + $0x58] sm:$0xff] }
 0x53a   :  { %v4370_v59 = vpop.f32.mrf.mxu2  ;;  %v4955_v60 = vpop.f32.mrf.mxu3 }
 0x53b   :  { %v4371_v31 = vadd.f32 7.351508, %v4370_v59 }
 0x53d   :  { %v9023_v44 = vadd.f32 %v4531_v35, %v4371_v31 }
 0x53f   :  { %v4729_v59 = vpop.f32.mrf.mxu1 }
 0x542   :  { %v4858_v58 = vpop.f32.mrf.mxu2  ;;  %v4959_v42 = vpop.f32.mrf.mxu3 }
 0x543   :  { %v4859_v46 = vadd.f32 %v4858_v58, %v4700_v63  ;;  %v4615_v63 = vpop.f32.mrf.mxu0  ;;  %v5634_v58 = vld [vmem:[%s9382_s1 + $0x40] sm:$0xff] }
 0x545   :  { %v4956_v22 = vadd.f32 %v4955_v60, %v4859_v46 }
 0x547   :  { %v5018_v26 = vsub.f32 0.0, %v4956_v22 }
 0x549   :  { %v9030_v29 = vadd.f32 %v5632_v39, %v5018_v26 }
 0x54a   :  { %v4862_v19 = vpop.f32.mrf.mxu2  ;;  %v4963_v34 = vpop.f32.mrf.mxu3 }
 0x54b   :  { %v4863_v30 = vadd.f32 %v4862_v19, %v4706_v9  ;;  %v5051_v38 = vsel %vm5050_vm1, %v9030_v29, -inf  ;;  %v4735_v9 = vpop.f32.mrf.mxu1  ;;  %v4724_v19 = vadd.f32 %v4723_v40, %v4606_v61 }
 0x54c   :  { %5052 = vmax.xlane.f32.xlu0 %v5051_v38 }
 0x54d   :  { %v4960_v52 = vadd.f32 %v4959_v42, %v4863_v30 }
 0x54f   :  { %v5019_v11 = vsub.f32 0.0, %v4960_v52  ;;  %v4620_v52 = vpop.f32.mrf.mxu0 }
 0x551   :  { %v9038_v18 = vadd.f32 %v5633_v24, %v5019_v11  ;;  %v4611_v24 = vadd.f32 %v4610_v20, %v8983_v49  ;;  %v4616_v49 = vadd.f32 %v4615_v63, %v8988_v10 }
 0x552   :  { %v4866_v35 = vpop.f32.mrf.mxu2  ;;  %v4967_v14 = vpop.f32.mrf.mxu3 }
 0x553   :  { %v4867_v60 = vadd.f32 %v4866_v35, %v4712_v21  ;;  %v5054_v31 = vsel %vm5050_vm1, %v9038_v18, -inf  ;;  %v4741_v17 = vpop.f32.mrf.mxu1  ;;  %v4730_v40 = vadd.f32 %v4729_v59, %v4611_v24  ;;  %v5636_v35 = vld [vmem:[%s9382_s1 + $0x70] sm:$0xff]  ;;  %v4736_v59 = vadd.f32 %v4735_v9, %v4616_v49  ;;  %v5638_v9 = vld [vmem:[%s9382_s1 + $0xa0] sm:$0xff] }
 0x554   :  { %5055 = vmax.xlane.f32.xlu0 %v5054_v31 }
 0x555   :  { %v4964_v32 = vadd.f32 %v4963_v34, %v4867_v60 }
 0x557   :  { %v5020_v45 = vsub.f32 0.0, %v4964_v32 }
 0x559   :  { %v9046_v42 = vadd.f32 %v5634_v58, %v5020_v45  ;;  %v4625_v45 = vpop.f32.mrf.mxu0 }
 0x55a   :  { %v4870_v46 = vpop.f32.mrf.mxu2  ;;  %v4971_v22 = vpop.f32.mrf.mxu3 }
 0x55b   :  { %v4871_v54 = vadd.f32 %v4870_v46, %v4718_v4  ;;  %v5057_v26 = vsel %vm5050_vm1, %v9046_v42, -inf  ;;  %v4747_v58 = vpop.f32.mrf.mxu1  ;;  %v5637_v46 = vld [vmem:[%s9382_s1 + $0x88] sm:$0xff] }
 0x55c   :  { %5058 = vmax.xlane.f32.xlu1 %v5057_v26 }
 0x55d   :  { %v4968_v39 = vadd.f32 %v4967_v14, %v4871_v54 }
 0x55f   :  { %v5021_v2 = vsub.f32 0.0, %v4968_v39 }
 0x561   :  { %v9054_v34 = vadd.f32 %v5635_v15, %v5021_v2  ;;  %v4630_v10 = vpop.f32.mrf.mxu0 }
 0x562   :  { %v4874_v30 = vpop.f32.mrf.mxu2  ;;  %v4975_v38 = vpop.f32.mrf.mxu3 }
 0x563   :  { %v4875_v1 = vadd.f32 %v4874_v30, %v4724_v19  ;;  %v5060_v11 = vsel %vm5050_vm1, %v9054_v34, -inf  ;;  %v4621_v19 = vadd.f32 %v4620_v52, %v8992_v37  ;;  %v4753_v24 = vpop.f32.mrf.mxu1  ;;  %v4626_v37 = vadd.f32 %v4625_v45, %v8996_v36 }
 0x564   :  { %5061 = vmax.xlane.f32.xlu1 %v5060_v11 }
 0x565   :  { %v4972_v21 = vadd.f32 %v4971_v22, %v4875_v1  ;;  %v4742_v15 = vadd.f32 %v4741_v17, %v4621_v19  ;;  %v4748_v17 = vadd.f32 %v4747_v58, %v4626_v37 }
 0x567   :  { %v5022_v6 = vsub.f32 0.0, %v4972_v21 }
 0x569   :  { %v9062_v14 = vadd.f32 %v5636_v35, %v5022_v6  ;;  %v5639_v35 = vld [vmem:[%s9382_s1 + $0xb8] sm:$0xff] }
 0x56a   :  { %v4878_v60 = vpop.f32.mrf.mxu2  ;;  %v4979_v31 = vpop.f32.mrf.mxu3 }
 0x56b   :  { %v4879_v32 = vadd.f32 %v4878_v60, %v4730_v40  ;;  %v5063_v25 = vsel %vm5050_vm1, %v9062_v14, -inf  ;;  %v4635_v40 = vpop.f32.mrf.mxu0  ;;  %v4759_v36 = vpop.f32.mrf.mxu1 }
 0x56c   :  { %5064 = vmax.xlane.f32.xlu2 %v5063_v25  ;;  %v4636_v19 = vadd.f32 %v4635_v40, %v9004_v47 }
 0x56d   :  { %v4976_v4 = vadd.f32 %v4975_v38, %v4879_v32 }
 0x56f   :  { %v5023_v20 = vsub.f32 0.0, %v4976_v4 }
 0x571   :  { %v9070_v22 = vadd.f32 %v5637_v46, %v5023_v20  ;;  %v4631_v20 = vadd.f32 %v4630_v10, %v9000_v8 }
 0x572   :  { %v4882_v54 = vpop.f32.mrf.mxu2  ;;  %v4983_v26 = vpop.f32.mrf.mxu3 }
 0x573   :  { %v4883_v39 = vadd.f32 %v4882_v54, %v4736_v59  ;;  %v5066_v61 = vsel %vm5050_vm1, %v9070_v22, -inf  ;;  %v4754_v59 = vadd.f32 %v4753_v24, %v4631_v20  ;;  %v4765_v10 = vpop.f32.mrf.mxu1  ;;  %v9106_v24 = vpop.xlane.xlu1 %5277 }
 0x574   :  { %5067 = vmax.xlane.f32.xlu2 %v5066_v61  ;;  %v4640_v61 = vpop.f32.mrf.mxu0 }
 0x575   :  { %v4980_v2 = vadd.f32 %v4979_v31, %v4883_v39 }
 0x577   :  { %v5024_v63 = vsub.f32 0.0, %v4980_v2 }
 0x579   :  { %v9078_v30 = vadd.f32 %v5638_v9, %v5024_v63  ;;  %v9097_v63 = vpop.xlane.xlu0 %5283 }
 0x57a   :  { %v4886_v38 = vpop.f32.mrf.mxu2  ;;  %v4987_v1 = vpop.f32.mrf.mxu3 }
 0x57b   :  { %v4887_v11 = vadd.f32 %v4886_v38, %v4742_v15  ;;  %v5069_v21 = vsel %vm5050_vm1, %v9078_v30, -inf  ;;  %v4760_v15 = vadd.f32 %v4759_v36, %v4636_v19 }
 0x57c   :  { %5070 = vmax.xlane.f32.xlu0 %v5069_v21  ;;  %v4645_v37 = vpop.f32.mrf.mxu0 }
 0x57d   :  { %v4984_v6 = vadd.f32 %v4983_v26, %v4887_v11 }
 0x57f   :  { %v5025_v52 = vsub.f32 0.0, %v4984_v6  ;;  %v4641_v6 = vadd.f32 %v4640_v61, %v9008_v48  ;;  %v4646_v48 = vadd.f32 %v4645_v37, %v9012_v12 }
 0x581   :  { %v9086_v60 = vadd.f32 %v5639_v35, %v5025_v52  ;;  %v9109_v40 = vpop.xlane.xlu0 %5340  ;;  %v5641_v35 = vld [vmem:[%s9382_s1 + $0x100] sm:$0xff] }
 0x582   :  { %v4890_v31 = vpop.f32.mrf.mxu2  ;;  %v4991_v32 = vpop.f32.mrf.mxu3 }
 0x583   :  { %v4891_v25 = vadd.f32 %v4890_v31, %v4748_v17  ;;  %v5072_v4 = vsel %vm5050_vm1, %v9086_v60, -inf  ;;  %v4766_v17 = vadd.f32 %v4765_v10, %v4641_v6 }
 0x584   :  { %5073 = vmax.xlane.f32.xlu1 %v5072_v4 }
 0x585   :  { %v4988_v49 = vadd.f32 %v4987_v1, %v4891_v25 }
 0x587   :  { %v5026_v45 = vsub.f32 0.0, %v4988_v49 }
 0x589   :  { %v9092_v58 = vadd.f32 %v5026_v45, %v8780_v3  ;;  %v5640_v3 = vld [vmem:[%s9382_s1 + $0xe8] sm:$0xff]  ;;  %v9119_v45 = vpop.xlane.xlu1 %5286  ;;  %v9124_v61 = vpop.xlane.xlu0 %5349 }
 0x58a   :  { %v4894_v46 = vpop.f32.mrf.mxu2  ;;  %v4995_v54 = vpop.f32.mrf.mxu3 }
 0x58b   :  { %v4895_v26 = vadd.f32 %v4894_v46, %v4754_v59  ;;  %v5075_v39 = vsel %vm5050_vm1, %v9092_v58, -inf  ;;  %v4650_v46 = vpop.f32.mrf.mxu0 }
 0x58c   :  { %5076 = vmax.xlane.f32.xlu2 %v5075_v39  ;;  %v4651_v12 = vadd.f32 %v4650_v46, %v9016_v50 }
 0x58d   :  { %v4992_v2 = vadd.f32 %v4991_v32, %v4895_v26  ;;  %v4771_v32 = vpop.f32.mrf.mxu1 }
 0x58f   :  { %v5027_v8 = vsub.f32 0.0, %v4992_v2 }
 0x591   :  { %v9102_v9 = vadd.f32 %v5640_v3, %v5027_v8 }
 0x592   :  { %v4898_v38 = vpop.f32.mrf.mxu2  ;;  %v4999_v21 = vpop.f32.mrf.mxu3 }
 0x593   :  { %v4899_v1 = vadd.f32 %v4898_v38, %v4760_v15  ;;  %v5078_v11 = vsel %vm5050_vm1, %v9102_v9, -inf  ;;  %v9129_v38 = vpop.xlane.xlu1 %5343 }
 0x594   :  { %5079 = vmax.xlane.f32.xlu0 %v5078_v11 }
 0x595   :  { %v4996_v47 = vadd.f32 %v4995_v54, %v4899_v1  ;;  %v4772_v54 = vadd.f32 %v4771_v32, %v4646_v48  ;;  %v4777_v8 = vpop.f32.mrf.mxu1  ;;  %v9139_v32 = vpop.xlane.xlu2 %5280 }
 0x596   :  { %v4778_v1 = vadd.f32 %v4777_v8, %v4651_v12  ;;  %v5303_v12 = vsub.f32 %v8922_v13, %v9139_v32 }
 0x597   :  { %v5028_v52 = vsub.f32 0.0, %v4996_v47 }
 0x599   :  { %v9114_v31 = vadd.f32 %v5641_v35, %v5028_v52  ;;  %v9136_v52 = vpop.xlane.xlu0 %5358 }
 0x59a   :  { %v4902_v25 = vpop.f32.mrf.mxu2  ;;  %v5003_v36 = vpop.f32.mrf.mxu3 }
 0x59b   :  { %v4903_v4 = vadd.f32 %v4902_v25, %v4766_v17  ;;  %v5081_v49 = vsel %vm5050_vm1, %v9114_v31, -inf }
 0x59c   :  { %5082 = vmax.xlane.f32.xlu1 %v5081_v49 }
 0x59d   :  { %v5000_v20 = vadd.f32 %v4999_v21, %v4903_v4  ;;  %v4655_v21 = vpop.f32.mrf.mxu0  ;;  %v4783_v35 = vpop.f32.mrf.mxu1  ;;  %v5302_v4 = vsub.f32 %v8877_v27, %v9106_v24 }
 0x59e   :  { %v4656_v50 = vadd.f32 %v4655_v21, %v9020_v16 }
 0x59f   :  { %v5029_v59 = vsub.f32 0.0, %v5000_v20 }
 0x5a0   :  { %v4784_v49 = vadd.f32 %v4783_v35, %v4656_v50 }
 0x5a1   :  { %v9122_v26 = vadd.f32 %v5029_v59, %v8877_v27  ;;  %v9146_v59 = vpop.xlane.xlu1 %5352  ;;  %v9151_v8 = vpop.xlane.xlu0 %5367 }
 0x5a2   :  { %v4906_v39 = vpop.f32.mrf.mxu2  ;;  %v5007_v3 = vpop.f32.mrf.mxu3 }
 0x5a3   :  { %v4907_v2 = vadd.f32 %v4906_v39, %v4772_v54  ;;  %v5084_v19 = vsel %vm5050_vm1, %v9122_v26, -inf  ;;  %v5329_v39 = vmul.f32 1.442695, %v5302_v4 }
 0x5a4   :  { %5085 = vmax.xlane.f32.xlu2 %v5084_v19 }
 0x5a5   :  { %v5004_v10 = vadd.f32 %v5003_v36, %v4907_v2  ;;  %v4660_v16 = vpop.f32.mrf.mxu0  ;;  %5526 = vpow2.f32 %v5329_v39 }
 0x5a6   :  { %v4661_v19 = vadd.f32 %v4660_v16, %v9023_v44  ;;  %v5331_v44 = vmul.f32 1.442695, %v5303_v12 }
 0x5a7   :  { %v5030_v15 = vsub.f32 0.0, %v5004_v10  ;;  %v4789_v10 = vpop.f32.mrf.mxu1 }
 0x5a8   :  { %5528 = vpow2.f32 %v5331_v44 }
 0x5a9   :  { %v9132_v11 = vadd.f32 %v5030_v15, %v8922_v13  ;;  %v9155_v15 = vpop.xlane.xlu2 %5289 }
 0x5aa   :  { %v4910_v47 = vpop.f32.mrf.mxu2  ;;  %v5011_v48 = vpop.f32.mrf.mxu3 }
 0x5ab   :  { %v4911_v6 = vadd.f32 %v4910_v47, %v4778_v1  ;;  %v5087_v37 = vsel %vm5050_vm1, %v9132_v11, -inf  ;;  %v5527_v35 = vpop.eup %5526 }
 0x5ac   :  { %5088 = vmax.xlane.f32.xlu0 %v5087_v37 }
 0x5ad   :  { %v5008_v17 = vadd.f32 %v5007_v3, %v4911_v6  ;;  %v4790_v3 = vadd.f32 %v4789_v10, %v4661_v19 }
 0x5ae   :  { %v5529_v16 = vpop.eup %5528 }
 0x5af   :  { %v5031_v25 = vsub.f32 0.0, %v5008_v17  ;;  %v9162_v17 = vpop.xlane.xlu1 %5361  ;;  %v5375_v19 = vsel %vm5050_vm1, %v5529_v16, 0.0 }
 0x5b1   :  { %v9144_v20 = vadd.f32 %v5031_v25, %v8901_v41 }
 0x5b2   :  { %v4914_v36 = vpop.f32.mrf.mxu2  ;;  %v5015_v37 = vpop.f32.mrf.mxu3 }
 0x5b3   :  { %v4915_v46 = vadd.f32 %v4914_v36, %v4784_v49  ;;  %v5090_v54 = vsel %vm5050_vm1, %v9144_v20, -inf  ;;  %v5372_v49 = vsel %vm5050_vm1, %v5527_v35, 0.0 }
 0x5b4   :  { %5091 = vmax.xlane.f32.xlu1 %v5090_v54 }
 0x5b5   :  { %v5012_v2 = vadd.f32 %v5011_v48, %v4915_v46  ;;  %v9172_v46 = vpop.xlane.xlu2 %5346 }
 0x5b7   :  { %v5032_v27 = vsub.f32 0.0, %v5012_v2  ;;  %v9176_v39 = vpop.xlane.xlu1 %5370 }
 0x5b9   :  { %v9158_v1 = vadd.f32 %v5032_v27, %v8896_v5 }
 0x5ba   :  { %v4918_v21 = vpop.f32.mrf.mxu2 }
 0x5bb   :  { %v4919_v47 = vadd.f32 %v4918_v21, %v4790_v3  ;;  %v5093_v6 = vsel %vm5050_vm1, %v9158_v1, -inf }
 0x5bc   :  { %5094 = vmax.xlane.f32.xlu2 %v5093_v6 }
 0x5bd   :  { %v5016_v50 = vadd.f32 %v5015_v37, %v4919_v47  ;;  %v9184_v3 = vpop.xlane.xlu2 %5355 }
 0x5bf   :  { %v5033_v25 = vsub.f32 0.0, %v5016_v50  ;;  %v9164_v13 = vpop.xlane.xlu0 %5052 }
 0x5c0   :  { %v5099_v4 = vsub.f32 %v9030_v29, %v9164_v13 }
 0x5c1   :  { %v9170_v48 = vadd.f32 %v5033_v25, %v8947_v7 }
 0x5c2   :  { %v5115_v36 = vmul.f32 1.442695, %v5099_v4 }
 0x5c3   :  { %v5096_v54 = vsel %vm5050_vm1, %v9170_v48, -inf }
 0x5c4   :  { %5530 = vpow2.f32 %v5115_v36  ;;  %5373 = vadd.xlane.f32.xlu2 %v5372_v49  ;;  %5097 = vmax.xlane.f32.xlu0 %v5096_v54 }
 0x5c5   :  { %v9191_v37 = vpop.xlane.xlu2 %5364 }
 0x5c7   :  { %v9178_v2 = vpop.xlane.xlu0 %5055 }
 0x5c8   :  { %v5100_v29 = vsub.f32 %v9038_v18, %v9178_v2 }
 0x5ca   :  { %v5531_v27 = vpop.eup %5530  ;;  %v5117_v10 = vmul.f32 1.442695, %v5100_v29 }
 0x5cb   :  { %v5147_v12 = vsel %vm5050_vm1, %v5531_v27, 0.0 }
 0x5cc   :  { %5532 = vpow2.f32 %v5117_v10  ;;  %5148 = vadd.xlane.f32.xlu1 %v5147_v12  ;;  %5376 = vadd.xlane.f32.xlu0 %v5375_v19 }
 0x5cf   :  { %v9186_v21 = vpop.xlane.xlu1 %5058 }
 0x5d0   :  { %v5101_v47 = vsub.f32 %v9046_v42, %v9186_v21 }
 0x5d2   :  { %v5533_v6 = vpop.eup %5532  ;;  %v5119_v44 = vmul.f32 1.442695, %v5101_v47 }
 0x5d3   :  { %v5150_v18 = vsel %vm5050_vm1, %v5533_v6, 0.0 }
 0x5d4   :  { %5534 = vpow2.f32 %v5119_v44  ;;  %5151 = vadd.xlane.f32.xlu2 %v5150_v18 }
 0x5d7   :  { %v9193_v50 = vpop.xlane.xlu1 %5061 }
 0x5d8   :  { %v5102_v35 = vsub.f32 %v9054_v34, %v9193_v50 }
 0x5da   :  { %v5535_v25 = vpop.eup %5534  ;;  %v5121_v4 = vmul.f32 1.442695, %v5102_v35 }
 0x5db   :  { %v5153_v49 = vsel %vm5050_vm1, %v5535_v25, 0.0 }
 0x5dc   :  { %5536 = vpow2.f32 %v5121_v4  ;;  %5154 = vadd.xlane.f32.xlu0 %v5153_v49 }
 0x5df   :  { %v9198_v42 = vpop.xlane.xlu2 %5064 }
 0x5e0   :  { %v5103_v36 = vsub.f32 %v9062_v14, %v9198_v42 }
 0x5e2   :  { %v5537_v54 = vpop.eup %5536  ;;  %v5123_v16 = vmul.f32 1.442695, %v5103_v36 }
 0x5e3   :  { %v5156_v29 = vsel %vm5050_vm1, %v5537_v54, 0.0 }
 0x5e4   :  { %5538 = vpow2.f32 %v5123_v16  ;;  %5157 = vadd.xlane.f32.xlu1 %v5156_v29 }
 0x5e7   :  { %v9203_v19 = vpop.xlane.xlu2 %5067 }
 0x5e8   :  { %v5104_v34 = vsub.f32 %v9070_v22, %v9203_v19 }
 0x5ea   :  { %v5539_v27 = vpop.eup %5538  ;;  %v5125_v10 = vmul.f32 1.442695, %v5104_v34 }
 0x5eb   :  { %v5159_v12 = vsel %vm5050_vm1, %v5539_v27, 0.0 }
 0x5ec   :  { %5540 = vpow2.f32 %v5125_v10  ;;  %5160 = vadd.xlane.f32.xlu2 %v5159_v12 }
 0x5ef   :  { %v9208_v47 = vpop.xlane.xlu0 %5070 }
 0x5f0   :  { %v5105_v14 = vsub.f32 %v9078_v30, %v9208_v47 }
 0x5f2   :  { %v5541_v6 = vpop.eup %5540  ;;  %v5127_v44 = vmul.f32 1.442695, %v5105_v14 }
 0x5f3   :  { %v5162_v18 = vsel %vm5050_vm1, %v5541_v6, 0.0 }
 0x5f4   :  { %5542 = vpow2.f32 %v5127_v44  ;;  %5163 = vadd.xlane.f32.xlu0 %v5162_v18 }
 0x5f7   :  { %v9213_v35 = vpop.xlane.xlu1 %5073 }
 0x5f8   :  { %v5106_v22 = vsub.f32 %v9086_v60, %v9213_v35 }
 0x5fa   :  { %v5543_v25 = vpop.eup %5542  ;;  %v5129_v4 = vmul.f32 1.442695, %v5106_v22 }
 0x5fb   :  { %v5165_v49 = vsel %vm5050_vm1, %v5543_v25, 0.0 }
 0x5fc   :  { %5544 = vpow2.f32 %v5129_v4  ;;  %5166 = vadd.xlane.f32.xlu1 %v5165_v49 }
 0x5ff   :  { %v9218_v36 = vpop.xlane.xlu2 %5076 }
 0x600   :  { %v5107_v30 = vsub.f32 %v9092_v58, %v9218_v36 }
 0x602   :  { %v5545_v54 = vpop.eup %5544  ;;  %v5131_v16 = vmul.f32 1.442695, %v5107_v30 }
 0x603   :  { %v5168_v29 = vsel %vm5050_vm1, %v5545_v54, 0.0 }
 0x604   :  { %5546 = vpow2.f32 %v5131_v16  ;;  %5169 = vadd.xlane.f32.xlu2 %v5168_v29 }
 0x607   :  { %v9223_v34 = vpop.xlane.xlu0 %5079 }
 0x608   :  { %v5108_v60 = vsub.f32 %v9102_v9, %v9223_v34 }
 0x60a   :  { %v5547_v27 = vpop.eup %5546  ;;  %v5133_v10 = vmul.f32 1.442695, %v5108_v60 }
 0x60b   :  { %v5171_v12 = vsel %vm5050_vm1, %v5547_v27, 0.0 }
 0x60c   :  { %5548 = vpow2.f32 %v5133_v10  ;;  %5172 = vadd.xlane.f32.xlu0 %v5171_v12  ;;  %v5306_v10 = vsub.f32 %v8947_v7, %v9155_v15 }
 0x60f   :  { %v9228_v14 = vpop.xlane.xlu1 %5082 }
 0x610   :  { %v5109_v58 = vsub.f32 %v9114_v31, %v9228_v14 }
 0x612   :  { %v5549_v6 = vpop.eup %5548  ;;  %v5135_v44 = vmul.f32 1.442695, %v5109_v58 }
 0x613   :  { %v5174_v18 = vsel %vm5050_vm1, %v5549_v6, 0.0 }
 0x614   :  { %5550 = vpow2.f32 %v5135_v44  ;;  %5175 = vadd.xlane.f32.xlu1 %v5174_v18 }
 0x617   :  { %v9233_v22 = vpop.xlane.xlu2 %5085 }
 0x618   :  { %v5110_v9 = vsub.f32 %v9122_v26, %v9233_v22 }
 0x61a   :  { %v5551_v25 = vpop.eup %5550  ;;  %v5137_v4 = vmul.f32 1.442695, %v5110_v9  ;;  %v5304_v9 = vsub.f32 %v8901_v41, %v9097_v63 }
 0x61b   :  { %v5177_v49 = vsel %vm5050_vm1, %v5551_v25, 0.0 }
 0x61c   :  { %5552 = vpow2.f32 %v5137_v4  ;;  %5178 = vadd.xlane.f32.xlu2 %v5177_v49  ;;  %v5333_v7 = vmul.f32 1.442695, %v5304_v9 }
 0x61f   :  { %v9238_v30 = vpop.xlane.xlu0 %5088 }
 0x620   :  { %v5111_v31 = vsub.f32 %v9132_v11, %v9238_v30  ;;  %v5337_v11 = vmul.f32 1.442695, %v5306_v10 }
 0x622   :  { %v5553_v54 = vpop.eup %5552  ;;  %v5139_v16 = vmul.f32 1.442695, %v5111_v31 }
 0x623   :  { %v5180_v29 = vsel %vm5050_vm1, %v5553_v54, 0.0 }
 0x624   :  { %5554 = vpow2.f32 %v5139_v16  ;;  %5181 = vadd.xlane.f32.xlu0 %v5180_v29 }
 0x627   :  { %v9243_v60 = vpop.xlane.xlu1 %5091 }
 0x628   :  { %v5112_v26 = vsub.f32 %v9144_v20, %v9243_v60 }
 0x62a   :  { %v5555_v27 = vpop.eup %5554  ;;  %v5141_v12 = vmul.f32 1.442695, %v5112_v26 }
 0x62b   :  { %v5183_v58 = vsel %vm5050_vm1, %v5555_v27, 0.0 }
 0x62c   :  { %5556 = vpow2.f32 %v5141_v12  ;;  %5184 = vadd.xlane.f32.xlu1 %v5183_v58 }
 0x62d   :  { %5558 = vpow2.f32 %v5337_v11 }
 0x62f   :  { %v9250_v6 = vpop.xlane.xlu2 %5094 }
 0x630   :  { %v5113_v44 = vsub.f32 %v9158_v1, %v9250_v6  ;;  %v5305_v1 = vsub.f32 %v8896_v5, %v9119_v45 }
 0x632   :  { %v5557_v18 = vpop.eup %5556  ;;  %v5143_v20 = vmul.f32 1.442695, %v5113_v44  ;;  %v5335_v26 = vmul.f32 1.442695, %v5305_v1 }
 0x633   :  { %v5186_v25 = vsel %vm5050_vm1, %v5557_v18, 0.0  ;;  %v5559_v49 = vpop.eup %5558 }
 0x634   :  { %5560 = vpow2.f32 %v5143_v20  ;;  %5187 = vadd.xlane.f32.xlu0 %v5186_v25  ;;  %v5384_v29 = vsel %vm5050_vm1, %v5559_v49, 0.0 }
 0x635   :  { %5562 = vpow2.f32 %v5333_v7 }
 0x636   :  { %5564 = vlog2.f32 %v9109_v40 }
 0x637   :  { %v9257_v4 = vpop.xlane.xlu0 %5097  ;;  %v9266_v27 = vpop.xlane.xlu2 %5373 }
 0x638   :  { %v5114_v31 = vsub.f32 %v9170_v48, %v9257_v4 }
 0x63a   :  { %v5561_v54 = vpop.eup %5560  ;;  %v5145_v16 = vmul.f32 1.442695, %v5114_v31 }
 0x63b   :  { %v5189_v41 = vsel %vm5050_vm1, %v5561_v54, 0.0  ;;  %v5563_v48 = vpop.eup %5562 }
 0x63c   :  { %5566 = vpow2.f32 %v5145_v16  ;;  %5190 = vadd.xlane.f32.xlu1 %v5189_v41  ;;  %5385 = vadd.xlane.f32.xlu0 %v5384_v29  ;;  %v5565_v12 = vpop.eup %5564  ;;  %v5378_v5 = vsel %vm5050_vm1, %v5563_v48, 0.0 }
 0x63d   :  { %v5388_v11 = vmul.f32 0.6931472, %v5565_v12 }
 0x63f   :  { %v5149_v10 = vpop.xlane.xlu1 %5148  ;;  %v9271_v9 = vpop.xlane.xlu0 %5376  ;;  %v5419_v7 = vadd.f32 %v5388_v11, %v8889_v51 }
 0x640   :  { %5568 = vlog2.f32 %v5149_v10 }
 0x641   :  { %5570 = vpow2.f32 %v5335_v26 }
 0x642   :  { %v5567_v58 = vpop.eup %5566  ;;  %5572 = vlog2.f32 %v9129_v38 }
 0x643   :  { %v5192_v40 = vsel %vm5050_vm1, %v5567_v58, 0.0 }
 0x644   :  { %5379 = vadd.xlane.f32.xlu1 %v5378_v5  ;;  %5193 = vadd.xlane.f32.xlu2 %v5192_v40 }
 0x646   :  { %v5569_v44 = vpop.eup %5568 }
 0x647   :  { %v5196_v18 = vmul.f32 0.6931472, %v5569_v44  ;;  %v5152_v20 = vpop.xlane.xlu2 %5151  ;;  %v5571_v25 = vpop.eup %5570 }
 0x648   :  { %5574 = vlog2.f32 %v5152_v20  ;;  %v5573_v31 = vpop.eup %5572  ;;  %v5381_v1 = vsel %vm5050_vm1, %v5571_v25, 0.0 }
 0x649   :  { %v5227_v49 = vadd.f32 %v5196_v18, %v9164_v13  ;;  %5576 = vlog2.f32 %v9172_v46  ;;  %v5390_v38 = vmul.f32 0.6931472, %v5573_v31 }
 0x64b   :  { %v5435_v54 = vsub.f32 %v5419_v7, %v5227_v49  ;;  %v5420_v51 = vadd.f32 %v5390_v38, %v8885_v57 }
 0x64c   :  { %5382 = vadd.xlane.f32.xlu2 %v5381_v1 }
 0x64d   :  { %5452 = vst.msk [vmem:[%s9387_s6] sm:$0xff] %vm5451_vm2, %v5435_v54 }
 0x64e   :  { %v5575_v16 = vpop.eup %5574 }
 0x64f   :  { %v5198_v41 = vmul.f32 0.6931472, %v5575_v16  ;;  %v5155_v29 = vpop.xlane.xlu0 %5154  ;;  %v5577_v26 = vpop.eup %5576 }
 0x650   :  { %5578 = vlog2.f32 %v5155_v29  ;;  %v5392_v46 = vmul.f32 0.6931472, %v5577_v26 }
 0x651   :  { %v5228_v13 = vadd.f32 %v5198_v41, %v9178_v2  ;;  %5580 = vlog2.f32 %v9124_v61 }
 0x652   :  { %v5421_v5 = vadd.f32 %v5392_v46, %v8930_v43 }
 0x653   :  { %v5436_v10 = vsub.f32 %v5420_v51, %v5228_v13 }
 0x655   :  { %5453 = vst.msk [vmem:[%s9387_s6 + $0x8] sm:$0xff] %vm5451_vm2, %v5436_v10 }
 0x656   :  { %v5579_v48 = vpop.eup %5578 }
 0x657   :  { %v5200_v12 = vmul.f32 0.6931472, %v5579_v48  ;;  %v5158_v58 = vpop.xlane.xlu1 %5157  ;;  %v5581_v40 = vpop.eup %5580 }
 0x658   :  { %5582 = vlog2.f32 %v5158_v58  ;;  %v5394_v11 = vmul.f32 0.6931472, %v5581_v40 }
 0x659   :  { %v5229_v57 = vadd.f32 %v5200_v12, %v9186_v21  ;;  %5584 = vlog2.f32 %v9146_v59 }
 0x65a   :  { %v5422_v20 = vadd.f32 %v5394_v11, %v8915_v33 }
 0x65b   :  { %v5437_v2 = vsub.f32 %v5421_v5, %v5229_v57 }
 0x65d   :  { %5454 = vst.msk [vmem:[%s9387_s6 + $0x10] sm:$0xff] %vm5451_vm2, %v5437_v2 }
 0x65e   :  { %v5583_v61 = vpop.eup %5582 }
 0x65f   :  { %v5202_v44 = vmul.f32 0.6931472, %v5583_v61  ;;  %v5161_v18 = vpop.xlane.xlu2 %5160  ;;  %v5585_v25 = vpop.eup %5584 }
 0x660   :  { %5586 = vlog2.f32 %v5161_v18  ;;  %v5396_v7 = vmul.f32 0.6931472, %v5585_v25 }
 0x661   :  { %v5230_v43 = vadd.f32 %v5202_v44, %v9193_v50  ;;  %5588 = vlog2.f32 %v9184_v3 }
 0x662   :  { %v5423_v54 = vadd.f32 %v5396_v7, %v8911_v55 }
 0x663   :  { %v5438_v21 = vsub.f32 %v5422_v20, %v5230_v43 }
 0x665   :  { %5455 = vst.msk [vmem:[%s9387_s6 + $0x18] sm:$0xff] %vm5451_vm2, %v5438_v21 }
 0x666   :  { %v5587_v59 = vpop.eup %5586 }
 0x667   :  { %v5204_v49 = vmul.f32 0.6931472, %v5587_v59  ;;  %v5164_v31 = vpop.xlane.xlu0 %5163  ;;  %v5589_v1 = vpop.eup %5588 }
 0x668   :  { %5590 = vlog2.f32 %v5164_v31  ;;  %v5398_v38 = vmul.f32 0.6931472, %v5589_v1 }
 0x669   :  { %v5231_v33 = vadd.f32 %v5204_v49, %v9198_v42  ;;  %5592 = vlog2.f32 %v9136_v52 }
 0x66a   :  { %v5424_v29 = vadd.f32 %v5398_v38, %v8955_v23 }
 0x66b   :  { %v5439_v50 = vsub.f32 %v5423_v54, %v5231_v33 }
 0x66d   :  { %5456 = vst.msk [vmem:[%s9387_s6 + $0x20] sm:$0xff] %vm5451_vm2, %v5439_v50 }
 0x66e   :  { %v5591_v3 = vpop.eup %5590 }
 0x66f   :  { %v5206_v16 = vmul.f32 0.6931472, %v5591_v3  ;;  %v5167_v41 = vpop.xlane.xlu1 %5166  ;;  %v5593_v51 = vpop.eup %5592 }
 0x670   :  { %5594 = vlog2.f32 %v5167_v41  ;;  %v5400_v13 = vmul.f32 0.6931472, %v5593_v51 }
 0x671   :  { %v5232_v55 = vadd.f32 %v5206_v16, %v9203_v19  ;;  %5596 = vlog2.f32 %v9162_v17 }
 0x672   :  { %v5425_v46 = vadd.f32 %v5400_v13, %v8940_v53 }
 0x673   :  { %v5440_v42 = vsub.f32 %v5424_v29, %v5232_v55 }
 0x675   :  { %5457 = vst.msk [vmem:[%s9387_s6 + $0x28] sm:$0xff] %vm5451_vm2, %v5440_v42 }
 0x676   :  { %v5595_v52 = vpop.eup %5594 }
 0x677   :  { %v5208_v26 = vmul.f32 0.6931472, %v5595_v52  ;;  %v5170_v10 = vpop.xlane.xlu2 %5169  ;;  %v5597_v48 = vpop.eup %5596 }
 0x678   :  { %5598 = vlog2.f32 %v5170_v10  ;;  %v5402_v12 = vmul.f32 0.6931472, %v5597_v48 }
 0x679   :  { %v5233_v23 = vadd.f32 %v5208_v26, %v9208_v47  ;;  %5600 = vlog2.f32 %v9191_v37 }
 0x67a   :  { %v5426_v57 = vadd.f32 %v5402_v12, %v8936_v28 }
 0x67b   :  { %v5441_v19 = vsub.f32 %v5425_v46, %v5233_v23 }
 0x67d   :  { %5458 = vst.msk [vmem:[%s9387_s6 + $0x30] sm:$0xff] %vm5451_vm2, %v5441_v19 }
 0x67e   :  { %v5599_v17 = vpop.eup %5598 }
 0x67f   :  { %v5210_v58 = vmul.f32 0.6931472, %v5599_v17  ;;  %v5173_v5 = vpop.xlane.xlu0 %5172  ;;  %v5601_v40 = vpop.eup %5600 }
 0x680   :  { %5602 = vlog2.f32 %v5173_v5  ;;  %v5404_v2 = vmul.f32 0.6931472, %v5601_v40 }
 0x681   :  { %v5234_v53 = vadd.f32 %v5210_v58, %v9213_v35  ;;  %5604 = vlog2.f32 %v9151_v8 }
 0x682   :  { %v5427_v44 = vadd.f32 %v5404_v2, %v8974_v62 }
 0x683   :  { %v5442_v47 = vsub.f32 %v5426_v57, %v5234_v53 }
 0x685   :  { %5459 = vst.msk [vmem:[%s9387_s6 + $0x38] sm:$0xff] %vm5451_vm2, %v5442_v47 }
 0x686   :  { %v5603_v37 = vpop.eup %5602 }
 0x687   :  { %v5212_v11 = vmul.f32 0.6931472, %v5603_v37  ;;  %v5176_v61 = vpop.xlane.xlu1 %5175  ;;  %v5605_v18 = vpop.eup %5604 }
 0x688   :  { %5606 = vlog2.f32 %v5176_v61  ;;  %v5406_v20 = vmul.f32 0.6931472, %v5605_v18 }
 0x689   :  { %v5235_v28 = vadd.f32 %v5212_v11, %v9218_v36  ;;  %5608 = vlog2.f32 %v9176_v39 }
 0x68a   :  { %v5428_v21 = vadd.f32 %v5406_v20, %v8965_v56 }
 0x68b   :  { %v5443_v35 = vsub.f32 %v5427_v44, %v5235_v28 }
 0x68d   :  { %5460 = vst.msk [vmem:[%s9387_s6 + $0x40] sm:$0xff] %vm5451_vm2, %v5443_v35 }
 0x68e   :  { %v5607_v8 = vpop.eup %5606 }
 0x68f   :  { %v5214_v43 = vmul.f32 0.6931472, %v5607_v8  ;;  %v5179_v25 = vpop.xlane.xlu2 %5178  ;;  %v5609_v7 = vpop.eup %5608 }
 0x690   :  { %5610 = vlog2.f32 %v5179_v25  ;;  %v5408_v59 = vmul.f32 0.6931472, %v5609_v7 }
 0x691   :  { %v5236_v62 = vadd.f32 %v5214_v43, %v9223_v34  ;;  %5612 = vlog2.f32 %v9266_v27 }
 0x692   :  { %v5429_v54 = vadd.f32 %v5408_v59, %v8961_v0 }
 0x693   :  { %v5444_v36 = vsub.f32 %v5428_v21, %v5236_v62 }
 0x695   :  { %5461 = vst.msk [vmem:[%s9387_s6 + $0x48] sm:$0xff] %vm5451_vm2, %v5444_v36 }
 0x696   :  { %v5611_v39 = vpop.eup %5610 }
 0x697   :  { %v5216_v49 = vmul.f32 0.6931472, %v5611_v39  ;;  %v5182_v31 = vpop.xlane.xlu0 %5181  ;;  %v5613_v33 = vpop.eup %5612 }
 0x698   :  { %5614 = vlog2.f32 %v5182_v31  ;;  %v5410_v1 = vmul.f32 0.6931472, %v5613_v33 }
 0x699   :  { %v5237_v56 = vadd.f32 %v5216_v49, %v9228_v14  ;;  %5616 = vlog2.f32 %v9271_v9 }
 0x69a   :  { %v5430_v3 = vadd.f32 %v5410_v1, %v9106_v24 }
 0x69b   :  { %v5445_v34 = vsub.f32 %v5429_v54, %v5237_v56 }
 0x69d   :  { %5462 = vst.msk [vmem:[%s9387_s6 + $0x50] sm:$0xff] %vm5451_vm2, %v5445_v34 }
 0x69e   :  { %v5615_v27 = vpop.eup %5614 }
 0x69f   :  { %v5218_v50 = vmul.f32 0.6931472, %v5615_v27  ;;  %v5185_v38 = vpop.xlane.xlu1 %5184  ;;  %v5617_v16 = vpop.eup %5616 }
 0x6a0   :  { %5618 = vlog2.f32 %v5185_v38  ;;  %v5412_v41 = vmul.f32 0.6931472, %v5617_v16 }
 0x6a1   :  { %v5238_v0 = vadd.f32 %v5218_v50, %v9233_v22 }
 0x6a2   :  { %v5431_v51 = vadd.f32 %v5412_v41, %v9139_v32 }
 0x6a3   :  { %v5446_v14 = vsub.f32 %v5430_v3, %v5238_v0 }
 0x6a5   :  { %5463 = vst.msk [vmem:[%s9387_s6 + $0x58] sm:$0xff] %vm5451_vm2, %v5446_v14 }
 0x6a6   :  { %v5619_v9 = vpop.eup %5618 }
 0x6a7   :  { %v5220_v29 = vmul.f32 0.6931472, %v5619_v9  ;;  %v5188_v55 = vpop.xlane.xlu0 %5187 }
 0x6a8   :  { %5620 = vlog2.f32 %v5188_v55 }
 0x6a9   :  { %v5239_v42 = vadd.f32 %v5220_v29, %v9238_v30 }
 0x6ab   :  { %v5447_v13 = vsub.f32 %v5431_v51, %v5239_v42 }
 0x6ad   :  { %5464 = vst.msk [vmem:[%s9387_s6 + $0x60] sm:$0xff] %vm5451_vm2, %v5447_v13 }
 0x6ae   :  { %v5621_v10 = vpop.eup %5620 }
 0x6af   :  { %v5191_v24 = vpop.xlane.xlu1 %5190  ;;  %v5386_v22 = vpop.xlane.xlu0 %5385  ;;  %v5222_v32 = vmul.f32 0.6931472, %v5621_v10 }
 0x6b0   :  { %5622 = vlog2.f32 %v5386_v22 }
 0x6b1   :  { %v5240_v58 = vadd.f32 %v5222_v32, %v9243_v60 }
 0x6b6   :  { %v5623_v46 = vpop.eup %5622 }
 0x6b7   :  { %v5380_v52 = vpop.xlane.xlu1 %5379  ;;  %v5194_v26 = vpop.xlane.xlu2 %5193  ;;  %v5418_v30 = vmul.f32 0.6931472, %v5623_v46 }
 0x6b8   :  { %5624 = vlog2.f32 %v5380_v52 }
 0x6b9   :  { %5626 = vlog2.f32 %v5194_v26  ;;  %v5434_v53 = vadd.f32 %v5418_v30, %v9155_v15 }
 0x6ba   :  { %5628 = vlog2.f32 %v5191_v24 }
 0x6be   :  { %v5625_v23 = vpop.eup %5624 }
 0x6bf   :  { %v5627_v48 = vpop.eup %5626  ;;  %v5414_v19 = vmul.f32 0.6931472, %v5625_v23  ;;  %v5383_v12 = vpop.xlane.xlu2 %5382 }
 0x6c0   :  { %v5226_v17 = vmul.f32 0.6931472, %v5627_v48  ;;  %5630 = vlog2.f32 %v5383_v12  ;;  %v5629_v57 = vpop.eup %5628 }
 0x6c1   :  { %v5432_v5 = vadd.f32 %v5414_v19, %v9097_v63  ;;  %v5224_v37 = vmul.f32 0.6931472, %v5629_v57 }
 0x6c2   :  { %v5242_v40 = vadd.f32 %v5226_v17, %v9257_v4 }
 0x6c3   :  { %v5448_v47 = vsub.f32 %v5432_v5, %v5240_v58  ;;  %v5241_v60 = vadd.f32 %v5224_v37, %v9250_v6 }
 0x6c4   :  { %v5450_v2 = vsub.f32 %v5434_v53, %v5242_v40 }
 0x6c5   :  { %5465 = vst.msk [vmem:[%s9387_s6 + $0x68] sm:$0xff] %vm5451_vm2, %v5448_v47 }
 0x6c6   :  { %v5631_v11 = vpop.eup %5630  ;;  %5467 = vst.msk [vmem:[%s9387_s6 + $0x78] sm:$0xff] %vm5451_vm2, %v5450_v2 }
 0x6c7   :  { %v5416_v63 = vmul.f32 0.6931472, %v5631_v11 }
 0x6c9   :  { %v5433_v15 = vadd.f32 %v5416_v63, %v9119_v45 }
 0x6cb   :  { %v5449_v4 = vsub.f32 %v5433_v15, %v5241_v60 }
 0x6cd   :  { %5466 = vst.msk [vmem:[%s9387_s6 + $0x70] sm:$0xff] %vm5451_vm2, %v5449_v4 }

</bundles_post_ra>
